<compile_context>
chip_gen: v5e
topology: v5e:2x2
jax: 0.10.0
libtpu: 0.0.40
codegen_flags: <defaults>
</compile_context>

<pallas_src>
import functools

import numpy as np
import jax
import jax.numpy as jnp
from jax import lax
from jax.experimental import pallas as pl
from jax.experimental.pallas import tpu as pltpu


def _reflect(p, n):
    # torch 'reflect' padding with pad=1 (edge excluded): -1 -> 1, n -> n-2
    if p < 0:
        return -p
    if p >= n:
        return 2 * n - 2 - p
    return p


def _shift_mats(H, W):
    """(9, HW, HW) 0/1 matrices M[k] such that (x_flat @ M[k]) is the
    reflect-padded 3x3 tap k (k = ky*3 + kx) of the image, flattened."""
    HW = H * W
    m = np.zeros((9, HW, HW), np.float32)
    for ky in range(3):
        for kx in range(3):
            k = ky * 3 + kx
            for y in range(H):
                for x in range(W):
                    p = y * W + x
                    q = _reflect(y + ky - 1, H) * W + _reflect(x + kx - 1, W)
                    m[k, q, p] = 1.0
    return m


def _attention_kernel(x_ref, m_ref, wh_ref, bh_ref, wa_ref, ba_ref,
                      wt_ref, bt_ref, o_ref, *, C, COUT, HW):
    f32 = jnp.float32
    x = x_ref[0]                                   # (C, HW), lane-dense

    # ---- conv_head: 3x3 reflect conv = 9 x (shift matmul + channel matmul) --
    t = jnp.zeros((C, HW), f32)
    for k in range(9):
        sx = jnp.dot(x, m_ref[k], preferred_element_type=f32)        # (C, HW)
        t = t + jnp.dot(wh_ref[k], sx, preferred_element_type=f32)   # (C, HW)
    t = t + bh_ref[...]                                              # (C, 1) bias

    # ---- conv_glob (global average pool) + attention_channel (1x1 conv) -----
    g = jnp.sum(t, axis=1, keepdims=True) * (1.0 / HW)               # (C, 1)
    ch = jnp.dot(wa_ref[...], t, preferred_element_type=f32) + ba_ref[0]  # (1, HW)

    # ---- torch.cat([t, t*global, t*channel], dim=1) as a stacked (3C, HW) ---
    stack = jnp.concatenate([t, t * g, t * ch], axis=0)              # (3C, HW)

    # ---- tail: 3x3 reflect conv 3C -> COUT, LeakyReLU(0.1), residual --------
    acc = jnp.zeros((COUT, HW), f32)
    for k in range(9):
        ss = jnp.dot(stack, m_ref[k], preferred_element_type=f32)    # (3C, HW)
        acc = acc + jnp.dot(wt_ref[k], ss, preferred_element_type=f32)
    acc = acc + bt_ref[...]                                          # (COUT, 1)
    y = jnp.where(acc >= 0.0, acc, 0.1 * acc)                        # LeakyReLU(0.1)
    o_ref[0] = (y + x).astype(o_ref.dtype)                           # residual


def attention_module_pallas(x, w_head, b_head, w_att, b_att, w_tail, b_tail):
    N, C, H, W = x.shape
    COUT = w_tail.shape[0]
    assert w_tail.shape[1] == 3 * C and COUT == C   # residual needs COUT == C
    HW = H * W

    # Precompute / repack operands for MXU-friendly in-kernel matmuls.
    M = jnp.asarray(_shift_mats(H, W))                                  # (9, HW, HW)
    wh = jnp.transpose(w_head, (2, 3, 0, 1)).reshape(9, C, C)           # tap-major
    wt = jnp.transpose(w_tail, (2, 3, 0, 1)).reshape(9, COUT, 3 * C)    # tap-major
    bh = b_head.reshape(C, 1)
    bt = b_tail.reshape(COUT, 1)
    wa = w_att.reshape(1, C)
    xf = x.reshape(N, C, HW)                                            # lane-dense

    kernel = functools.partial(_attention_kernel, C=C, COUT=COUT, HW=HW)

    def const(shape):
        return pl.BlockSpec(shape, lambda n: (0,) * len(shape))

    out = pl.pallas_call(
        kernel,
        out_shape=jax.ShapeDtypeStruct((N, COUT, HW), jnp.float32),
        grid=(N,),                       # batch-parallel (shards over v7x's 2 TCs)
        in_specs=[
            pl.BlockSpec((1, C, HW), lambda n: (n, 0, 0)),            # x (per batch)
            const((9, HW, HW)),                                       # shift matrices
            const((9, C, C)),                                         # conv_head weights
            const((C, 1)),                                            # conv_head bias
            const((1, C)),                                            # attention 1x1 weight
            pl.BlockSpec(memory_space=pltpu.MemorySpace.SMEM),        # attention bias
            const((9, COUT, 3 * C)),                                  # tail weights
            const((COUT, 1)),                                         # tail bias
        ],
        out_specs=pl.BlockSpec((1, COUT, HW), lambda n: (n, 0, 0)),
        compiler_params=pltpu.CompilerParams(dimension_semantics=("parallel",)),
    )(xf, M, wh, bh, wa, b_att, wt, bt)

    return out.reshape(N, COUT, H, W)


def _ref_forward(x, w_head, b_head, w_att, b_att, w_tail, b_tail):
    """Pure-JAX reference mirroring the PyTorch forward exactly."""
    def conv3_reflect(inp, w, b):
        p = jnp.pad(inp, ((0, 0), (0, 0), (1, 1), (1, 1)), mode='reflect')
        out = lax.conv_general_dilated(
            p, w, window_strides=(1, 1), padding='VALID',
            dimension_numbers=('NCHW', 'OIHW', 'NCHW'),
            precision=lax.Precision.HIGHEST)
        return out + b[None, :, None, None]

    t = conv3_reflect(x, w_head, b_head)
    g = jnp.mean(t, axis=(2, 3), keepdims=True)                      # AdaptiveAvgPool2d(1)
    ch = jnp.einsum('c,nchw->nhw', w_att, t,
                    precision=lax.Precision.HIGHEST)[:, None] + b_att[0]
    cat = jnp.concatenate([t, t * g, t * ch], axis=1)
    y = conv3_reflect(cat, w_tail, b_tail)
    y = jnp.where(y >= 0.0, y, 0.1 * y)
    return y + x


if __name__ == "__main__":
    key = jax.random.PRNGKey(0)
    ks = jax.random.split(key, 7)

    N, C, H, W = 2, 4, 16, 16
    COUT = C  # residual branch requires out_channels == in_channels

    x = jax.random.normal(ks[0], (N, C, H, W), jnp.float32)
    w_head = 0.10 * jax.random.normal(ks[1], (C, C, 3, 3), jnp.float32)
    b_head = 0.10 * jax.random.normal(ks[2], (C,), jnp.float32)
    w_att = 0.10 * jax.random.normal(ks[3], (C,), jnp.float32)   # Conv2d(C,1,1) weight
    b_att = 0.10 * jax.random.normal(ks[4], (1,), jnp.float32)
    w_tail = 0.05 * jax.random.normal(ks[5], (COUT, 3 * C, 3, 3), jnp.float32)
    b_tail = 0.10 * jax.random.normal(ks[6], (COUT,), jnp.float32)

    out = attention_module_pallas(x, w_head, b_head, w_att, b_att, w_tail, b_tail)
    out = jax.block_until_ready(out)

    ref = _ref_forward(x, w_head, b_head, w_att, b_att, w_tail, b_tail)
    np.testing.assert_allclose(np.asarray(out), np.asarray(ref), atol=1e-3, rtol=1e-3)

    print("KERNEL_OK")
</pallas_src>

<mosaic_0001>
module attributes {stable_mosaic.version = 11 : i64} {
  func.func @_attention_kernel(%arg0: i32, %arg1: memref<1x4x256xf32, #tpu.memory_space<vmem>>, %arg2: memref<9x256x256xf32, #tpu.memory_space<vmem>>, %arg3: memref<9x4x4xf32, #tpu.memory_space<vmem>>, %arg4: memref<4x1xf32, #tpu.memory_space<vmem>>, %arg5: memref<1x4xf32, #tpu.memory_space<vmem>>, %arg6: memref<1xf32, #tpu.memory_space<smem>>, %arg7: memref<9x4x12xf32, #tpu.memory_space<vmem>>, %arg8: memref<4x1xf32, #tpu.memory_space<vmem>>, %arg9: memref<1x4x256xf32, #tpu.memory_space<vmem>>) attributes {dimension_semantics = [#tpu.dimension_semantics<parallel>], iteration_bounds = array<i64: 2>, scalar_prefetch = 0 : i64, scratch_operands = 0 : i64, tpu.core_type = #tpu.core_type<tc>, window_params = [{transform_indices = @transform_0, window_bounds = array<i64: 1, 4, 256>}, {pipeline_mode = #tpu.pipeline_mode<synchronous>, transform_indices = @transform_1, window_bounds = array<i64: 9, 256, 256>}, {pipeline_mode = #tpu.pipeline_mode<synchronous>, transform_indices = @transform_2, window_bounds = array<i64: 9, 4, 4>}, {pipeline_mode = #tpu.pipeline_mode<synchronous>, transform_indices = @transform_3, window_bounds = array<i64: 4, 1>}, {pipeline_mode = #tpu.pipeline_mode<synchronous>, transform_indices = @transform_4, window_bounds = array<i64: 1, 4>}, {transform_indices = @transform_5, window_bounds = array<i64: 1>}, {pipeline_mode = #tpu.pipeline_mode<synchronous>, transform_indices = @transform_6, window_bounds = array<i64: 9, 4, 12>}, {pipeline_mode = #tpu.pipeline_mode<synchronous>, transform_indices = @transform_7, window_bounds = array<i64: 4, 1>}, {transform_indices = @transform_8, window_bounds = array<i64: 1, 4, 256>}]} {
    %c0 = arith.constant 0 : index
    %c0_0 = arith.constant 0 : index
    %c0_1 = arith.constant 0 : index
    %0 = vector.load %arg1[%c0, %c0_0, %c0_1] : memref<1x4x256xf32, #tpu.memory_space<vmem>>, vector<1x4x256xf32>
    %1 = vector.shape_cast %0 : vector<1x4x256xf32> to vector<4x256xf32>
    %cst = arith.constant 0.000000e+00 : f32
    %2 = vector.broadcast %cst : f32 to vector<4x256xf32>
    %c0_2 = arith.constant 0 : index
    %c0_3 = arith.constant 0 : index
    %c0_4 = arith.constant 0 : index
    %3 = vector.load %arg2[%c0_2, %c0_3, %c0_4] : memref<9x256x256xf32, #tpu.memory_space<vmem>>, vector<1x256x256xf32>
    %4 = vector.shape_cast %3 : vector<1x256x256xf32> to vector<256x256xf32>
    %cst_5 = arith.constant dense<0.000000e+00> : vector<4x256xf32>
    %5 = tpu.matmul %1, %4, %cst_5 {dimension_numbers = #tpu.dot_dimension_numbers<[1], [0], [0], [1], [0, 0, 1, 1], [], []>} : vector<4x256xf32>, vector<256x256xf32>, vector<4x256xf32> -> vector<4x256xf32>
    %c0_6 = arith.constant 0 : index
    %c0_7 = arith.constant 0 : index
    %c0_8 = arith.constant 0 : index
    %6 = vector.load %arg3[%c0_6, %c0_7, %c0_8] : memref<9x4x4xf32, #tpu.memory_space<vmem>>, vector<1x4x4xf32>
    %7 = vector.shape_cast %6 : vector<1x4x4xf32> to vector<4x4xf32>
    %cst_9 = arith.constant dense<0.000000e+00> : vector<4x256xf32>
    %8 = tpu.matmul %7, %5, %cst_9 {dimension_numbers = #tpu.dot_dimension_numbers<[1], [0], [0], [1], [0, 0, 1, 1], [], []>} : vector<4x4xf32>, vector<4x256xf32>, vector<4x256xf32> -> vector<4x256xf32>
    %9 = arith.addf %2, %8 : vector<4x256xf32>
    %c1 = arith.constant 1 : index
    %c0_10 = arith.constant 0 : index
    %c0_11 = arith.constant 0 : index
    %10 = vector.load %arg2[%c1, %c0_10, %c0_11] : memref<9x256x256xf32, #tpu.memory_space<vmem>>, vector<1x256x256xf32>
    %11 = vector.shape_cast %10 : vector<1x256x256xf32> to vector<256x256xf32>
    %cst_12 = arith.constant dense<0.000000e+00> : vector<4x256xf32>
    %12 = tpu.matmul %1, %11, %cst_12 {dimension_numbers = #tpu.dot_dimension_numbers<[1], [0], [0], [1], [0, 0, 1, 1], [], []>} : vector<4x256xf32>, vector<256x256xf32>, vector<4x256xf32> -> vector<4x256xf32>
    %c1_13 = arith.constant 1 : index
    %c0_14 = arith.constant 0 : index
    %c0_15 = arith.constant 0 : index
    %13 = vector.load %arg3[%c1_13, %c0_14, %c0_15] : memref<9x4x4xf32, #tpu.memory_space<vmem>>, vector<1x4x4xf32>
    %14 = vector.shape_cast %13 : vector<1x4x4xf32> to vector<4x4xf32>
    %cst_16 = arith.constant dense<0.000000e+00> : vector<4x256xf32>
    %15 = tpu.matmul %14, %12, %cst_16 {dimension_numbers = #tpu.dot_dimension_numbers<[1], [0], [0], [1], [0, 0, 1, 1], [], []>} : vector<4x4xf32>, vector<4x256xf32>, vector<4x256xf32> -> vector<4x256xf32>
    %16 = arith.addf %9, %15 : vector<4x256xf32>
    %c2 = arith.constant 2 : index
    %c0_17 = arith.constant 0 : index
    %c0_18 = arith.constant 0 : index
    %17 = vector.load %arg2[%c2, %c0_17, %c0_18] : memref<9x256x256xf32, #tpu.memory_space<vmem>>, vector<1x256x256xf32>
    %18 = vector.shape_cast %17 : vector<1x256x256xf32> to vector<256x256xf32>
    %cst_19 = arith.constant dense<0.000000e+00> : vector<4x256xf32>
    %19 = tpu.matmul %1, %18, %cst_19 {dimension_numbers = #tpu.dot_dimension_numbers<[1], [0], [0], [1], [0, 0, 1, 1], [], []>} : vector<4x256xf32>, vector<256x256xf32>, vector<4x256xf32> -> vector<4x256xf32>
    %c2_20 = arith.constant 2 : index
    %c0_21 = arith.constant 0 : index
    %c0_22 = arith.constant 0 : index
    %20 = vector.load %arg3[%c2_20, %c0_21, %c0_22] : memref<9x4x4xf32, #tpu.memory_space<vmem>>, vector<1x4x4xf32>
    %21 = vector.shape_cast %20 : vector<1x4x4xf32> to vector<4x4xf32>
    %cst_23 = arith.constant dense<0.000000e+00> : vector<4x256xf32>
    %22 = tpu.matmul %21, %19, %cst_23 {dimension_numbers = #tpu.dot_dimension_numbers<[1], [0], [0], [1], [0, 0, 1, 1], [], []>} : vector<4x4xf32>, vector<4x256xf32>, vector<4x256xf32> -> vector<4x256xf32>
    %23 = arith.addf %16, %22 : vector<4x256xf32>
    %c3 = arith.constant 3 : index
    %c0_24 = arith.constant 0 : index
    %c0_25 = arith.constant 0 : index
    %24 = vector.load %arg2[%c3, %c0_24, %c0_25] : memref<9x256x256xf32, #tpu.memory_space<vmem>>, vector<1x256x256xf32>
    %25 = vector.shape_cast %24 : vector<1x256x256xf32> to vector<256x256xf32>
    %cst_26 = arith.constant dense<0.000000e+00> : vector<4x256xf32>
    %26 = tpu.matmul %1, %25, %cst_26 {dimension_numbers = #tpu.dot_dimension_numbers<[1], [0], [0], [1], [0, 0, 1, 1], [], []>} : vector<4x256xf32>, vector<256x256xf32>, vector<4x256xf32> -> vector<4x256xf32>
    %c3_27 = arith.constant 3 : index
    %c0_28 = arith.constant 0 : index
    %c0_29 = arith.constant 0 : index
    %27 = vector.load %arg3[%c3_27, %c0_28, %c0_29] : memref<9x4x4xf32, #tpu.memory_space<vmem>>, vector<1x4x4xf32>
    %28 = vector.shape_cast %27 : vector<1x4x4xf32> to vector<4x4xf32>
    %cst_30 = arith.constant dense<0.000000e+00> : vector<4x256xf32>
    %29 = tpu.matmul %28, %26, %cst_30 {dimension_numbers = #tpu.dot_dimension_numbers<[1], [0], [0], [1], [0, 0, 1, 1], [], []>} : vector<4x4xf32>, vector<4x256xf32>, vector<4x256xf32> -> vector<4x256xf32>
    %30 = arith.addf %23, %29 : vector<4x256xf32>
    %c4 = arith.constant 4 : index
    %c0_31 = arith.constant 0 : index
    %c0_32 = arith.constant 0 : index
    %31 = vector.load %arg2[%c4, %c0_31, %c0_32] : memref<9x256x256xf32, #tpu.memory_space<vmem>>, vector<1x256x256xf32>
    %32 = vector.shape_cast %31 : vector<1x256x256xf32> to vector<256x256xf32>
    %cst_33 = arith.constant dense<0.000000e+00> : vector<4x256xf32>
    %33 = tpu.matmul %1, %32, %cst_33 {dimension_numbers = #tpu.dot_dimension_numbers<[1], [0], [0], [1], [0, 0, 1, 1], [], []>} : vector<4x256xf32>, vector<256x256xf32>, vector<4x256xf32> -> vector<4x256xf32>
    %c4_34 = arith.constant 4 : index
    %c0_35 = arith.constant 0 : index
    %c0_36 = arith.constant 0 : index
    %34 = vector.load %arg3[%c4_34, %c0_35, %c0_36] : memref<9x4x4xf32, #tpu.memory_space<vmem>>, vector<1x4x4xf32>
    %35 = vector.shape_cast %34 : vector<1x4x4xf32> to vector<4x4xf32>
    %cst_37 = arith.constant dense<0.000000e+00> : vector<4x256xf32>
    %36 = tpu.matmul %35, %33, %cst_37 {dimension_numbers = #tpu.dot_dimension_numbers<[1], [0], [0], [1], [0, 0, 1, 1], [], []>} : vector<4x4xf32>, vector<4x256xf32>, vector<4x256xf32> -> vector<4x256xf32>
    %37 = arith.addf %30, %36 : vector<4x256xf32>
    %c5 = arith.constant 5 : index
    %c0_38 = arith.constant 0 : index
    %c0_39 = arith.constant 0 : index
    %38 = vector.load %arg2[%c5, %c0_38, %c0_39] : memref<9x256x256xf32, #tpu.memory_space<vmem>>, vector<1x256x256xf32>
    %39 = vector.shape_cast %38 : vector<1x256x256xf32> to vector<256x256xf32>
    %cst_40 = arith.constant dense<0.000000e+00> : vector<4x256xf32>
    %40 = tpu.matmul %1, %39, %cst_40 {dimension_numbers = #tpu.dot_dimension_numbers<[1], [0], [0], [1], [0, 0, 1, 1], [], []>} : vector<4x256xf32>, vector<256x256xf32>, vector<4x256xf32> -> vector<4x256xf32>
    %c5_41 = arith.constant 5 : index
    %c0_42 = arith.constant 0 : index
    %c0_43 = arith.constant 0 : index
    %41 = vector.load %arg3[%c5_41, %c0_42, %c0_43] : memref<9x4x4xf32, #tpu.memory_space<vmem>>, vector<1x4x4xf32>
    %42 = vector.shape_cast %41 : vector<1x4x4xf32> to vector<4x4xf32>
    %cst_44 = arith.constant dense<0.000000e+00> : vector<4x256xf32>
    %43 = tpu.matmul %42, %40, %cst_44 {dimension_numbers = #tpu.dot_dimension_numbers<[1], [0], [0], [1], [0, 0, 1, 1], [], []>} : vector<4x4xf32>, vector<4x256xf32>, vector<4x256xf32> -> vector<4x256xf32>
    %44 = arith.addf %37, %43 : vector<4x256xf32>
    %c6 = arith.constant 6 : index
    %c0_45 = arith.constant 0 : index
    %c0_46 = arith.constant 0 : index
    %45 = vector.load %arg2[%c6, %c0_45, %c0_46] : memref<9x256x256xf32, #tpu.memory_space<vmem>>, vector<1x256x256xf32>
    %46 = vector.shape_cast %45 : vector<1x256x256xf32> to vector<256x256xf32>
    %cst_47 = arith.constant dense<0.000000e+00> : vector<4x256xf32>
    %47 = tpu.matmul %1, %46, %cst_47 {dimension_numbers = #tpu.dot_dimension_numbers<[1], [0], [0], [1], [0, 0, 1, 1], [], []>} : vector<4x256xf32>, vector<256x256xf32>, vector<4x256xf32> -> vector<4x256xf32>
    %c6_48 = arith.constant 6 : index
    %c0_49 = arith.constant 0 : index
    %c0_50 = arith.constant 0 : index
    %48 = vector.load %arg3[%c6_48, %c0_49, %c0_50] : memref<9x4x4xf32, #tpu.memory_space<vmem>>, vector<1x4x4xf32>
    %49 = vector.shape_cast %48 : vector<1x4x4xf32> to vector<4x4xf32>
    %cst_51 = arith.constant dense<0.000000e+00> : vector<4x256xf32>
    %50 = tpu.matmul %49, %47, %cst_51 {dimension_numbers = #tpu.dot_dimension_numbers<[1], [0], [0], [1], [0, 0, 1, 1], [], []>} : vector<4x4xf32>, vector<4x256xf32>, vector<4x256xf32> -> vector<4x256xf32>
    %51 = arith.addf %44, %50 : vector<4x256xf32>
    %c7 = arith.constant 7 : index
    %c0_52 = arith.constant 0 : index
    %c0_53 = arith.constant 0 : index
    %52 = vector.load %arg2[%c7, %c0_52, %c0_53] : memref<9x256x256xf32, #tpu.memory_space<vmem>>, vector<1x256x256xf32>
    %53 = vector.shape_cast %52 : vector<1x256x256xf32> to vector<256x256xf32>
    %cst_54 = arith.constant dense<0.000000e+00> : vector<4x256xf32>
    %54 = tpu.matmul %1, %53, %cst_54 {dimension_numbers = #tpu.dot_dimension_numbers<[1], [0], [0], [1], [0, 0, 1, 1], [], []>} : vector<4x256xf32>, vector<256x256xf32>, vector<4x256xf32> -> vector<4x256xf32>
    %c7_55 = arith.constant 7 : index
    %c0_56 = arith.constant 0 : index
    %c0_57 = arith.constant 0 : index
    %55 = vector.load %arg3[%c7_55, %c0_56, %c0_57] : memref<9x4x4xf32, #tpu.memory_space<vmem>>, vector<1x4x4xf32>
    %56 = vector.shape_cast %55 : vector<1x4x4xf32> to vector<4x4xf32>
    %cst_58 = arith.constant dense<0.000000e+00> : vector<4x256xf32>
    %57 = tpu.matmul %56, %54, %cst_58 {dimension_numbers = #tpu.dot_dimension_numbers<[1], [0], [0], [1], [0, 0, 1, 1], [], []>} : vector<4x4xf32>, vector<4x256xf32>, vector<4x256xf32> -> vector<4x256xf32>
    %58 = arith.addf %51, %57 : vector<4x256xf32>
    %c8 = arith.constant 8 : index
    %c0_59 = arith.constant 0 : index
    %c0_60 = arith.constant 0 : index
    %59 = vector.load %arg2[%c8, %c0_59, %c0_60] : memref<9x256x256xf32, #tpu.memory_space<vmem>>, vector<1x256x256xf32>
    %60 = vector.shape_cast %59 : vector<1x256x256xf32> to vector<256x256xf32>
    %cst_61 = arith.constant dense<0.000000e+00> : vector<4x256xf32>
    %61 = tpu.matmul %1, %60, %cst_61 {dimension_numbers = #tpu.dot_dimension_numbers<[1], [0], [0], [1], [0, 0, 1, 1], [], []>} : vector<4x256xf32>, vector<256x256xf32>, vector<4x256xf32> -> vector<4x256xf32>
    %c8_62 = arith.constant 8 : index
    %c0_63 = arith.constant 0 : index
    %c0_64 = arith.constant 0 : index
    %62 = vector.load %arg3[%c8_62, %c0_63, %c0_64] : memref<9x4x4xf32, #tpu.memory_space<vmem>>, vector<1x4x4xf32>
    %63 = vector.shape_cast %62 : vector<1x4x4xf32> to vector<4x4xf32>
    %cst_65 = arith.constant dense<0.000000e+00> : vector<4x256xf32>
    %64 = tpu.matmul %63, %61, %cst_65 {dimension_numbers = #tpu.dot_dimension_numbers<[1], [0], [0], [1], [0, 0, 1, 1], [], []>} : vector<4x4xf32>, vector<4x256xf32>, vector<4x256xf32> -> vector<4x256xf32>
    %65 = arith.addf %58, %64 : vector<4x256xf32>
    %c0_66 = arith.constant 0 : index
    %c0_67 = arith.constant 0 : index
    %66 = vector.load %arg4[%c0_66, %c0_67] : memref<4x1xf32, #tpu.memory_space<vmem>>, vector<4x1xf32>
    %67 = vector.broadcast %66 : vector<4x1xf32> to vector<4x256xf32>
    %68 = arith.addf %65, %67 : vector<4x256xf32>
    %cst_68 = arith.constant dense<0.000000e+00> : vector<4xf32>
    %69 = vector.multi_reduction <add>, %68, %cst_68 [1] : vector<4x256xf32> to vector<4xf32>
    %70 = vector.shape_cast %69 : vector<4xf32> to vector<4x1xf32>
    %cst_69 = arith.constant 3.906250e-03 : f32
    %71 = vector.broadcast %cst_69 : f32 to vector<4x1xf32>
    %72 = arith.mulf %70, %71 : vector<4x1xf32>
    %c0_70 = arith.constant 0 : index
    %c0_71 = arith.constant 0 : index
    %73 = vector.load %arg5[%c0_70, %c0_71] : memref<1x4xf32, #tpu.memory_space<vmem>>, vector<1x4xf32>
    %cst_72 = arith.constant dense<0.000000e+00> : vector<1x256xf32>
    %74 = tpu.matmul %73, %68, %cst_72 {dimension_numbers = #tpu.dot_dimension_numbers<[1], [0], [0], [1], [0, 0, 1, 1], [], []>} : vector<1x4xf32>, vector<4x256xf32>, vector<1x256xf32> -> vector<1x256xf32>
    %c0_73 = arith.constant 0 : index
    %75 = memref.load %arg6[%c0_73] : memref<1xf32, #tpu.memory_space<smem>>
    %76 = vector.broadcast %75 : f32 to vector<1x256xf32>
    %77 = arith.addf %74, %76 : vector<1x256xf32>
    %78 = vector.broadcast %72 : vector<4x1xf32> to vector<4x256xf32>
    %79 = arith.mulf %68, %78 : vector<4x256xf32>
    %80 = vector.broadcast %77 : vector<1x256xf32> to vector<4x256xf32>
    %81 = arith.mulf %68, %80 : vector<4x256xf32>
    %82 = tpu.concatenate %68, %79, %81 in 0 : vector<4x256xf32>, vector<4x256xf32>, vector<4x256xf32> -> vector<12x256xf32>
    %cst_74 = arith.constant 0.000000e+00 : f32
    %83 = vector.broadcast %cst_74 : f32 to vector<4x256xf32>
    %c0_75 = arith.constant 0 : index
    %c0_76 = arith.constant 0 : index
    %c0_77 = arith.constant 0 : index
    %84 = vector.load %arg2[%c0_75, %c0_76, %c0_77] : memref<9x256x256xf32, #tpu.memory_space<vmem>>, vector<1x256x256xf32>
    %85 = vector.shape_cast %84 : vector<1x256x256xf32> to vector<256x256xf32>
    %cst_78 = arith.constant dense<0.000000e+00> : vector<12x256xf32>
    %86 = tpu.matmul %82, %85, %cst_78 {dimension_numbers = #tpu.dot_dimension_numbers<[1], [0], [0], [1], [0, 0, 1, 1], [], []>} : vector<12x256xf32>, vector<256x256xf32>, vector<12x256xf32> -> vector<12x256xf32>
    %c0_79 = arith.constant 0 : index
    %c0_80 = arith.constant 0 : index
    %c0_81 = arith.constant 0 : index
    %87 = vector.load %arg7[%c0_79, %c0_80, %c0_81] : memref<9x4x12xf32, #tpu.memory_space<vmem>>, vector<1x4x12xf32>
    %88 = vector.shape_cast %87 : vector<1x4x12xf32> to vector<4x12xf32>
    %cst_82 = arith.constant dense<0.000000e+00> : vector<4x256xf32>
    %89 = tpu.matmul %88, %86, %cst_82 {dimension_numbers = #tpu.dot_dimension_numbers<[1], [0], [0], [1], [0, 0, 1, 1], [], []>} : vector<4x12xf32>, vector<12x256xf32>, vector<4x256xf32> -> vector<4x256xf32>
    %90 = arith.addf %83, %89 : vector<4x256xf32>
    %c1_83 = arith.constant 1 : index
    %c0_84 = arith.constant 0 : index
    %c0_85 = arith.constant 0 : index
    %91 = vector.load %arg2[%c1_83, %c0_84, %c0_85] : memref<9x256x256xf32, #tpu.memory_space<vmem>>, vector<1x256x256xf32>
    %92 = vector.shape_cast %91 : vector<1x256x256xf32> to vector<256x256xf32>
    %cst_86 = arith.constant dense<0.000000e+00> : vector<12x256xf32>
    %93 = tpu.matmul %82, %92, %cst_86 {dimension_numbers = #tpu.dot_dimension_numbers<[1], [0], [0], [1], [0, 0, 1, 1], [], []>} : vector<12x256xf32>, vector<256x256xf32>, vector<12x256xf32> -> vector<12x256xf32>
    %c1_87 = arith.constant 1 : index
    %c0_88 = arith.constant 0 : index
    %c0_89 = arith.constant 0 : index
    %94 = vector.load %arg7[%c1_87, %c0_88, %c0_89] : memref<9x4x12xf32, #tpu.memory_space<vmem>>, vector<1x4x12xf32>
    %95 = vector.shape_cast %94 : vector<1x4x12xf32> to vector<4x12xf32>
    %cst_90 = arith.constant dense<0.000000e+00> : vector<4x256xf32>
    %96 = tpu.matmul %95, %93, %cst_90 {dimension_numbers = #tpu.dot_dimension_numbers<[1], [0], [0], [1], [0, 0, 1, 1], [], []>} : vector<4x12xf32>, vector<12x256xf32>, vector<4x256xf32> -> vector<4x256xf32>
    %97 = arith.addf %90, %96 : vector<4x256xf32>
    %c2_91 = arith.constant 2 : index
    %c0_92 = arith.constant 0 : index
    %c0_93 = arith.constant 0 : index
    %98 = vector.load %arg2[%c2_91, %c0_92, %c0_93] : memref<9x256x256xf32, #tpu.memory_space<vmem>>, vector<1x256x256xf32>
    %99 = vector.shape_cast %98 : vector<1x256x256xf32> to vector<256x256xf32>
    %cst_94 = arith.constant dense<0.000000e+00> : vector<12x256xf32>
    %100 = tpu.matmul %82, %99, %cst_94 {dimension_numbers = #tpu.dot_dimension_numbers<[1], [0], [0], [1], [0, 0, 1, 1], [], []>} : vector<12x256xf32>, vector<256x256xf32>, vector<12x256xf32> -> vector<12x256xf32>
    %c2_95 = arith.constant 2 : index
    %c0_96 = arith.constant 0 : index
    %c0_97 = arith.constant 0 : index
    %101 = vector.load %arg7[%c2_95, %c0_96, %c0_97] : memref<9x4x12xf32, #tpu.memory_space<vmem>>, vector<1x4x12xf32>
    %102 = vector.shape_cast %101 : vector<1x4x12xf32> to vector<4x12xf32>
    %cst_98 = arith.constant dense<0.000000e+00> : vector<4x256xf32>
    %103 = tpu.matmul %102, %100, %cst_98 {dimension_numbers = #tpu.dot_dimension_numbers<[1], [0], [0], [1], [0, 0, 1, 1], [], []>} : vector<4x12xf32>, vector<12x256xf32>, vector<4x256xf32> -> vector<4x256xf32>
    %104 = arith.addf %97, %103 : vector<4x256xf32>
    %c3_99 = arith.constant 3 : index
    %c0_100 = arith.constant 0 : index
    %c0_101 = arith.constant 0 : index
    %105 = vector.load %arg2[%c3_99, %c0_100, %c0_101] : memref<9x256x256xf32, #tpu.memory_space<vmem>>, vector<1x256x256xf32>
    %106 = vector.shape_cast %105 : vector<1x256x256xf32> to vector<256x256xf32>
    %cst_102 = arith.constant dense<0.000000e+00> : vector<12x256xf32>
    %107 = tpu.matmul %82, %106, %cst_102 {dimension_numbers = #tpu.dot_dimension_numbers<[1], [0], [0], [1], [0, 0, 1, 1], [], []>} : vector<12x256xf32>, vector<256x256xf32>, vector<12x256xf32> -> vector<12x256xf32>
    %c3_103 = arith.constant 3 : index
    %c0_104 = arith.constant 0 : index
    %c0_105 = arith.constant 0 : index
    %108 = vector.load %arg7[%c3_103, %c0_104, %c0_105] : memref<9x4x12xf32, #tpu.memory_space<vmem>>, vector<1x4x12xf32>
    %109 = vector.shape_cast %108 : vector<1x4x12xf32> to vector<4x12xf32>
    %cst_106 = arith.constant dense<0.000000e+00> : vector<4x256xf32>
    %110 = tpu.matmul %109, %107, %cst_106 {dimension_numbers = #tpu.dot_dimension_numbers<[1], [0], [0], [1], [0, 0, 1, 1], [], []>} : vector<4x12xf32>, vector<12x256xf32>, vector<4x256xf32> -> vector<4x256xf32>
    %111 = arith.addf %104, %110 : vector<4x256xf32>
    %c4_107 = arith.constant 4 : index
    %c0_108 = arith.constant 0 : index
    %c0_109 = arith.constant 0 : index
    %112 = vector.load %arg2[%c4_107, %c0_108, %c0_109] : memref<9x256x256xf32, #tpu.memory_space<vmem>>, vector<1x256x256xf32>
    %113 = vector.shape_cast %112 : vector<1x256x256xf32> to vector<256x256xf32>
    %cst_110 = arith.constant dense<0.000000e+00> : vector<12x256xf32>
    %114 = tpu.matmul %82, %113, %cst_110 {dimension_numbers = #tpu.dot_dimension_numbers<[1], [0], [0], [1], [0, 0, 1, 1], [], []>} : vector<12x256xf32>, vector<256x256xf32>, vector<12x256xf32> -> vector<12x256xf32>
    %c4_111 = arith.constant 4 : index
    %c0_112 = arith.constant 0 : index
    %c0_113 = arith.constant 0 : index
    %115 = vector.load %arg7[%c4_111, %c0_112, %c0_113] : memref<9x4x12xf32, #tpu.memory_space<vmem>>, vector<1x4x12xf32>
    %116 = vector.shape_cast %115 : vector<1x4x12xf32> to vector<4x12xf32>
    %cst_114 = arith.constant dense<0.000000e+00> : vector<4x256xf32>
    %117 = tpu.matmul %116, %114, %cst_114 {dimension_numbers = #tpu.dot_dimension_numbers<[1], [0], [0], [1], [0, 0, 1, 1], [], []>} : vector<4x12xf32>, vector<12x256xf32>, vector<4x256xf32> -> vector<4x256xf32>
    %118 = arith.addf %111, %117 : vector<4x256xf32>
    %c5_115 = arith.constant 5 : index
    %c0_116 = arith.constant 0 : index
    %c0_117 = arith.constant 0 : index
    %119 = vector.load %arg2[%c5_115, %c0_116, %c0_117] : memref<9x256x256xf32, #tpu.memory_space<vmem>>, vector<1x256x256xf32>
    %120 = vector.shape_cast %119 : vector<1x256x256xf32> to vector<256x256xf32>
    %cst_118 = arith.constant dense<0.000000e+00> : vector<12x256xf32>
    %121 = tpu.matmul %82, %120, %cst_118 {dimension_numbers = #tpu.dot_dimension_numbers<[1], [0], [0], [1], [0, 0, 1, 1], [], []>} : vector<12x256xf32>, vector<256x256xf32>, vector<12x256xf32> -> vector<12x256xf32>
    %c5_119 = arith.constant 5 : index
    %c0_120 = arith.constant 0 : index
    %c0_121 = arith.constant 0 : index
    %122 = vector.load %arg7[%c5_119, %c0_120, %c0_121] : memref<9x4x12xf32, #tpu.memory_space<vmem>>, vector<1x4x12xf32>
    %123 = vector.shape_cast %122 : vector<1x4x12xf32> to vector<4x12xf32>
    %cst_122 = arith.constant dense<0.000000e+00> : vector<4x256xf32>
    %124 = tpu.matmul %123, %121, %cst_122 {dimension_numbers = #tpu.dot_dimension_numbers<[1], [0], [0], [1], [0, 0, 1, 1], [], []>} : vector<4x12xf32>, vector<12x256xf32>, vector<4x256xf32> -> vector<4x256xf32>
    %125 = arith.addf %118, %124 : vector<4x256xf32>
    %c6_123 = arith.constant 6 : index
    %c0_124 = arith.constant 0 : index
    %c0_125 = arith.constant 0 : index
    %126 = vector.load %arg2[%c6_123, %c0_124, %c0_125] : memref<9x256x256xf32, #tpu.memory_space<vmem>>, vector<1x256x256xf32>
    %127 = vector.shape_cast %126 : vector<1x256x256xf32> to vector<256x256xf32>
    %cst_126 = arith.constant dense<0.000000e+00> : vector<12x256xf32>
    %128 = tpu.matmul %82, %127, %cst_126 {dimension_numbers = #tpu.dot_dimension_numbers<[1], [0], [0], [1], [0, 0, 1, 1], [], []>} : vector<12x256xf32>, vector<256x256xf32>, vector<12x256xf32> -> vector<12x256xf32>
    %c6_127 = arith.constant 6 : index
    %c0_128 = arith.constant 0 : index
    %c0_129 = arith.constant 0 : index
    %129 = vector.load %arg7[%c6_127, %c0_128, %c0_129] : memref<9x4x12xf32, #tpu.memory_space<vmem>>, vector<1x4x12xf32>
    %130 = vector.shape_cast %129 : vector<1x4x12xf32> to vector<4x12xf32>
    %cst_130 = arith.constant dense<0.000000e+00> : vector<4x256xf32>
    %131 = tpu.matmul %130, %128, %cst_130 {dimension_numbers = #tpu.dot_dimension_numbers<[1], [0], [0], [1], [0, 0, 1, 1], [], []>} : vector<4x12xf32>, vector<12x256xf32>, vector<4x256xf32> -> vector<4x256xf32>
    %132 = arith.addf %125, %131 : vector<4x256xf32>
    %c7_131 = arith.constant 7 : index
    %c0_132 = arith.constant 0 : index
    %c0_133 = arith.constant 0 : index
    %133 = vector.load %arg2[%c7_131, %c0_132, %c0_133] : memref<9x256x256xf32, #tpu.memory_space<vmem>>, vector<1x256x256xf32>
    %134 = vector.shape_cast %133 : vector<1x256x256xf32> to vector<256x256xf32>
    %cst_134 = arith.constant dense<0.000000e+00> : vector<12x256xf32>
    %135 = tpu.matmul %82, %134, %cst_134 {dimension_numbers = #tpu.dot_dimension_numbers<[1], [0], [0], [1], [0, 0, 1, 1], [], []>} : vector<12x256xf32>, vector<256x256xf32>, vector<12x256xf32> -> vector<12x256xf32>
    %c7_135 = arith.constant 7 : index
    %c0_136 = arith.constant 0 : index
    %c0_137 = arith.constant 0 : index
    %136 = vector.load %arg7[%c7_135, %c0_136, %c0_137] : memref<9x4x12xf32, #tpu.memory_space<vmem>>, vector<1x4x12xf32>
    %137 = vector.shape_cast %136 : vector<1x4x12xf32> to vector<4x12xf32>
    %cst_138 = arith.constant dense<0.000000e+00> : vector<4x256xf32>
    %138 = tpu.matmul %137, %135, %cst_138 {dimension_numbers = #tpu.dot_dimension_numbers<[1], [0], [0], [1], [0, 0, 1, 1], [], []>} : vector<4x12xf32>, vector<12x256xf32>, vector<4x256xf32> -> vector<4x256xf32>
    %139 = arith.addf %132, %138 : vector<4x256xf32>
    %c8_139 = arith.constant 8 : index
    %c0_140 = arith.constant 0 : index
    %c0_141 = arith.constant 0 : index
    %140 = vector.load %arg2[%c8_139, %c0_140, %c0_141] : memref<9x256x256xf32, #tpu.memory_space<vmem>>, vector<1x256x256xf32>
    %141 = vector.shape_cast %140 : vector<1x256x256xf32> to vector<256x256xf32>
    %cst_142 = arith.constant dense<0.000000e+00> : vector<12x256xf32>
    %142 = tpu.matmul %82, %141, %cst_142 {dimension_numbers = #tpu.dot_dimension_numbers<[1], [0], [0], [1], [0, 0, 1, 1], [], []>} : vector<12x256xf32>, vector<256x256xf32>, vector<12x256xf32> -> vector<12x256xf32>
    %c8_143 = arith.constant 8 : index
    %c0_144 = arith.constant 0 : index
    %c0_145 = arith.constant 0 : index
    %143 = vector.load %arg7[%c8_143, %c0_144, %c0_145] : memref<9x4x12xf32, #tpu.memory_space<vmem>>, vector<1x4x12xf32>
    %144 = vector.shape_cast %143 : vector<1x4x12xf32> to vector<4x12xf32>
    %cst_146 = arith.constant dense<0.000000e+00> : vector<4x256xf32>
    %145 = tpu.matmul %144, %142, %cst_146 {dimension_numbers = #tpu.dot_dimension_numbers<[1], [0], [0], [1], [0, 0, 1, 1], [], []>} : vector<4x12xf32>, vector<12x256xf32>, vector<4x256xf32> -> vector<4x256xf32>
    %146 = arith.addf %139, %145 : vector<4x256xf32>
    %c0_147 = arith.constant 0 : index
    %c0_148 = arith.constant 0 : index
    %147 = vector.load %arg8[%c0_147, %c0_148] : memref<4x1xf32, #tpu.memory_space<vmem>>, vector<4x1xf32>
    %148 = vector.broadcast %147 : vector<4x1xf32> to vector<4x256xf32>
    %149 = arith.addf %146, %148 : vector<4x256xf32>
    %cst_149 = arith.constant 0.000000e+00 : f32
    %150 = vector.broadcast %cst_149 : f32 to vector<4x256xf32>
    %151 = arith.cmpf oge, %149, %150 : vector<4x256xf32>
    %cst_150 = arith.constant 1.000000e-01 : f32
    %152 = vector.broadcast %cst_150 : f32 to vector<4x256xf32>
    %153 = arith.mulf %152, %149 : vector<4x256xf32>
    %154 = arith.select %151, %149, %153 : vector<4x256xi1>, vector<4x256xf32>
    %155 = arith.addf %154, %1 : vector<4x256xf32>
    %c0_151 = arith.constant 0 : index
    %c0_152 = arith.constant 0 : index
    %c0_153 = arith.constant 0 : index
    %156 = vector.load %arg9[%c0_151, %c0_152, %c0_153] : memref<1x4x256xf32, #tpu.memory_space<vmem>>, vector<1x4x256xf32>
    %157 = vector.shape_cast %156 : vector<1x4x256xf32> to vector<4x256xf32>
    %158 = vector.shape_cast %155 : vector<4x256xf32> to vector<1x4x256xf32>
    tpu.vector_store %arg9[%c0_151, %c0_152, %c0_153], %158 {strides = array<i32>} : memref<1x4x256xf32, #tpu.memory_space<vmem>>, vector<1x4x256xf32>,
    return
  }
  func.func @transform_0(%arg0: i32) -> (i32, i32, i32) {
    %c0_i32 = arith.constant 0 : i32
    %c0_i32_0 = arith.constant 0 : i32
    %c0_i32_1 = arith.constant 0 : i32
    return %arg0, %c0_i32, %c0_i32_0 : i32, i32, i32
  }
  func.func @transform_1(%arg0: i32) -> (i32, i32, i32) {
    %c0_i32 = arith.constant 0 : i32
    %c0_i32_0 = arith.constant 0 : i32
    %c0_i32_1 = arith.constant 0 : i32
    %c0_i32_2 = arith.constant 0 : i32
    return %c0_i32, %c0_i32_0, %c0_i32_1 : i32, i32, i32
  }
  func.func @transform_2(%arg0: i32) -> (i32, i32, i32) {
    %c0_i32 = arith.constant 0 : i32
    %c0_i32_0 = arith.constant 0 : i32
    %c0_i32_1 = arith.constant 0 : i32
    %c0_i32_2 = arith.constant 0 : i32
    return %c0_i32, %c0_i32_0, %c0_i32_1 : i32, i32, i32
  }
  func.func @transform_3(%arg0: i32) -> (i32, i32) {
    %c0_i32 = arith.constant 0 : i32
    %c0_i32_0 = arith.constant 0 : i32
    %c0_i32_1 = arith.constant 0 : i32
    return %c0_i32, %c0_i32_0 : i32, i32
  }
  func.func @transform_4(%arg0: i32) -> (i32, i32) {
    %c0_i32 = arith.constant 0 : i32
    %c0_i32_0 = arith.constant 0 : i32
    %c0_i32_1 = arith.constant 0 : i32
    return %c0_i32, %c0_i32_0 : i32, i32
  }
  func.func @transform_5(%arg0: i32) -> i32 {
    %c0_i32 = arith.constant 0 : i32
    %c0_i32_0 = arith.constant 0 : i32
    return %c0_i32 : i32
  }
  func.func @transform_6(%arg0: i32) -> (i32, i32, i32) {
    %c0_i32 = arith.constant 0 : i32
    %c0_i32_0 = arith.constant 0 : i32
    %c0_i32_1 = arith.constant 0 : i32
    %c0_i32_2 = arith.constant 0 : i32
    return %c0_i32, %c0_i32_0, %c0_i32_1 : i32, i32, i32
  }
  func.func @transform_7(%arg0: i32) -> (i32, i32) {
    %c0_i32 = arith.constant 0 : i32
    %c0_i32_0 = arith.constant 0 : i32
    %c0_i32_1 = arith.constant 0 : i32
    return %c0_i32, %c0_i32_0 : i32, i32
  }
  func.func @transform_8(%arg0: i32) -> (i32, i32, i32) {
    %c0_i32 = arith.constant 0 : i32
    %c0_i32_0 = arith.constant 0 : i32
    %c0_i32_1 = arith.constant 0 : i32
    return %arg0, %c0_i32, %c0_i32_0 : i32, i32, i32
  }
}

</mosaic_0001>

<bundles_post_ra>
// kernel: tpu_custom_call.1
= control target key start
LH: loop header
LB: loop body
LE: loop exit
PB: predicated region body
PF: predicated region fallthrough
CT: control target
= control target key end

     0   :  { %s5321_s0 = inlined_call_operand.hbm [shape: f32[2,4,256], index: 0, kind: input, shape index: {}]   ;;  %s5322_s1 = inlined_call_operand.hbm [shape: f32[9,256,256], index: 1, kind: input, shape index: {}]   ;;  %s5323_s2 = inlined_call_operand.vmem [shape: f32[9,4,4], index: 2, kind: input, shape index: {}]   ;;  %s5324_s3 = inlined_call_operand.vmem [shape: f32[4,1], index: 3, kind: input, shape index: {}]   ;;  %s5325_s4 = inlined_call_operand.hbm [shape: f32[1,4], index: 4, kind: input, shape index: {}]   ;;  %s5326_s5 = inlined_call_operand.<no memory space> [shape: f32[1], index: 5, kind: input, shape index: {}]   ;;  %s5327_s6 = inlined_call_operand.hbm [shape: f32[9,4,12], index: 6, kind: input, shape index: {}]   ;;  %s5328_s7 = inlined_call_operand.vmem [shape: f32[4,1], index: 7, kind: input, shape index: {}]   ;;  %s5329_s8 = inlined_call_operand.hbm [shape: f32[2,4,256], index: 8, kind: output, shape index: {}]  }
   0x1   :  { %5330 = sst [smem:[#allocation16_spill]] %s5322_s1 }
   0x2   :  { %13 = sst [smem:[#allocation2]] %s5326_s5 }
   0x3   :  { %14 = vsyncpa [#allocation4], 0 }
   0x4   :  { %16 = vsyncpa [#allocation4 + $0x1], 0 }
   0x5   :  { %17 = vsyncpa [#allocation7], 0 }
   0x6   :  { %18 = vsyncpa [#allocation10], 0 }
   0x7   :  { %19 = vsyncpa [#allocation5], 0 }
   0x8   :  { %21 = vsyncpa [#allocation5 + $0x1], 0  ;;  %s4740_s29 = smov 0   ;;  %s4742_s30 = smov 0  }
   0x9   :  { %s4744_s9 = smov 0   ;;  %s4746_s10 = smov 0  }
   0xa LB: > { %s5331_s1 = sld [smem:[#allocation16_spill]]  ;;  %s4764_s13 = sadd.s32 4294967295, %s4682_s10   ;;  %s4682_s10 = sphi %s4746_s10, %s5342_s10   ;;  %s4678_s9 = sphi %s4744_s9, %s5341_s9   ;;  %s4674_s30 = sphi %s4742_s30, %s5340_s30   ;;  %s4670_s29 = sphi %s4740_s29, %s5339_s29  }
   0xb   : > { %p3723_p0 = scmp.ge.s32.totalorder %s4682_s10, 1  ;;  %p48_p1 = scmp.eq.s32.totalorder %s4764_s13, 0 }
   0xc   : > { %p231_p2 = scmp.lt.s32.totalorder %s4682_s10, 3  ;;  %s4684_s15 = smov [#allocation6]  }
   0xd   : > { %s244_s16 = sshll.u32 %s4684_s15, 4  ;;  %s263_s19 = sshll.u32 %s5325_s4, 4  ;;  %s245_s16 = int_to_ptr.vmem [resolvable:$true] %s244_s16  ;;  %s264_s19 = int_to_ptr.hbm [resolvable:$true] %s263_s19 }
   0xe   : > { %p4769_p3 = pnand %p3723_p0, %p231_p2  ;;  %s277_s23 = sshll.u32 %s5327_s6, 4  ;;  %s278_s23 = int_to_ptr.hbm [resolvable:$true] %s277_s23 }
   0xf   : > { %s4685_s24 = smov [#allocation8]   ;;  %s4686_s26 = smov 256  }
  0x10   : > { %s242_s12 = sshll.u32 %s5331_s1, 4  ;;  %p3844_p4 = pneg %p4769_p3  ;;  %s243_s12 = int_to_ptr.hbm [resolvable:$true] %s242_s12 }
  0x11   : > { %s265_s25 = sshll.u32 %s4685_s24, 4  ;;  %s4687_s27 = smov 16   ;;  %s266_s25 = int_to_ptr.vmem [resolvable:$true] %s265_s25 }
  0x12   : > { %p4781_p6 = pnand %p3844_p4, %p48_p1  ;;  %s4688_s28 = smov [#allocation9]  }
  0x13   : > { %s279_s5 = sshll.u32 %s4688_s28, 4  ;;  %s4689_s11 = smov 64   ;;  %s280_s5 = int_to_ptr.vmem [resolvable:$true] %s279_s5 }
  0x14   : > { %3847 = dma.hbm_to_vmem [thread:$0]  (!%p4781_p6), %s243_s12, 73728, %s245_s16, [#allocation7], %s4686_s26, %s4686_s26, %s4687_s27  }
  0x15   : > { %3850 = dma.hbm_to_vmem [thread:$0]  (!%p4781_p6), %s264_s19, 16, %s266_s25, [#allocation7]  }
  0x16   : > { %s4690_s15 = smov 4   ;;  %s3722_s17 = sadd.s32 4294967294, %s4682_s10  }
  0x17   : > { %3853 = dma.hbm_to_vmem [thread:$0]  (!%p4781_p6), %s278_s23, 576, %s280_s5, [#allocation10], %s4689_s11, %s4689_s11, %s4690_s15  }
  0x18   : > { %s4796_s12 = sadd.s32 1, %s4682_s10   ;;  %s34_s16 = sadd.s32 1, %s4678_s9 }
  0x19   : > { %s31_s18 = ssub.s32 %s4682_s10, %s4796_s12  ;;  %p41_p7 = scmp.ne.s32.totalorder %s4678_s9, %s4674_s30 }
  0x1a   : > { %p32_p8 = scmp.eq.s32.totalorder %s31_s18, 0  ;;  %p42_p9 = scmp.eq.s32.totalorder %s4682_s10, 0 }
  0x1b   : > { %p47_p10 = scmp.ne.s32.totalorder %s4674_s30, %s4670_s29  ;;  %p218_p11 = scmp.eq.s32.totalorder %s4764_s13, 1 }
  0x1c   : > { %s4808_s19 = scalar_select %p32_p8, %s4678_s9, %s34_s16  }
  0x1d   : > { %p4812_p12 = por %p48_p1, %p47_p10  ;;  %p4816_p13 = por %p218_p11, %p41_p7 }
  0x1e   : > { %p224_p0 = scmp.eq.s32.totalorder %s3722_s17, 1  ;;  %p43_p2 = por %p42_p9, %p41_p7 }
  0x1f   : > { %s296_s22 = sand.u32 1, %s4678_s9   ;;  %p3865_p6 = scmp.lt.s32.totalorder %s4682_s10, 2 }
  0x20   : > { %p4821_p4 = por %p224_p0, %p47_p10  ;;  %s3728_s24 = sshll.u32 %s296_s22, 3 }
  0x21   : > { %s3826_s25 = sshll.u32 %s4682_s10, 3  ;;  %s300_s11 = scalar_lea.vmem [#allocation3], %s3728_s24 }
  0x22   : > { %s305_s28 = scalar_lea.hbm %s5321_s0, %s3826_s25  ;;  %s309_s15 = sshll.u32 %s300_s11, 4  ;;  %s310_s15 = int_to_ptr.vmem [resolvable:$true] %s309_s15 }
  0x23   : > { %s307_s5 = sshll.u32 %s305_s28, 4  ;;  %p4830_p8 = pnand %p3865_p6, %p43_p2  ;;  %s308_s5 = int_to_ptr.hbm [resolvable:$true] %s307_s5 }
  0x24   : > { %s297_s16 = scalar_lea.sflag [#allocation4], %s296_s22  ;;  %s4578_s18 = sshra.s32 %s308_s5, 4  ;;  %s4579_s18 = int_to_ptr.hbm [resolvable:$true] %s4578_s18 }
  0x25   : > { %s4580_s1 = scalar_lea.hbm %s4579_s18, 8  ;;  %p4582_p9 = pneg %p4830_p8 }
  0x26   : > { %p4581_p7 = scmp.ne.s32.totalorder %s4579_s18, %s4580_s1  ;;  %s4585_s24 = scalar_lea.hbm %s5321_s0, 16 }
  0x27   : > { %p4586_p0 = scmp.lt.s32.totalorder %s4579_s18, %s5321_s0  ;;  %p4587_p2 = scmp.lt.s32.totalorder %s4585_s24, %s4580_s1 }
  0x28   : > { %p4583_p10 = pnand %p4582_p9, %p4581_p7 }
  0x29   : > { %p4588_p6 = por %p4587_p2, %p4586_p0 }
  0x2a   : > { %p4584_p11 = pneg %p4583_p10 }
  0x2c   : > { %p4589_p5 = pnand %p4588_p6, %p4584_p11 }
  0x2e   : > { %4592 = shalt.err (!%p4589_p5)
}
  0x2f   : > { %3857 = dma.hbm_to_vmem [thread:$0]  (!%p4830_p8), %s308_s5, 128, %s310_s15, %s297_s16  }
  0x30   : > { %318 = sbr.rel (%p4769_p3) target bundleno = 3188 (0xc74), region = 52  ;;  %s4847_s22 = sand.u32 (!%p4769_p3), 1, %s4674_s30  }
  0x31   : > { %s3732_s11 = sshll.u32 (!%p4769_p3), %s4847_s22, 3  ;;  %s321_s25 = scalar_lea.sflag (!%p4769_p3), [#allocation4], %s4847_s22 }
  0x32   : > { %s4853_s1 = scalar_lea.vmem (!%p4769_p3), [#allocation3], %s3732_s11 }
  0x35   : > { %4653 = dma.done.wait (%p4812_p12), %s321_s25, 128  }
  0x36   : > { %4655 = vsyncadd (%p4812_p12), %s321_s25, 4294967168 }
  0x37   : > { %4657 = dma.done.wait (%p48_p1), [#allocation7], 73744  }
  0x38   : > { %4659 = vsyncadd (%p48_p1), [#allocation7], 4294893552 }
  0x39   : > { %4661 = dma.done.wait (%p48_p1), [#allocation10], 576  }
  0x3a   : > { %4663 = vsyncadd (%p48_p1), [#allocation10], 4294966720  ;;  %v405_v0 = vld [vmem:[#allocation6 + $0xf8] sm:$0xff]  ;;  %v403_v2 = vld [vmem:[#allocation6 + $0xe8] sm:$0xff]  ;;  %vm681_vm0 = vcmask 1043456   ;;  %vm677_vm1 = vcmask 31744  }
  0x3b   : > { %v437_v1 = vld [vmem:[#allocation6 + $0x1f8] sm:$0xff]  ;;  %484 = vmatpush.msra.mxu2 %v405_v0  ;;  %v435_v3 = vld [vmem:[#allocation6 + $0x1e8] sm:$0xff]  ;;  %v404_v6 = vld [vmem:[#allocation6 + $0xf0] sm:$0xff]  ;;  %s2213_s26 = sld [smem:[#allocation2]]  ;;  %vm2465_vm2 = vcmask 97280   ;;  %s3827_s28 = sshll.u32 %s4764_s13, 3 }
  0x3c   : > { %504 = vmatpush.msra.mxu3 %v437_v1  ;;  %v401_v4 = vld [vmem:[#allocation6 + $0xd8] sm:$0xff]  ;;  %v436_v7 = vld [vmem:[#allocation6 + $0x1f0] sm:$0xff]  ;;  %v402_v8 = vld [vmem:[#allocation6 + $0xe0] sm:$0xff]  ;;  %444 = vmatpush.msra.mxu0 %v404_v6  ;;  %s3618_s14 = scalar_lea.hbm %s5329_s8, %s3827_s28  ;;  %s372_s20 = scalar_lea.vmem [#allocation11], %s3732_s11 }
  0x3d   : > { %v433_v5 = vld [vmem:[#allocation6 + $0x1d8] sm:$0xff]  ;;  %485 = vmatpush.msra.mxu2 %v403_v2  ;;  %v434_v9 = vld [vmem:[#allocation6 + $0x1e0] sm:$0xff]  ;;  %464 = vmatpush.msra.mxu1 %v436_v7  ;;  %v399_v10 = vld [vmem:[#allocation6 + $0xc8] sm:$0xff]  ;;  %s3620_s5 = sshll.u32 %s372_s20, 4  ;;  %s3622_s13 = sshll.u32 %s3618_s14, 4  ;;  %s3621_s5 = int_to_ptr.vmem [resolvable:$true] %s3620_s5  ;;  %s3623_s13 = int_to_ptr.hbm [resolvable:$true] %s3622_s13 }
  0x3e   : > { %505 = vmatpush.msra.mxu3 %v435_v3  ;;  %v431_v11 = vld [vmem:[#allocation6 + $0x1c8] sm:$0xff]  ;;  %v400_v12 = vld [vmem:[#allocation6 + $0xd0] sm:$0xff]  ;;  %445 = vmatpush.msra.mxu0 %v402_v8  ;;  %v397_v14 = vld [vmem:[#allocation6 + $0xb8] sm:$0xff]  ;;  %s3607_s15 = scalar_lea.sflag [#allocation5], %s4847_s22  ;;  %s4622_s17 = sshra.s32 %s3623_s13, 4  ;;  %s4623_s17 = int_to_ptr.hbm [resolvable:$true] %s4622_s17 }
  0x3f   : > { %486 = vmatpush.msra.mxu2 %v401_v4  ;;  %v432_v13 = vld [vmem:[#allocation6 + $0x1d0] sm:$0xff]  ;;  %465 = vmatpush.msra.mxu1 %v434_v9  ;;  %v429_v15 = vld [vmem:[#allocation6 + $0x1b8] sm:$0xff]  ;;  %v398_v16 = vld [vmem:[#allocation6 + $0xc0] sm:$0xff]  ;;  %s4624_s16 = scalar_lea.hbm %s4623_s17, 8  ;;  %s4628_s11 = scalar_lea.hbm %s5329_s8, 16 }
  0x40   : > { %506 = vmatpush.msra.mxu3 %v433_v5  ;;  %v430_v17 = vld [vmem:[#allocation6 + $0x1c0] sm:$0xff]  ;;  %446 = vmatpush.msra.mxu0 %v400_v12  ;;  %v395_v18 = vld [vmem:[#allocation6 + $0xa8] sm:$0xff]  ;;  %v396_v20 = vld [vmem:[#allocation6 + $0xb0] sm:$0xff]  ;;  %p4625_p1 = scmp.ne.s32.totalorder %s4623_s17, %s4624_s16  ;;  %p4629_p12 = scmp.lt.s32.totalorder %s4623_s17, %s5329_s8 }
  0x41   : > { %487 = vmatpush.msra.mxu2 %v399_v10  ;;  %466 = vmatpush.msra.mxu1 %v432_v13  ;;  %v427_v19 = vld [vmem:[#allocation6 + $0x1a8] sm:$0xff]  ;;  %v428_v21 = vld [vmem:[#allocation6 + $0x1b0] sm:$0xff]  ;;  %v393_v22 = vld [vmem:[#allocation6 + $0x98] sm:$0xff]  ;;  %p4630_p8 = scmp.lt.s32.totalorder %s4628_s11, %s4624_s16 }
  0x42   : > { %507 = vmatpush.msra.mxu3 %v431_v11  ;;  %447 = vmatpush.msra.mxu0 %v398_v16  ;;  %v425_v23 = vld [vmem:[#allocation6 + $0x198] sm:$0xff]  ;;  %v394_v24 = vld [vmem:[#allocation6 + $0xa0] sm:$0xff]  ;;  %v391_v26 = vld [vmem:[#allocation6 + $0x88] sm:$0xff]  ;;  %p4626_p3 = pnand %p4625_p1, %p4816_p13 }
  0x43   : > { %488 = vmatpush.msra.mxu2 %v397_v14  ;;  %467 = vmatpush.msra.mxu1 %v430_v17  ;;  %v426_v25 = vld [vmem:[#allocation6 + $0x1a0] sm:$0xff]  ;;  %v423_v27 = vld [vmem:[#allocation6 + $0x188] sm:$0xff]  ;;  %v392_v28 = vld [vmem:[#allocation6 + $0x90] sm:$0xff]  ;;  %p4631_p7 = por %p4630_p8, %p4629_p12 }
  0x44   : > { %508 = vmatpush.msra.mxu3 %v429_v15  ;;  %448 = vmatpush.msra.mxu0 %v396_v20  ;;  %v424_v29 = vld [vmem:[#allocation6 + $0x190] sm:$0xff]  ;;  %v389_v30 = vld [vmem:[#allocation6 + $0x78] sm:$0xff]  ;;  %v390_v32 = vld [vmem:[#allocation6 + $0x80] sm:$0xff]  ;;  %p4627_p5 = pneg %p4626_p3 }
  0x45   : > { %489 = vmatpush.msra.mxu2 %v395_v18  ;;  %468 = vmatpush.msra.mxu1 %v428_v21  ;;  %v421_v31 = vld [vmem:[#allocation6 + $0x178] sm:$0xff]  ;;  %v422_v33 = vld [vmem:[#allocation6 + $0x180] sm:$0xff]  ;;  %v387_v34 = vld [vmem:[#allocation6 + $0x68] sm:$0xff] }
  0x46   : > { %509 = vmatpush.msra.mxu3 %v427_v19  ;;  %449 = vmatpush.msra.mxu0 %v394_v24  ;;  %v419_v35 = vld [vmem:[#allocation6 + $0x168] sm:$0xff]  ;;  %v388_v36 = vld [vmem:[#allocation6 + $0x70] sm:$0xff]  ;;  %v385_v38 = vld [vmem:[#allocation6 + $0x58] sm:$0xff]  ;;  %p4632_p9 = pnand %p4631_p7, %p4627_p5 }
  0x47   : > { %490 = vmatpush.msra.mxu2 %v393_v22  ;;  %469 = vmatpush.msra.mxu1 %v426_v25  ;;  %v420_v37 = vld [vmem:[#allocation6 + $0x170] sm:$0xff]  ;;  %v417_v39 = vld [vmem:[#allocation6 + $0x158] sm:$0xff]  ;;  %v386_v40 = vld [vmem:[#allocation6 + $0x60] sm:$0xff] }
  0x48   : > { %510 = vmatpush.msra.mxu3 %v425_v23  ;;  %450 = vmatpush.msra.mxu0 %v392_v28  ;;  %v418_v41 = vld [vmem:[#allocation6 + $0x160] sm:$0xff]  ;;  %v4868_v42 = vld [vmem:[%s4853_s1] sm:$0xff]  ;;  %v383_v43 = vld [vmem:[#allocation6 + $0x48] sm:$0xff] }
  0x49   : > { %491 = vmatpush.msra.mxu2 %v391_v26  ;;  %470 = vmatpush.msra.mxu1 %v424_v29  ;;  %v415_v44 = vld [vmem:[#allocation6 + $0x148] sm:$0xff]  ;;  %439 = vst [vmem:[#allocation1] ss:$2 sm:$0xff] %v4868_v42  ;;  %v384_v45 = vld [vmem:[#allocation6 + $0x50] sm:$0xff]  ;;  %v381_v47 = vld [vmem:[#allocation6 + $0x38] sm:$0xff] }
  0x4a   : > { %511 = vmatpush.msra.mxu3 %v423_v27  ;;  %451 = vmatpush.msra.mxu0 %v390_v32  ;;  %v416_v46 = vld [vmem:[#allocation6 + $0x150] sm:$0xff]  ;;  %v413_v48 = vld [vmem:[#allocation6 + $0x138] sm:$0xff]  ;;  %v382_v49 = vld [vmem:[#allocation6 + $0x40] sm:$0xff] }
  0x4b   : > { %492 = vmatpush.msra.mxu2 %v389_v30  ;;  %471 = vmatpush.msra.mxu1 %v422_v33  ;;  %v414_v50 = vld [vmem:[#allocation6 + $0x140] sm:$0xff]  ;;  %v379_v51 = vld [vmem:[#allocation6 + $0x28] sm:$0xff]  ;;  %v377_v53 = vld [vmem:[#allocation6 + $0x18] sm:$0xff] }
  0x4c   : > { %512 = vmatpush.msra.mxu3 %v421_v31  ;;  %452 = vmatpush.msra.mxu0 %v388_v36  ;;  %v411_v52 = vld [vmem:[#allocation6 + $0x128] sm:$0xff]  ;;  %v380_v54 = vld [vmem:[#allocation6 + $0x30] sm:$0xff]  ;;  %v409_v56 = vld [vmem:[#allocation6 + $0x118] sm:$0xff] }
  0x4d   : > { %493 = vmatpush.msra.mxu2 %v387_v34  ;;  %472 = vmatpush.msra.mxu1 %v420_v37  ;;  %v412_v55 = vld [vmem:[#allocation6 + $0x130] sm:$0xff]  ;;  %v378_v57 = vld [vmem:[#allocation6 + $0x20] sm:$0xff]  ;;  %v375_v61 = vld [vmem:[#allocation6 + $0x8] sm:$0xff] }
  0x4e   : > { %513 = vmatpush.msra.mxu3 %v419_v35  ;;  %453 = vmatpush.msra.mxu0 %v386_v40  ;;  %v410_v58 = vld [vmem:[#allocation6 + $0x120] sm:$0xff]  ;;  %v407_v62 = vld [vmem:[#allocation6 + $0x108] sm:$0xff]  ;;  %v557_v63 = vld [vmem:[#allocation6 + $0x2f8] sm:$0xff] }
  0x4f   : > { %494 = vmatpush.msra.mxu2 %v385_v38  ;;  %473 = vmatpush.msra.mxu1 %v418_v41  ;;  %v589_v0 = vld [vmem:[#allocation6 + $0x3f8] sm:$0xff]  ;;  %v376_v1 = vld [vmem:[#allocation6 + $0x10] sm:$0xff]  ;;  %v555_v3 = vld [vmem:[#allocation6 + $0x2e8] sm:$0xff] }
  0x50   : > { %514 = vmatpush.msra.mxu3 %v417_v39  ;;  %454 = vmatpush.msra.mxu0 %v384_v45  ;;  %v440_v59 = vld.sshfl [vmem:[#allocation1] sm:$0xff pattern:$0x75316420]  ;;  %v441_v60 = vld.sshfl [vmem:[#allocation1 + $0x8] sm:$0xff pattern:$0x75316420] }
  0x51   : > { %495 = vmatpush.msra.mxu2 %v383_v43  ;;  %474 = vmatpush.msra.mxu1 %v416_v46  ;;  %590 = vst [vmem:[#allocation1] ss:$2 sm:$0xff] %v4868_v42  ;;  %v408_v2 = vld [vmem:[#allocation6 + $0x110] sm:$0xff]  ;;  %v587_v4 = vld [vmem:[#allocation6 + $0x3e8] sm:$0xff]  ;;  %v374_v5 = vld [vmem:[#allocation6] sm:$0xff] }
  0x52   : > { %515 = vmatpush.msra.mxu3 %v415_v44  ;;  %455 = vmatpush.msra.mxu0 %v382_v49  ;;  %v406_v6 = vld [vmem:[#allocation6 + $0x100] sm:$0xff]  ;;  %v553_v7 = vld [vmem:[#allocation6 + $0x2d8] sm:$0xff]  ;;  %v556_v9 = vld [vmem:[#allocation6 + $0x2f0] sm:$0xff] }
  0x53   : > { %496 = vmatpush.msra.mxu2 %v381_v47  ;;  %475 = vmatpush.msra.mxu1 %v414_v50  ;;  %v585_v8 = vld [vmem:[#allocation6 + $0x3d8] sm:$0xff]  ;;  %v588_v10 = vld [vmem:[#allocation6 + $0x3f0] sm:$0xff]  ;;  %v551_v11 = vld [vmem:[#allocation6 + $0x2c8] sm:$0xff] }
  0x54   : > { %516 = vmatpush.msra.mxu3 %v413_v48  ;;  %456 = vmatpush.msra.mxu0 %v380_v54  ;;  %v583_v12 = vld [vmem:[#allocation6 + $0x3c8] sm:$0xff]  ;;  %v554_v13 = vld [vmem:[#allocation6 + $0x2e0] sm:$0xff]  ;;  %v549_v15 = vld [vmem:[#allocation6 + $0x2b8] sm:$0xff] }
  0x55   : > { %497 = vmatpush.msra.mxu2 %v379_v51  ;;  %476 = vmatpush.msra.mxu1 %v412_v55  ;;  %v586_v14 = vld [vmem:[#allocation6 + $0x3e0] sm:$0xff]  ;;  %v581_v16 = vld [vmem:[#allocation6 + $0x3b8] sm:$0xff]  ;;  %v552_v17 = vld [vmem:[#allocation6 + $0x2d0] sm:$0xff] }
  0x56   : > { %517 = vmatpush.msra.mxu3 %v411_v52  ;;  %457 = vmatpush.msra.mxu0 %v378_v57  ;;  %v584_v18 = vld [vmem:[#allocation6 + $0x3d0] sm:$0xff]  ;;  %v547_v19 = vld [vmem:[#allocation6 + $0x2a8] sm:$0xff]  ;;  %v550_v21 = vld [vmem:[#allocation6 + $0x2c0] sm:$0xff] }
  0x57   : > { %498 = vmatpush.msra.mxu2 %v377_v53  ;;  %477 = vmatpush.msra.mxu1 %v410_v58  ;;  %v579_v20 = vld [vmem:[#allocation6 + $0x3a8] sm:$0xff]  ;;  %v582_v22 = vld [vmem:[#allocation6 + $0x3c0] sm:$0xff]  ;;  %v545_v25 = vld [vmem:[#allocation6 + $0x298] sm:$0xff] }
  0x58   : > { %518 = vmatpush.msra.mxu3 %v409_v56  ;;  %458 = vmatpush.msra.mxu0 %v376_v1  ;;  %v4872_v23 = vld.sshfl [vmem:[#allocation1] sm:$0xff pattern:$0x75316420]  ;;  %v4874_v24 = vld.sshfl [vmem:[#allocation1 + $0x8] sm:$0xff pattern:$0x75316420] }
  0x59   : > { %499 = vmatpush.msra.mxu2 %v375_v61  ;;  %478 = vmatpush.msra.mxu1 %v408_v2  ;;  %v577_v26 = vld [vmem:[#allocation6 + $0x398] sm:$0xff]  ;;  %842 = vst [vmem:[#allocation1] ss:$2 sm:$0xff] %v4868_v42  ;;  %v548_v27 = vld [vmem:[#allocation6 + $0x2b0] sm:$0xff]  ;;  %v543_v29 = vld [vmem:[#allocation6 + $0x288] sm:$0xff] }
  0x5a   : > { %519 = vmatpush.msra.mxu3 %v407_v62  ;;  %500 = vmatmul.f32.vlgmr.msra.gmra.mxu2 %v440_v59  ;;  %v580_v28 = vld [vmem:[#allocation6 + $0x3b0] sm:$0xff]  ;;  %v575_v30 = vld [vmem:[#allocation6 + $0x388] sm:$0xff]  ;;  %v546_v31 = vld [vmem:[#allocation6 + $0x2a0] sm:$0xff] }
  0x5b   : > { %520 = vmatmul.f32.vlgmr.msra.gmra.mxu3 %v441_v60  ;;  %635 = vmatpush.msrb.mxu2 %v557_v63  ;;  %v578_v32 = vld [vmem:[#allocation6 + $0x3a0] sm:$0xff]  ;;  %v541_v33 = vld [vmem:[#allocation6 + $0x278] sm:$0xff]  ;;  %v544_v35 = vld [vmem:[#allocation6 + $0x290] sm:$0xff] }
  0x5c   : > { %655 = vmatpush.msrb.mxu3 %v589_v0  ;;  %459 = vmatpush.msra.mxu0 %v374_v5  ;;  %v573_v34 = vld [vmem:[#allocation6 + $0x378] sm:$0xff]  ;;  %v576_v36 = vld [vmem:[#allocation6 + $0x390] sm:$0xff]  ;;  %v539_v37 = vld [vmem:[#allocation6 + $0x268] sm:$0xff] }
  0x5d   : > { %636 = vmatpush.msrb.mxu2 %v555_v3  ;;  %479 = vmatpush.msra.mxu1 %v406_v6  ;;  %v571_v38 = vld [vmem:[#allocation6 + $0x368] sm:$0xff]  ;;  %v542_v39 = vld [vmem:[#allocation6 + $0x280] sm:$0xff]  ;;  %v537_v41 = vld [vmem:[#allocation6 + $0x258] sm:$0xff] }
  0x5e   : > { %656 = vmatpush.msrb.mxu3 %v587_v4  ;;  %460 = vmatmul.f32.vlgmr.msra.gmra.mxu0 %v440_v59  ;;  %v574_v40 = vld [vmem:[#allocation6 + $0x380] sm:$0xff]  ;;  %v569_v43 = vld [vmem:[#allocation6 + $0x358] sm:$0xff]  ;;  %v540_v44 = vld [vmem:[#allocation6 + $0x270] sm:$0xff] }
  0x5f   : > { %637 = vmatpush.msrb.mxu2 %v553_v7  ;;  %480 = vmatmul.f32.vlgmr.msra.gmra.mxu1 %v441_v60  ;;  %v572_v45 = vld [vmem:[#allocation6 + $0x370] sm:$0xff]  ;;  %v535_v46 = vld [vmem:[#allocation6 + $0x248] sm:$0xff]  ;;  %v538_v48 = vld [vmem:[#allocation6 + $0x260] sm:$0xff] }
  0x60   : > { %657 = vmatpush.msrb.mxu3 %v585_v8  ;;  %595 = vmatpush.msrb.mxu0 %v556_v9  ;;  %v567_v47 = vld [vmem:[#allocation6 + $0x348] sm:$0xff]  ;;  %v570_v49 = vld [vmem:[#allocation6 + $0x360] sm:$0xff]  ;;  %v533_v50 = vld [vmem:[#allocation6 + $0x238] sm:$0xff] }
  0x61   : > { %615 = vmatpush.msrb.mxu1 %v588_v10  ;;  %638 = vmatpush.msrb.mxu2 %v551_v11  ;;  %v565_v51 = vld [vmem:[#allocation6 + $0x338] sm:$0xff]  ;;  %v536_v52 = vld [vmem:[#allocation6 + $0x250] sm:$0xff]  ;;  %v531_v54 = vld [vmem:[#allocation6 + $0x228] sm:$0xff] }
  0x62   : > { %658 = vmatpush.msrb.mxu3 %v583_v12  ;;  %596 = vmatpush.msrb.mxu0 %v554_v13  ;;  %v568_v53 = vld [vmem:[#allocation6 + $0x350] sm:$0xff]  ;;  %v563_v55 = vld [vmem:[#allocation6 + $0x328] sm:$0xff]  ;;  %v534_v56 = vld [vmem:[#allocation6 + $0x240] sm:$0xff] }
  0x63   : > { %616 = vmatpush.msrb.mxu1 %v586_v14  ;;  %639 = vmatpush.msrb.mxu2 %v549_v15  ;;  %v566_v57 = vld [vmem:[#allocation6 + $0x340] sm:$0xff]  ;;  %v529_v58 = vld [vmem:[#allocation6 + $0x218] sm:$0xff]  ;;  %v532_v60 = vld [vmem:[#allocation6 + $0x230] sm:$0xff] }
  0x64   : > { %659 = vmatpush.msrb.mxu3 %v581_v16  ;;  %597 = vmatpush.msrb.mxu0 %v552_v17  ;;  %v561_v59 = vld [vmem:[#allocation6 + $0x318] sm:$0xff]  ;;  %v564_v61 = vld [vmem:[#allocation6 + $0x330] sm:$0xff]  ;;  %v527_v62 = vld [vmem:[#allocation6 + $0x208] sm:$0xff] }
  0x65   : > { %617 = vmatpush.msrb.mxu1 %v584_v18  ;;  %640 = vmatpush.msrb.mxu2 %v547_v19  ;;  %v559_v63 = vld [vmem:[#allocation6 + $0x308] sm:$0xff]  ;;  %v530_v0 = vld [vmem:[#allocation6 + $0x220] sm:$0xff]  ;;  %v528_v2 = vld [vmem:[#allocation6 + $0x210] sm:$0xff] }
  0x66   : > { %660 = vmatpush.msrb.mxu3 %v579_v20  ;;  %598 = vmatpush.msrb.mxu0 %v550_v21  ;;  %v562_v1 = vld [vmem:[#allocation6 + $0x320] sm:$0xff]  ;;  %v560_v3 = vld [vmem:[#allocation6 + $0x310] sm:$0xff]  ;;  %v809_v11 = vld [vmem:[#allocation6 + $0x4f8] sm:$0xff] }
  0x67   : > { %618 = vmatpush.msrb.mxu1 %v582_v22  ;;  %641 = vmatpush.msrb.mxu2 %v545_v25  ;;  %v526_v4 = vld [vmem:[#allocation6 + $0x200] sm:$0xff]  ;;  %v841_v13 = vld [vmem:[#allocation6 + $0x5f8] sm:$0xff]  ;;  %v524_v14 = vld [vmem:[%s5323_s2] sm:$0xf] }
  0x68   : > { %661 = vmatpush.msrb.mxu3 %v577_v26  ;;  %599 = vmatpush.msrb.mxu0 %v548_v27  ;;  %v558_v5 = vld [vmem:[#allocation6 + $0x300] sm:$0xff]  ;;  %v807_v15 = vld [vmem:[#allocation6 + $0x4e8] sm:$0xff]  ;;  %v805_v17 = vld [vmem:[#allocation6 + $0x4d8] sm:$0xff] }
  0x69   : > { %619 = vmatpush.msrb.mxu1 %v580_v28  ;;  %642 = vmatpush.msrb.mxu2 %v543_v29  ;;  %v839_v16 = vld [vmem:[#allocation6 + $0x5e8] sm:$0xff]  ;;  %v837_v18 = vld [vmem:[#allocation6 + $0x5d8] sm:$0xff]  ;;  %v4890_v20 = vld.sshfl [vmem:[#allocation1 + $0x8] sm:$0xff pattern:$0x75316420] }
  0x6a   : > { %662 = vmatpush.msrb.mxu3 %v575_v30  ;;  %600 = vmatpush.msrb.mxu0 %v546_v31  ;;  %v4888_v19 = vld.sshfl [vmem:[#allocation1] sm:$0xff pattern:$0x75316420]  ;;  %v797_v27 = vld [vmem:[#allocation6 + $0x498] sm:$0xff] }
  0x6b   : > { %620 = vmatpush.msrb.mxu1 %v578_v32  ;;  %643 = vmatpush.msrb.mxu2 %v541_v33  ;;  %v803_v21 = vld [vmem:[#allocation6 + $0x4c8] sm:$0xff]  ;;  %1045 = vst [vmem:[#allocation1] ss:$2 sm:$0xff] %v4868_v42  ;;  %v829_v28 = vld [vmem:[#allocation6 + $0x598] sm:$0xff] }
  0x6c   : > { %663 = vmatpush.msrb.mxu3 %v573_v34  ;;  %601 = vmatpush.msrb.mxu0 %v544_v35  ;;  %v835_v22 = vld [vmem:[#allocation6 + $0x5c8] sm:$0xff]  ;;  %v793_v31 = vld [vmem:[#allocation6 + $0x478] sm:$0xff] }
  0x6d   : > { %621 = vmatpush.msrb.mxu1 %v576_v36  ;;  %644 = vmatpush.msrb.mxu2 %v539_v37  ;;  %v799_v25 = vld [vmem:[#allocation6 + $0x4a8] sm:$0xff]  ;;  %v825_v32 = vld [vmem:[#allocation6 + $0x578] sm:$0xff] }
  0x6e   : > { %664 = vmatpush.msrb.mxu3 %v571_v38  ;;  %602 = vmatpush.msrb.mxu0 %v542_v39  ;;  %v831_v26 = vld [vmem:[#allocation6 + $0x5a8] sm:$0xff]  ;;  %v789_v35 = vld [vmem:[#allocation6 + $0x458] sm:$0xff] }
  0x6f   : > { %622 = vmatpush.msrb.mxu1 %v574_v40  ;;  %645 = vmatpush.msrb.mxu2 %v537_v41  ;;  %v795_v29 = vld [vmem:[#allocation6 + $0x488] sm:$0xff]  ;;  %v821_v36 = vld [vmem:[#allocation6 + $0x558] sm:$0xff] }
  0x70   : > { %665 = vmatpush.msrb.mxu3 %v569_v43  ;;  %603 = vmatpush.msrb.mxu0 %v540_v44  ;;  %v827_v30 = vld [vmem:[#allocation6 + $0x588] sm:$0xff]  ;;  %v785_v39 = vld [vmem:[#allocation6 + $0x438] sm:$0xff] }
  0x71   : > { %623 = vmatpush.msrb.mxu1 %v572_v45  ;;  %646 = vmatpush.msrb.mxu2 %v535_v46  ;;  %v791_v33 = vld [vmem:[#allocation6 + $0x468] sm:$0xff]  ;;  %v817_v40 = vld [vmem:[#allocation6 + $0x538] sm:$0xff] }
  0x72   : > { %666 = vmatpush.msrb.mxu3 %v567_v47  ;;  %604 = vmatpush.msrb.mxu0 %v538_v48  ;;  %v823_v34 = vld [vmem:[#allocation6 + $0x568] sm:$0xff]  ;;  %v781_v44 = vld [vmem:[#allocation6 + $0x418] sm:$0xff] }
  0x73   : > { %624 = vmatpush.msrb.mxu1 %v570_v49  ;;  %647 = vmatpush.msrb.mxu2 %v533_v50  ;;  %v787_v37 = vld [vmem:[#allocation6 + $0x448] sm:$0xff]  ;;  %v813_v45 = vld [vmem:[#allocation6 + $0x518] sm:$0xff] }
  0x74   : > { %667 = vmatpush.msrb.mxu3 %v565_v51  ;;  %605 = vmatpush.msrb.mxu0 %v536_v52  ;;  %v819_v38 = vld [vmem:[#allocation6 + $0x548] sm:$0xff] }
  0x75   : > { %625 = vmatpush.msrb.mxu1 %v568_v53  ;;  %648 = vmatpush.msrb.mxu2 %v531_v54  ;;  %v783_v41 = vld [vmem:[#allocation6 + $0x428] sm:$0xff]  ;;  %v808_v53 = vld [vmem:[#allocation6 + $0x4f0] sm:$0xff] }
  0x76   : > { %668 = vmatpush.msrb.mxu3 %v563_v55  ;;  %606 = vmatpush.msrb.mxu0 %v534_v56  ;;  %v815_v43 = vld [vmem:[#allocation6 + $0x528] sm:$0xff]  ;;  %v840_v55 = vld [vmem:[#allocation6 + $0x5f0] sm:$0xff] }
  0x77   : > { %626 = vmatpush.msrb.mxu1 %v566_v57  ;;  %649 = vmatpush.msrb.mxu2 %v529_v58  ;;  %v779_v46 = vld [vmem:[#allocation6 + $0x408] sm:$0xff]  ;;  %v1011_v56 = vld [vmem:[#allocation6 + $0x6f0] sm:$0xff]  ;;  %v806_v58 = vld [vmem:[#allocation6 + $0x4e0] sm:$0xff] }
  0x78   : > { %669 = vmatpush.msrb.mxu3 %v561_v59  ;;  %607 = vmatpush.msrb.mxu0 %v532_v60  ;;  %v811_v47 = vld [vmem:[#allocation6 + $0x508] sm:$0xff]  ;;  %v1043_v57 = vld [vmem:[#allocation6 + $0x7f0] sm:$0xff]  ;;  %v838_v59 = vld [vmem:[#allocation6 + $0x5e0] sm:$0xff] }
  0x79   : > { %627 = vmatpush.msrb.mxu1 %v564_v61  ;;  %650 = vmatpush.msrb.mxu2 %v527_v62  ;;  %v1009_v60 = vld [vmem:[#allocation6 + $0x6e0] sm:$0xff]  ;;  %v804_v62 = vld [vmem:[#allocation6 + $0x4d0] sm:$0xff] }
  0x7a   : > { %670 = vmatpush.msrb.mxu3 %v559_v63  ;;  %651 = vmatmul.f32.vlgmr.msrb.gmra.mxu2 %v4872_v23  ;;  %v1041_v61 = vld [vmem:[#allocation6 + $0x7e0] sm:$0xff]  ;;  %v4897_v63 = vld.sshfl [vmem:[#allocation1] sm:$0xff pattern:$0x75316420] }
  0x7b   : > { %671 = vmatmul.f32.vlgmr.msrb.gmra.mxu3 %v4874_v24  ;;  %608 = vmatpush.msrb.mxu0 %v530_v0  ;;  %v4899_v0 = vld.sshfl [vmem:[#allocation1 + $0x8] sm:$0xff pattern:$0x75316420] }
  0x7c   : > { %628 = vmatpush.msrb.mxu1 %v562_v1  ;;  %v836_v1 = vld [vmem:[#allocation6 + $0x5d0] sm:$0xff]  ;;  %1248 = vst [vmem:[#allocation1] ss:$2 sm:$0xff] %v4868_v42 }
  0x7d   : > { %609 = vmatpush.msrb.mxu0 %v528_v2  ;;  %v1007_v2 = vld [vmem:[#allocation6 + $0x6d0] sm:$0xff] }
  0x7e   : > { %629 = vmatpush.msrb.mxu1 %v560_v3  ;;  %v1039_v3 = vld [vmem:[#allocation6 + $0x7d0] sm:$0xff] }
  0x7f   : > { %610 = vmatpush.msrb.mxu0 %v526_v4  ;;  %v802_v4 = vld [vmem:[#allocation6 + $0x4c0] sm:$0xff] }
  0x80   : > { %630 = vmatpush.msrb.mxu1 %v558_v5  ;;  %611 = vmatmul.f32.vlgmr.msrb.gmra.mxu0 %v4872_v23  ;;  %v801_v23 = vld [vmem:[#allocation6 + $0x4b8] sm:$0xff]  ;;  %v834_v5 = vld [vmem:[#allocation6 + $0x5c0] sm:$0xff] }
  0x81   : > { %631 = vmatmul.f32.vlgmr.msrb.gmra.mxu1 %v4874_v24  ;;  %v833_v24 = vld [vmem:[#allocation6 + $0x5b8] sm:$0xff] }
  0xdb   : > { %v461_v6 = vpop.f32.mrf.mxu0 }
  0xdc   : > { %v481_v7 = vpop.f32.mrf.mxu1 }
  0xdd   : > { %v482_v8 = vadd.f32 %v481_v7, %v461_v6  ;;  %v501_v9 = vpop.f32.mrf.mxu2  ;;  %v1005_v6 = vld [vmem:[#allocation6 + $0x6c0] sm:$0xff] }
  0xde   : > { %v521_v10 = vpop.f32.mrf.mxu3  ;;  %v1037_v7 = vld [vmem:[#allocation6 + $0x7c0] sm:$0xff] }
  0xdf   : > { %v522_v12 = vadd.f32 %v521_v10, %v501_v9  ;;  %3742 = vmatpush.msk.msra.mxu2 %vm681_vm0, %v482_v8  ;;  %v800_v8 = vld [vmem:[#allocation6 + $0x4b0] sm:$0xff] }
  0xe0   : > { %3743 = vmatmul.msk.f32.vlgmr.msra.gmra.mxu2 %vm677_vm1, %v524_v14  ;;  %v832_v9 = vld [vmem:[#allocation6 + $0x5b0] sm:$0xff] }
  0xe1   : > { %3744 = vmatpush.msk.msra.mxu3 %vm681_vm0, %v522_v12  ;;  %887 = vmatpush.msrb.mxu2 %v809_v11  ;;  %v1003_v10 = vld [vmem:[#allocation6 + $0x6b0] sm:$0xff]  ;;  %v798_v12 = vld [vmem:[#allocation6 + $0x4a0] sm:$0xff] }
  0xe2   : > { %3745 = vmatmul.msk.f32.vlgmr.msra.gmra.mxu3 %vm677_vm1, %v524_v14  ;;  %v1035_v11 = vld [vmem:[#allocation6 + $0x7b0] sm:$0xff]  ;;  %v1001_v14 = vld [vmem:[#allocation6 + $0x6a0] sm:$0xff] }
  0xe3   : > { %907 = vmatpush.msrb.mxu3 %v841_v13  ;;  %888 = vmatpush.msrb.mxu2 %v807_v15  ;;  %v830_v13 = vld [vmem:[#allocation6 + $0x5a0] sm:$0xff] }
  0xe4   : > { %v1033_v15 = vld [vmem:[#allocation6 + $0x7a0] sm:$0xff] }
  0xe5   : > { %908 = vmatpush.msrb.mxu3 %v839_v16  ;;  %889 = vmatpush.msrb.mxu2 %v805_v17  ;;  %v796_v16 = vld [vmem:[#allocation6 + $0x490] sm:$0xff] }
  0xe6   : > { %v828_v17 = vld [vmem:[#allocation6 + $0x590] sm:$0xff] }
  0xe7   : > { %909 = vmatpush.msrb.mxu3 %v837_v18  ;;  %890 = vmatpush.msrb.mxu2 %v803_v21  ;;  %v999_v18 = vld [vmem:[#allocation6 + $0x690] sm:$0xff] }
  0xe8   : > { %v1031_v21 = vld [vmem:[#allocation6 + $0x790] sm:$0xff] }
  0xe9   : > { %910 = vmatpush.msrb.mxu3 %v835_v22  ;;  %891 = vmatpush.msrb.mxu2 %v801_v23  ;;  %v794_v22 = vld [vmem:[#allocation6 + $0x480] sm:$0xff] }
  0xea   : > { %v826_v23 = vld [vmem:[#allocation6 + $0x580] sm:$0xff] }
  0xeb   : > { %911 = vmatpush.msrb.mxu3 %v833_v24  ;;  %892 = vmatpush.msrb.mxu2 %v799_v25  ;;  %v997_v24 = vld [vmem:[#allocation6 + $0x680] sm:$0xff] }
  0xec   : > { %v1029_v25 = vld [vmem:[#allocation6 + $0x780] sm:$0xff] }
  0xed   : > { %912 = vmatpush.msrb.mxu3 %v831_v26  ;;  %893 = vmatpush.msrb.mxu2 %v797_v27  ;;  %v792_v26 = vld [vmem:[#allocation6 + $0x470] sm:$0xff] }
  0xee   : > { %v824_v27 = vld [vmem:[#allocation6 + $0x570] sm:$0xff] }
  0xef   : > { %913 = vmatpush.msrb.mxu3 %v829_v28  ;;  %894 = vmatpush.msrb.mxu2 %v795_v29  ;;  %v995_v28 = vld [vmem:[#allocation6 + $0x670] sm:$0xff] }
  0xf0   : > { %v1027_v29 = vld [vmem:[#allocation6 + $0x770] sm:$0xff] }
  0xf1   : > { %914 = vmatpush.msrb.mxu3 %v827_v30  ;;  %895 = vmatpush.msrb.mxu2 %v793_v31  ;;  %v790_v30 = vld [vmem:[#allocation6 + $0x460] sm:$0xff] }
  0xf2   : > { %v822_v31 = vld [vmem:[#allocation6 + $0x560] sm:$0xff] }
  0xf3   : > { %915 = vmatpush.msrb.mxu3 %v825_v32  ;;  %896 = vmatpush.msrb.mxu2 %v791_v33  ;;  %v993_v32 = vld [vmem:[#allocation6 + $0x660] sm:$0xff] }
  0xf4   : > { %v1025_v33 = vld [vmem:[#allocation6 + $0x760] sm:$0xff] }
  0xf5   : > { %916 = vmatpush.msrb.mxu3 %v823_v34  ;;  %897 = vmatpush.msrb.mxu2 %v789_v35  ;;  %v788_v34 = vld [vmem:[#allocation6 + $0x450] sm:$0xff] }
  0xf6   : > { %v820_v35 = vld [vmem:[#allocation6 + $0x550] sm:$0xff] }
  0xf7   : > { %917 = vmatpush.msrb.mxu3 %v821_v36  ;;  %898 = vmatpush.msrb.mxu2 %v787_v37  ;;  %v991_v36 = vld [vmem:[#allocation6 + $0x650] sm:$0xff] }
  0xf8   : > { %v1023_v37 = vld [vmem:[#allocation6 + $0x750] sm:$0xff] }
  0xf9   : > { %918 = vmatpush.msrb.mxu3 %v819_v38  ;;  %899 = vmatpush.msrb.mxu2 %v785_v39  ;;  %v786_v38 = vld [vmem:[#allocation6 + $0x440] sm:$0xff] }
  0xfa   : > { %v818_v39 = vld [vmem:[#allocation6 + $0x540] sm:$0xff] }
  0xfb   : > { %919 = vmatpush.msrb.mxu3 %v817_v40  ;;  %900 = vmatpush.msrb.mxu2 %v783_v41  ;;  %v989_v40 = vld [vmem:[#allocation6 + $0x640] sm:$0xff] }
  0xfc   : > { %v1021_v41 = vld [vmem:[#allocation6 + $0x740] sm:$0xff] }
  0xfd   : > { %920 = vmatpush.msrb.mxu3 %v815_v43  ;;  %901 = vmatpush.msrb.mxu2 %v781_v44  ;;  %v612_v48 = vpop.f32.mrf.mxu0  ;;  %v652_v51 = vpop.f32.mrf.mxu2  ;;  %v3737_v43 = vld [vmem:[%s5323_s2 + $0x4] sm:$0xf]  ;;  %v784_v44 = vld [vmem:[#allocation6 + $0x430] sm:$0xff] }
  0xfe   : > { %v632_v49 = vpop.f32.mrf.mxu1  ;;  %v672_v52 = vpop.f32.mrf.mxu3 }
  0xff   : > { %921 = vmatpush.msrb.mxu3 %v813_v45  ;;  %v633_v50 = vadd.f32 %v632_v49, %v612_v48  ;;  %902 = vmatpush.msrb.mxu2 %v779_v46  ;;  %v673_v54 = vadd.f32 %v672_v52, %v652_v51  ;;  %v816_v45 = vld [vmem:[#allocation6 + $0x530] sm:$0xff]  ;;  %v782_v48 = vld [vmem:[#allocation6 + $0x420] sm:$0xff] }
 0x100   : > { %903 = vmatmul.f32.vlgmr.msrb.gmra.mxu2 %v4888_v19  ;;  %v987_v46 = vld [vmem:[#allocation6 + $0x630] sm:$0xff]  ;;  %v814_v49 = vld [vmem:[#allocation6 + $0x520] sm:$0xff] }
 0x101   : > { %922 = vmatpush.msrb.mxu3 %v811_v47  ;;  %3738 = vmatpush.msk.msra.mxu0 %vm681_vm0, %v633_v50  ;;  %v1019_v47 = vld [vmem:[#allocation6 + $0x730] sm:$0xff]  ;;  %v985_v50 = vld [vmem:[#allocation6 + $0x620] sm:$0xff] }
 0x102   : > { %923 = vmatmul.f32.vlgmr.msrb.gmra.mxu3 %v4890_v20  ;;  %3740 = vmatpush.msk.msra.mxu1 %vm681_vm0, %v673_v54  ;;  %v1017_v51 = vld [vmem:[#allocation6 + $0x720] sm:$0xff]  ;;  %v780_v52 = vld [vmem:[#allocation6 + $0x410] sm:$0xff] }
 0x103   : > { %847 = vmatpush.msrb.mxu0 %v808_v53  ;;  %1050 = vmatpush.msra.mxu2 %v1011_v56  ;;  %v812_v53 = vld [vmem:[#allocation6 + $0x510] sm:$0xff]  ;;  %v778_v56 = vld [vmem:[#allocation6 + $0x400] sm:$0xff] }
 0x104   : > { %867 = vmatpush.msrb.mxu1 %v840_v55  ;;  %1070 = vmatpush.msra.mxu3 %v1043_v57  ;;  %v983_v54 = vld [vmem:[#allocation6 + $0x610] sm:$0xff]  ;;  %v810_v57 = vld [vmem:[#allocation6 + $0x500] sm:$0xff] }
 0x105   : > { %848 = vmatpush.msrb.mxu0 %v806_v58  ;;  %1051 = vmatpush.msra.mxu2 %v1009_v60  ;;  %v1015_v55 = vld [vmem:[#allocation6 + $0x710] sm:$0xff]  ;;  %v981_v58 = vld [vmem:[#allocation6 + $0x600] sm:$0xff] }
 0x106   : > { %868 = vmatpush.msrb.mxu1 %v838_v59  ;;  %1071 = vmatpush.msra.mxu3 %v1041_v61  ;;  %v1013_v59 = vld [vmem:[#allocation6 + $0x700] sm:$0xff] }
 0x107   : > { %849 = vmatpush.msrb.mxu0 %v804_v62  ;;  %1052 = vmatpush.msra.mxu2 %v1007_v2 }
 0x108   : > { %869 = vmatpush.msrb.mxu1 %v836_v1  ;;  %1072 = vmatpush.msra.mxu3 %v1039_v3  ;;  %v3746_v3 = vld [vmem:[%s5323_s2 + $0x8] sm:$0xf] }
 0x109   : > { %850 = vmatpush.msrb.mxu0 %v802_v4  ;;  %1053 = vmatpush.msra.mxu2 %v1005_v6  ;;  %v1044_v4 = vld [vmem:[#allocation6 + $0x7f8] sm:$0xff] }
 0x10a   : > { %870 = vmatpush.msrb.mxu1 %v834_v5  ;;  %1073 = vmatpush.msra.mxu3 %v1037_v7  ;;  %v1038_v5 = vld [vmem:[#allocation6 + $0x7c8] sm:$0xff]  ;;  %v1036_v6 = vld [vmem:[#allocation6 + $0x7b8] sm:$0xff] }
 0x10b   : > { %851 = vmatpush.msrb.mxu0 %v800_v8  ;;  %1054 = vmatpush.msra.mxu2 %v1003_v10  ;;  %v1034_v7 = vld [vmem:[#allocation6 + $0x7a8] sm:$0xff]  ;;  %v1032_v8 = vld [vmem:[#allocation6 + $0x798] sm:$0xff] }
 0x10c   : > { %871 = vmatpush.msrb.mxu1 %v832_v9  ;;  %1074 = vmatpush.msra.mxu3 %v1035_v11  ;;  %v1030_v9 = vld [vmem:[#allocation6 + $0x788] sm:$0xff]  ;;  %v1028_v10 = vld [vmem:[#allocation6 + $0x778] sm:$0xff] }
 0x10d   : > { %852 = vmatpush.msrb.mxu0 %v798_v12  ;;  %1055 = vmatpush.msra.mxu2 %v1001_v14  ;;  %v1024_v14 = vld [vmem:[#allocation6 + $0x758] sm:$0xff] }
 0x10e   : > { %872 = vmatpush.msrb.mxu1 %v830_v13  ;;  %1075 = vmatpush.msra.mxu3 %v1033_v15  ;;  %v1026_v13 = vld [vmem:[#allocation6 + $0x768] sm:$0xff] }
 0x10f   : > { %853 = vmatpush.msrb.mxu0 %v796_v16  ;;  %1056 = vmatpush.msra.mxu2 %v999_v18  ;;  %v1022_v15 = vld [vmem:[#allocation6 + $0x748] sm:$0xff]  ;;  %v1020_v16 = vld [vmem:[#allocation6 + $0x738] sm:$0xff] }
 0x110   : > { %873 = vmatpush.msrb.mxu1 %v828_v17  ;;  %1076 = vmatpush.msra.mxu3 %v1031_v21  ;;  %v1018_v18 = vld [vmem:[#allocation6 + $0x728] sm:$0xff] }
 0x111   : > { %854 = vmatpush.msrb.mxu0 %v794_v22  ;;  %1057 = vmatpush.msra.mxu2 %v997_v24  ;;  %v1012_v24 = vld [vmem:[#allocation6 + $0x6f8] sm:$0xff] }
 0x112   : > { %874 = vmatpush.msrb.mxu1 %v826_v23  ;;  %1077 = vmatpush.msra.mxu3 %v1029_v25  ;;  %v1016_v23 = vld [vmem:[#allocation6 + $0x718] sm:$0xff]  ;;  %v1014_v25 = vld [vmem:[#allocation6 + $0x708] sm:$0xff] }
 0x113   : > { %855 = vmatpush.msrb.mxu0 %v792_v26  ;;  %1058 = vmatpush.msra.mxu2 %v995_v28  ;;  %v1010_v26 = vld [vmem:[#allocation6 + $0x6e8] sm:$0xff] }
 0x114   : > { %875 = vmatpush.msrb.mxu1 %v824_v27  ;;  %1078 = vmatpush.msra.mxu3 %v1027_v29  ;;  %v1246_v27 = vld [vmem:[#allocation6 + $0x9f0] sm:$0xff]  ;;  %v1008_v29 = vld [vmem:[#allocation6 + $0x6d8] sm:$0xff] }
 0x115   : > { %856 = vmatpush.msrb.mxu0 %v790_v30  ;;  %1059 = vmatpush.msra.mxu2 %v993_v32 }
 0x116   : > { %876 = vmatpush.msrb.mxu1 %v822_v31  ;;  %1079 = vmatpush.msra.mxu3 %v1025_v33  ;;  %v1244_v31 = vld [vmem:[#allocation6 + $0x9e0] sm:$0xff]  ;;  %v1006_v33 = vld [vmem:[#allocation6 + $0x6c8] sm:$0xff] }
 0x117   : > { %857 = vmatpush.msrb.mxu0 %v788_v34  ;;  %1060 = vmatpush.msra.mxu2 %v991_v36  ;;  %v4930_v34 = vld [vmem:[%s5323_s2 + $0xc] sm:$0xf]  ;;  %v1004_v36 = vld [vmem:[#allocation6 + $0x6b8] sm:$0xff] }
 0x118   : > { %877 = vmatpush.msrb.mxu1 %v820_v35  ;;  %1080 = vmatpush.msra.mxu3 %v1023_v37  ;;  %v1242_v35 = vld [vmem:[#allocation6 + $0x9d0] sm:$0xff]  ;;  %v1002_v37 = vld [vmem:[#allocation6 + $0x6a8] sm:$0xff] }
 0x119   : > { %858 = vmatpush.msrb.mxu0 %v786_v38  ;;  %1061 = vmatpush.msra.mxu2 %v989_v40  ;;  %v1238_v38 = vld [vmem:[#allocation6 + $0x9b0] sm:$0xff]  ;;  %v1236_v40 = vld [vmem:[#allocation6 + $0x9a0] sm:$0xff] }
 0x11a   : > { %878 = vmatpush.msrb.mxu1 %v818_v39  ;;  %1081 = vmatpush.msra.mxu3 %v1021_v41  ;;  %v1000_v39 = vld [vmem:[#allocation6 + $0x698] sm:$0xff]  ;;  %v998_v41 = vld [vmem:[#allocation6 + $0x688] sm:$0xff] }
 0x11b   : > { %3739 = vmatmul.msk.f32.vlgmr.msra.gmra.mxu0 %vm677_vm1, %v3737_v43  ;;  %3741 = vmatmul.msk.f32.vlgmr.msra.gmra.mxu1 %vm677_vm1, %v3737_v43  ;;  %v1234_v43 = vld [vmem:[#allocation6 + $0x990] sm:$0xff] }
 0x11c   : > { %859 = vmatpush.msrb.mxu0 %v784_v44  ;;  %879 = vmatpush.msrb.mxu1 %v816_v45  ;;  %v996_v44 = vld [vmem:[#allocation6 + $0x678] sm:$0xff]  ;;  %v1232_v45 = vld [vmem:[#allocation6 + $0x980] sm:$0xff] }
 0x11d   : > { %1062 = vmatpush.msra.mxu2 %v987_v46  ;;  %1082 = vmatpush.msra.mxu3 %v1019_v47  ;;  %v994_v46 = vld [vmem:[#allocation6 + $0x668] sm:$0xff]  ;;  %v1230_v47 = vld [vmem:[#allocation6 + $0x970] sm:$0xff] }
 0x11e   : > { %860 = vmatpush.msrb.mxu0 %v782_v48  ;;  %880 = vmatpush.msrb.mxu1 %v814_v49  ;;  %v992_v48 = vld [vmem:[#allocation6 + $0x658] sm:$0xff]  ;;  %v1228_v49 = vld [vmem:[#allocation6 + $0x960] sm:$0xff] }
 0x11f   : > { %1063 = vmatpush.msra.mxu2 %v985_v50  ;;  %1083 = vmatpush.msra.mxu3 %v1017_v51  ;;  %v990_v50 = vld [vmem:[#allocation6 + $0x648] sm:$0xff]  ;;  %v1226_v51 = vld [vmem:[#allocation6 + $0x950] sm:$0xff] }
 0x120   : > { %861 = vmatpush.msrb.mxu0 %v780_v52  ;;  %881 = vmatpush.msrb.mxu1 %v812_v53  ;;  %v988_v52 = vld [vmem:[#allocation6 + $0x638] sm:$0xff]  ;;  %v1224_v53 = vld [vmem:[#allocation6 + $0x940] sm:$0xff] }
 0x121   : > { %1064 = vmatpush.msra.mxu2 %v983_v54  ;;  %1084 = vmatpush.msra.mxu3 %v1015_v55  ;;  %v986_v54 = vld [vmem:[#allocation6 + $0x628] sm:$0xff]  ;;  %v1222_v55 = vld [vmem:[#allocation6 + $0x930] sm:$0xff] }
 0x122   : > { %862 = vmatpush.msrb.mxu0 %v778_v56  ;;  %882 = vmatpush.msrb.mxu1 %v810_v57  ;;  %v984_v56 = vld [vmem:[#allocation6 + $0x618] sm:$0xff]  ;;  %v1220_v57 = vld [vmem:[#allocation6 + $0x920] sm:$0xff] }
 0x123   : > { %1065 = vmatpush.msra.mxu2 %v981_v58  ;;  %1085 = vmatpush.msra.mxu3 %v1013_v59  ;;  %v982_v58 = vld [vmem:[#allocation6 + $0x608] sm:$0xff]  ;;  %v1218_v59 = vld [vmem:[#allocation6 + $0x910] sm:$0xff] }
 0x124   : > { %863 = vmatmul.f32.vlgmr.msrb.gmra.mxu0 %v4888_v19  ;;  %883 = vmatmul.f32.vlgmr.msrb.gmra.mxu1 %v4890_v20  ;;  %v1042_v19 = vld [vmem:[#allocation6 + $0x7e8] sm:$0xff]  ;;  %v1040_v20 = vld [vmem:[#allocation6 + $0x7d8] sm:$0xff] }
 0x125   : > { %1066 = vmatmul.f32.vlgmr.msra.gmra.mxu2 %v4897_v63  ;;  %1086 = vmatmul.f32.vlgmr.msra.gmra.mxu3 %v4899_v0 }
 0x163   : > { %v4911_v60 = vpop.f32.mrf.mxu2 }
 0x165   : > { %v4913_v61 = vpop.f32.mrf.mxu3 }
 0x183   : > { %v904_v62 = vpop.f32.mrf.mxu2 }
 0x185   : > { %v924_v1 = vpop.f32.mrf.mxu3 }
 0x186   : > { %v925_v2 = vadd.f32 %v924_v1, %v904_v62  ;;  %v1214_v62 = vld [vmem:[#allocation6 + $0x8f0] sm:$0xff]  ;;  %v1216_v1 = vld [vmem:[#allocation6 + $0x900] sm:$0xff] }
 0x188   : > { %3749 = vmatpush.msk.msra.mxu1 %vm681_vm0, %v925_v2  ;;  %v4935_v2 = vld.sshfl [vmem:[#allocation1] sm:$0xff pattern:$0x75316420] }
 0x189   : > { %3750 = vmatmul.msk.f32.vlgmr.msra.gmra.mxu1 %vm677_vm1, %v3746_v3 }
 0x18a   : > { %1110 = vmatpush.msrb.mxu1 %v1044_v4  ;;  %v1212_v4 = vld [vmem:[#allocation6 + $0x8e0] sm:$0xff] }
 0x18c   : > { %1111 = vmatpush.msrb.mxu1 %v1042_v19  ;;  %v1210_v19 = vld [vmem:[#allocation6 + $0x8d0] sm:$0xff] }
 0x18e   : > { %1112 = vmatpush.msrb.mxu1 %v1040_v20  ;;  %v1208_v20 = vld [vmem:[#allocation6 + $0x8c0] sm:$0xff] }
 0x190   : > { %1113 = vmatpush.msrb.mxu1 %v1038_v5  ;;  %v1206_v5 = vld [vmem:[#allocation6 + $0x8b0] sm:$0xff] }
 0x192   : > { %1114 = vmatpush.msrb.mxu1 %v1036_v6  ;;  %v1204_v6 = vld [vmem:[#allocation6 + $0x8a0] sm:$0xff] }
 0x194   : > { %1115 = vmatpush.msrb.mxu1 %v1034_v7  ;;  %v1202_v7 = vld [vmem:[#allocation6 + $0x890] sm:$0xff] }
 0x196   : > { %1116 = vmatpush.msrb.mxu1 %v1032_v8  ;;  %v1200_v8 = vld [vmem:[#allocation6 + $0x880] sm:$0xff] }
 0x198   : > { %v4920_v11 = vpop.f32.mrf.mxu0  ;;  %1117 = vmatpush.msrb.mxu1 %v1030_v9  ;;  %v4922_v12 = vpop.f32.mrf.mxu1  ;;  %v1196_v9 = vld [vmem:[#allocation6 + $0x860] sm:$0xff] }
 0x19a   : > { %1118 = vmatpush.msrb.mxu1 %v1028_v10  ;;  %v1194_v10 = vld [vmem:[#allocation6 + $0x850] sm:$0xff] }
 0x19c   : > { %1119 = vmatpush.msrb.mxu1 %v1026_v13  ;;  %v1192_v13 = vld [vmem:[#allocation6 + $0x840] sm:$0xff] }
 0x19e   : > { %1120 = vmatpush.msrb.mxu1 %v1024_v14  ;;  %v1190_v14 = vld [vmem:[#allocation6 + $0x830] sm:$0xff] }
 0x1a0   : > { %1121 = vmatpush.msrb.mxu1 %v1022_v15  ;;  %v1188_v15 = vld [vmem:[#allocation6 + $0x820] sm:$0xff] }
 0x1a1   : > { %v864_v17 = vpop.f32.mrf.mxu0  ;;  %v884_v21 = vpop.f32.mrf.mxu1 }
 0x1a2   : > { %1122 = vmatpush.msrb.mxu1 %v1020_v16  ;;  %v885_v22 = vadd.f32 %v884_v21, %v864_v17  ;;  %v1186_v16 = vld [vmem:[#allocation6 + $0x810] sm:$0xff]  ;;  %v1184_v17 = vld [vmem:[#allocation6 + $0x800] sm:$0xff]  ;;  %v1213_v21 = vld [vmem:[#allocation6 + $0x8e8] sm:$0xff] }
 0x1a4   : > { %1123 = vmatpush.msrb.mxu1 %v1018_v18  ;;  %3747 = vmatpush.msk.msra.mxu0 %vm681_vm0, %v885_v22  ;;  %v1215_v18 = vld [vmem:[#allocation6 + $0x8f8] sm:$0xff] }
 0x1a5   : > { %3748 = vmatmul.msk.f32.vlgmr.msra.gmra.mxu0 %vm677_vm1, %v3746_v3  ;;  %v4937_v3 = vld.sshfl [vmem:[#allocation1 + $0x8] sm:$0xff pattern:$0x75316420]  ;;  %v1211_v22 = vld [vmem:[#allocation6 + $0x8d8] sm:$0xff] }
 0x1a6   : > { %1124 = vmatpush.msrb.mxu1 %v1016_v23  ;;  %1090 = vmatpush.msrb.mxu0 %v1012_v24  ;;  %1451 = vst [vmem:[#allocation1] ss:$2 sm:$0xff] %v4868_v42  ;;  %v1209_v23 = vld [vmem:[#allocation6 + $0x8c8] sm:$0xff]  ;;  %v1207_v24 = vld [vmem:[#allocation6 + $0x8b8] sm:$0xff] }
 0x1a8   : > { %v1067_v28 = vpop.f32.mrf.mxu2  ;;  %1125 = vmatpush.msrb.mxu1 %v1014_v25  ;;  %v1087_v30 = vpop.f32.mrf.mxu3  ;;  %1091 = vmatpush.msrb.mxu0 %v1010_v26  ;;  %v1205_v25 = vld [vmem:[#allocation6 + $0x8a8] sm:$0xff]  ;;  %v1203_v26 = vld [vmem:[#allocation6 + $0x898] sm:$0xff] }
 0x1a9   : > { %1126 = vmatmul.f32.vlgmr.msrb.gmra.mxu1 %v4899_v0  ;;  %v1088_v32 = vadd.f32 %v1087_v30, %v1067_v28  ;;  %v1240_v0 = vld [vmem:[#allocation6 + $0x9c0] sm:$0xff]  ;;  %v1199_v28 = vld [vmem:[#allocation6 + $0x878] sm:$0xff] }
 0x1aa   : > { %1273 = vmatpush.msra.mxu1 %v1246_v27  ;;  %1092 = vmatpush.msrb.mxu0 %v1008_v29  ;;  %v1201_v27 = vld [vmem:[#allocation6 + $0x888] sm:$0xff] }
 0x1ab   : > { %3752 = vmatpush.msk.msrb.mxu2 %vm681_vm0, %v1088_v32  ;;  %v1197_v29 = vld [vmem:[#allocation6 + $0x868] sm:$0xff] }
 0x1ac   : > { %1274 = vmatpush.msra.mxu1 %v1244_v31  ;;  %1093 = vmatpush.msrb.mxu0 %v1006_v33  ;;  %v1195_v31 = vld [vmem:[#allocation6 + $0x858] sm:$0xff]  ;;  %v1193_v33 = vld [vmem:[#allocation6 + $0x848] sm:$0xff] }
 0x1ad   : > { %3753 = vmatmul.msk.f32.vlgmr.msrb.gmra.mxu2 %vm677_vm1, %v4930_v34 }
 0x1ae   : > { %1275 = vmatpush.msra.mxu1 %v1242_v35  ;;  %1094 = vmatpush.msrb.mxu0 %v1004_v36  ;;  %v1191_v35 = vld [vmem:[#allocation6 + $0x838] sm:$0xff]  ;;  %v1189_v36 = vld [vmem:[#allocation6 + $0x828] sm:$0xff] }
 0x1af   : > { %1293 = vmatpush.msra.mxu2 %v1215_v18  ;;  %v4957_v18 = vld.sshfl [vmem:[#allocation1] sm:$0xff pattern:$0x75316420] }
 0x1b0   : > { %1276 = vmatpush.msra.mxu1 %v1240_v0  ;;  %1095 = vmatpush.msrb.mxu0 %v1002_v37 }
 0x1b1   : > { %1294 = vmatpush.msra.mxu2 %v1213_v21  ;;  %v4959_v21 = vld.sshfl [vmem:[#allocation1 + $0x8] sm:$0xff pattern:$0x75316420] }
 0x1b2   : > { %1277 = vmatpush.msra.mxu1 %v1238_v38  ;;  %1096 = vmatpush.msrb.mxu0 %v1000_v39  ;;  %v1187_v38 = vld [vmem:[#allocation6 + $0x818] sm:$0xff]  ;;  %1654 = vst [vmem:[#allocation1] ss:$2 sm:$0xff] %v4868_v42 }
 0x1b3   : > { %1295 = vmatpush.msra.mxu2 %v1211_v22  ;;  %v1447_v22 = vld [vmem:[#allocation6 + $0xbe0] sm:$0xff] }
 0x1b4   : > { %1278 = vmatpush.msra.mxu1 %v1236_v40  ;;  %1097 = vmatpush.msrb.mxu0 %v998_v41  ;;  %v1185_v40 = vld [vmem:[#allocation6 + $0x808] sm:$0xff]  ;;  %v1247_v41 = vld [vmem:[#allocation6 + $0x9f8] sm:$0xff] }
 0x1b5   : > { %1296 = vmatpush.msra.mxu2 %v1209_v23  ;;  %v1445_v23 = vld [vmem:[#allocation6 + $0xbd0] sm:$0xff] }
 0x1b6   : > { %1279 = vmatpush.msra.mxu1 %v1234_v43  ;;  %1098 = vmatpush.msrb.mxu0 %v996_v44  ;;  %v1417_v43 = vld [vmem:[#allocation6 + $0xaf0] sm:$0xff]  ;;  %v1245_v44 = vld [vmem:[#allocation6 + $0x9e8] sm:$0xff] }
 0x1b7   : > { %1297 = vmatpush.msra.mxu2 %v1207_v24  ;;  %v1443_v24 = vld [vmem:[#allocation6 + $0xbc0] sm:$0xff] }
 0x1b8   : > { %1280 = vmatpush.msra.mxu1 %v1232_v45  ;;  %1099 = vmatpush.msrb.mxu0 %v994_v46  ;;  %v1415_v45 = vld [vmem:[#allocation6 + $0xae0] sm:$0xff]  ;;  %v1243_v46 = vld [vmem:[#allocation6 + $0x9d8] sm:$0xff] }
 0x1b9   : > { %1298 = vmatpush.msra.mxu2 %v1205_v25  ;;  %v1441_v25 = vld [vmem:[#allocation6 + $0xbb0] sm:$0xff] }
 0x1ba   : > { %1281 = vmatpush.msra.mxu1 %v1230_v47  ;;  %1100 = vmatpush.msrb.mxu0 %v992_v48  ;;  %v1413_v47 = vld [vmem:[#allocation6 + $0xad0] sm:$0xff]  ;;  %v1241_v48 = vld [vmem:[#allocation6 + $0x9c8] sm:$0xff] }
 0x1bb   : > { %1299 = vmatpush.msra.mxu2 %v1203_v26  ;;  %v1439_v26 = vld [vmem:[#allocation6 + $0xba0] sm:$0xff] }
 0x1bc   : > { %1282 = vmatpush.msra.mxu1 %v1228_v49  ;;  %1101 = vmatpush.msrb.mxu0 %v990_v50  ;;  %v1411_v49 = vld [vmem:[#allocation6 + $0xac0] sm:$0xff]  ;;  %v1239_v50 = vld [vmem:[#allocation6 + $0x9b8] sm:$0xff] }
 0x1bd   : > { %1300 = vmatpush.msra.mxu2 %v1201_v27  ;;  %v1437_v27 = vld [vmem:[#allocation6 + $0xb90] sm:$0xff] }
 0x1be   : > { %1283 = vmatpush.msra.mxu1 %v1226_v51  ;;  %1102 = vmatpush.msrb.mxu0 %v988_v52  ;;  %v1409_v51 = vld [vmem:[#allocation6 + $0xab0] sm:$0xff]  ;;  %v1237_v52 = vld [vmem:[#allocation6 + $0x9a8] sm:$0xff] }
 0x1bf   : > { %1301 = vmatpush.msra.mxu2 %v1199_v28  ;;  %v1433_v28 = vld [vmem:[#allocation6 + $0xb70] sm:$0xff] }
 0x1c0   : > { %1284 = vmatpush.msra.mxu1 %v1224_v53  ;;  %1103 = vmatpush.msrb.mxu0 %v986_v54  ;;  %v1235_v53 = vld [vmem:[#allocation6 + $0x998] sm:$0xff]  ;;  %v1405_v54 = vld [vmem:[#allocation6 + $0xa90] sm:$0xff] }
 0x1c1   : > { %1302 = vmatpush.msra.mxu2 %v1197_v29  ;;  %v1431_v29 = vld [vmem:[#allocation6 + $0xb60] sm:$0xff] }
 0x1c2   : > { %1285 = vmatpush.msra.mxu1 %v1222_v55  ;;  %1104 = vmatpush.msrb.mxu0 %v984_v56  ;;  %v1233_v55 = vld [vmem:[#allocation6 + $0x988] sm:$0xff]  ;;  %v1403_v56 = vld [vmem:[#allocation6 + $0xa80] sm:$0xff] }
 0x1c3   : > { %1303 = vmatpush.msra.mxu2 %v1195_v31  ;;  %v1429_v31 = vld [vmem:[#allocation6 + $0xb50] sm:$0xff] }
 0x1c4   : > { %1286 = vmatpush.msra.mxu1 %v1220_v57  ;;  %1105 = vmatpush.msrb.mxu0 %v982_v58  ;;  %v1231_v57 = vld [vmem:[#allocation6 + $0x978] sm:$0xff]  ;;  %v1401_v58 = vld [vmem:[#allocation6 + $0xa70] sm:$0xff] }
 0x1c5   : > { %1106 = vmatmul.f32.vlgmr.msrb.gmra.mxu0 %v4897_v63  ;;  %v1198_v63 = vld [vmem:[#allocation6 + $0x870] sm:$0xff]  ;;  %1304 = vmatpush.msra.mxu2 %v1193_v33  ;;  %v1427_v33 = vld [vmem:[#allocation6 + $0xb40] sm:$0xff] }
 0x1c6   : > { %1287 = vmatpush.msra.mxu1 %v1218_v59  ;;  %1253 = vmatpush.msra.mxu0 %v1214_v62  ;;  %v1229_v59 = vld [vmem:[#allocation6 + $0x968] sm:$0xff]  ;;  %v1399_v62 = vld [vmem:[#allocation6 + $0xa60] sm:$0xff] }
 0x1c7   : > { %1305 = vmatpush.msra.mxu2 %v1191_v35  ;;  %v1425_v35 = vld [vmem:[#allocation6 + $0xb30] sm:$0xff] }
 0x1c8   : > { %1288 = vmatpush.msra.mxu1 %v1216_v1  ;;  %1254 = vmatpush.msra.mxu0 %v1212_v4  ;;  %v1227_v1 = vld [vmem:[#allocation6 + $0x958] sm:$0xff]  ;;  %v1225_v4 = vld [vmem:[#allocation6 + $0x948] sm:$0xff] }
 0x1c9   : > { %1289 = vmatmul.f32.vlgmr.msra.gmra.mxu1 %v4937_v3  ;;  %1306 = vmatpush.msra.mxu2 %v1189_v36  ;;  %v1423_v36 = vld [vmem:[#allocation6 + $0xb20] sm:$0xff] }
 0x1ca   : > { %1255 = vmatpush.msra.mxu0 %v1210_v19  ;;  %v1395_v19 = vld [vmem:[#allocation6 + $0xa40] sm:$0xff] }
 0x1cb   : > { %1307 = vmatpush.msra.mxu2 %v1187_v38  ;;  %v1418_v38 = vld [vmem:[#allocation6 + $0xaf8] sm:$0xff] }
 0x1cc   : > { %1256 = vmatpush.msra.mxu0 %v1208_v20  ;;  %v1223_v20 = vld [vmem:[#allocation6 + $0x938] sm:$0xff] }
 0x1cd   : > { %1308 = vmatpush.msra.mxu2 %v1185_v40  ;;  %v1414_v40 = vld [vmem:[#allocation6 + $0xad8] sm:$0xff] }
 0x1ce   : > { %1257 = vmatpush.msra.mxu0 %v1206_v5  ;;  %1309 = vmatmul.f32.vlgmr.msra.gmra.mxu2 %v4935_v2  ;;  %v1393_v5 = vld [vmem:[#allocation6 + $0xa30] sm:$0xff] }
 0x1cf   : > { %1456 = vmatpush.msrb.mxu2 %v1417_v43  ;;  %v1410_v43 = vld [vmem:[#allocation6 + $0xab8] sm:$0xff] }
 0x1d0   : > { %1258 = vmatpush.msra.mxu0 %v1204_v6  ;;  %v1221_v6 = vld [vmem:[#allocation6 + $0x928] sm:$0xff] }
 0x1d1   : > { %1457 = vmatpush.msrb.mxu2 %v1415_v45  ;;  %v1406_v45 = vld [vmem:[#allocation6 + $0xa98] sm:$0xff] }
 0x1d2   : > { %1259 = vmatpush.msra.mxu0 %v1202_v7  ;;  %v1391_v7 = vld [vmem:[#allocation6 + $0xa20] sm:$0xff] }
 0x1d3   : > { %1458 = vmatpush.msrb.mxu2 %v1413_v47  ;;  %v1402_v47 = vld [vmem:[#allocation6 + $0xa78] sm:$0xff] }
 0x1d4   : > { %1260 = vmatpush.msra.mxu0 %v1200_v8 }
 0x1d5   : > { %1459 = vmatpush.msrb.mxu2 %v1411_v49 }
 0x1d6   : > { %1261 = vmatpush.msra.mxu0 %v1198_v63  ;;  %v1219_v63 = vld [vmem:[#allocation6 + $0x918] sm:$0xff] }
 0x1d7   : > { %1460 = vmatpush.msrb.mxu2 %v1409_v51 }
 0x1d8   : > { %1262 = vmatpush.msra.mxu0 %v1196_v9  ;;  %v1389_v9 = vld [vmem:[#allocation6 + $0xa10] sm:$0xff] }
 0x1da   : > { %1263 = vmatpush.msra.mxu0 %v1194_v10 }
 0x1dc   : > { %1264 = vmatpush.msra.mxu0 %v1192_v13  ;;  %v1217_v13 = vld [vmem:[#allocation6 + $0x908] sm:$0xff] }
 0x1de   : > { %1265 = vmatpush.msra.mxu0 %v1190_v14 }
 0x1e0   : > { %1266 = vmatpush.msra.mxu0 %v1188_v15  ;;  %v4954_v15 = vld [vmem:[%s5323_s2 + $0x10] sm:$0xf] }
 0x1e2   : > { %1267 = vmatpush.msra.mxu0 %v1186_v16  ;;  %v1449_v16 = vld [vmem:[#allocation6 + $0xbf0] sm:$0xff] }
 0x1e4   : > { %1268 = vmatpush.msra.mxu0 %v1184_v17  ;;  %v1387_v17 = vld [vmem:[#allocation6 + $0xa00] sm:$0xff] }
 0x1e5   : > { %1269 = vmatmul.f32.vlgmr.msra.gmra.mxu0 %v4935_v2  ;;  %v1397_v2 = vld [vmem:[#allocation6 + $0xa50] sm:$0xff] }
 0x206   : > { %v4943_v30 = vpop.f32.mrf.mxu1 }
 0x222   : > { %v4945_v32 = vpop.f32.mrf.mxu0 }
 0x226   : > { %v1127_v0 = vpop.f32.mrf.mxu1 }
 0x230   : > { %v4967_v49 = vpop.f32.mrf.mxu2 }
 0x242   : > { %v1107_v37 = vpop.f32.mrf.mxu0 }
 0x243   : > { %v1128_v39 = vadd.f32 %v1127_v0, %v1107_v37  ;;  %v1421_v0 = vld [vmem:[#allocation6 + $0xb10] sm:$0xff]  ;;  %v1419_v37 = vld [vmem:[#allocation6 + $0xb00] sm:$0xff] }
 0x245   : > { %3754 = vmatpush.msk.msrb.mxu3 %vm681_vm0, %v1128_v39  ;;  %v1416_v39 = vld [vmem:[#allocation6 + $0xae8] sm:$0xff] }
 0x246   : > { %3755 = vmatmul.msk.f32.vlgmr.msrb.gmra.mxu3 %vm677_vm1, %v4930_v34  ;;  %v1407_v34 = vld [vmem:[#allocation6 + $0xaa0] sm:$0xff]  ;;  %v1290_v8 = vpop.f32.mrf.mxu1 }
 0x247   : > { %1313 = vmatpush.msra.mxu3 %v1247_v41  ;;  %1461 = vmatpush.msrb.mxu2 %v1407_v34  ;;  %v1412_v41 = vld [vmem:[#allocation6 + $0xac8] sm:$0xff]  ;;  %v1394_v34 = vld [vmem:[#allocation6 + $0xa38] sm:$0xff] }
 0x249   : > { %1314 = vmatpush.msra.mxu3 %v1245_v44  ;;  %1462 = vmatpush.msrb.mxu2 %v1405_v54  ;;  %v1408_v44 = vld [vmem:[#allocation6 + $0xaa8] sm:$0xff] }
 0x24b   : > { %1315 = vmatpush.msra.mxu3 %v1243_v46  ;;  %1463 = vmatpush.msrb.mxu2 %v1403_v56  ;;  %v1404_v46 = vld [vmem:[#allocation6 + $0xa88] sm:$0xff]  ;;  %v1390_v56 = vld [vmem:[#allocation6 + $0xa18] sm:$0xff] }
 0x24d   : > { %1316 = vmatpush.msra.mxu3 %v1241_v48  ;;  %1464 = vmatpush.msrb.mxu2 %v1401_v58  ;;  %v1400_v48 = vld [vmem:[#allocation6 + $0xa68] sm:$0xff] }
 0x24e   : > { %v1388_v58 = vld [vmem:[#allocation6 + $0xa08] sm:$0xff] }
 0x24f   : > { %1317 = vmatpush.msra.mxu3 %v1239_v50  ;;  %1465 = vmatpush.msrb.mxu2 %v1399_v62  ;;  %v1398_v50 = vld [vmem:[#allocation6 + $0xa58] sm:$0xff]  ;;  %v1620_v62 = vld [vmem:[#allocation6 + $0xcf0] sm:$0xff] }
 0x251   : > { %1318 = vmatpush.msra.mxu3 %v1237_v52  ;;  %1466 = vmatpush.msrb.mxu2 %v1397_v2  ;;  %v1396_v52 = vld [vmem:[#allocation6 + $0xa48] sm:$0xff]  ;;  %v1310_v54 = vpop.f32.mrf.mxu2  ;;  %v1618_v2 = vld [vmem:[#allocation6 + $0xce0] sm:$0xff] }
 0x253   : > { %1319 = vmatpush.msra.mxu3 %v1235_v53  ;;  %1467 = vmatpush.msrb.mxu2 %v1395_v19  ;;  %v1392_v53 = vld [vmem:[#allocation6 + $0xa28] sm:$0xff]  ;;  %v1616_v19 = vld [vmem:[#allocation6 + $0xcd0] sm:$0xff] }
 0x255   : > { %1320 = vmatpush.msra.mxu3 %v1233_v55  ;;  %1468 = vmatpush.msrb.mxu2 %v1393_v5  ;;  %v1614_v5 = vld [vmem:[#allocation6 + $0xcc0] sm:$0xff] }
 0x257   : > { %1321 = vmatpush.msra.mxu3 %v1231_v57  ;;  %1469 = vmatpush.msrb.mxu2 %v1391_v7  ;;  %v1612_v7 = vld [vmem:[#allocation6 + $0xcb0] sm:$0xff] }
 0x259   : > { %1322 = vmatpush.msra.mxu3 %v1229_v59  ;;  %1470 = vmatpush.msrb.mxu2 %v1389_v9  ;;  %v1450_v59 = vld [vmem:[#allocation6 + $0xbf8] sm:$0xff] }
 0x25a   : > { %v1438_v9 = vld [vmem:[#allocation6 + $0xb98] sm:$0xff] }
 0x25b   : > { %1323 = vmatpush.msra.mxu3 %v1227_v1  ;;  %1471 = vmatpush.msrb.mxu2 %v1387_v17  ;;  %v1448_v1 = vld [vmem:[#allocation6 + $0xbe8] sm:$0xff] }
 0x25c   : > { %1472 = vmatmul.f32.vlgmr.msrb.gmra.mxu2 %v4957_v18  ;;  %v1432_v17 = vld [vmem:[#allocation6 + $0xb68] sm:$0xff] }
 0x25d   : > { %1324 = vmatpush.msra.mxu3 %v1225_v4  ;;  %v1446_v4 = vld [vmem:[#allocation6 + $0xbd8] sm:$0xff] }
 0x25f   : > { %1325 = vmatpush.msra.mxu3 %v1223_v20  ;;  %v1444_v20 = vld [vmem:[#allocation6 + $0xbc8] sm:$0xff] }
 0x261   : > { %1326 = vmatpush.msra.mxu3 %v1221_v6  ;;  %v1442_v6 = vld [vmem:[#allocation6 + $0xbb8] sm:$0xff] }
 0x262   : > { %v1270_v10 = vpop.f32.mrf.mxu0 }
 0x263   : > { %v1291_v14 = vadd.f32 %v1290_v8, %v1270_v10  ;;  %1327 = vmatpush.msra.mxu3 %v1219_v63  ;;  %v1440_v8 = vld [vmem:[#allocation6 + $0xba8] sm:$0xff]  ;;  %v1610_v63 = vld [vmem:[#allocation6 + $0xca0] sm:$0xff]  ;;  %v1608_v10 = vld [vmem:[#allocation6 + $0xc90] sm:$0xff] }
 0x265   : > { %1328 = vmatpush.msra.mxu3 %v1217_v13  ;;  %3757 = vmatpush.msk.msrb.mxu0 %vm681_vm0, %v1291_v14  ;;  %v1436_v13 = vld [vmem:[#allocation6 + $0xb88] sm:$0xff]  ;;  %v1606_v14 = vld [vmem:[#allocation6 + $0xc80] sm:$0xff] }
 0x266   : > { %1329 = vmatmul.f32.vlgmr.msra.gmra.mxu3 %v4937_v3  ;;  %3758 = vmatmul.msk.f32.vlgmr.msrb.gmra.mxu0 %vm677_vm1, %v4954_v15  ;;  %v1435_v3 = vld [vmem:[#allocation6 + $0xb80] sm:$0xff] }
 0x267   : > { %1476 = vmatpush.msrb.mxu3 %v1449_v16  ;;  %1496 = vmatpush.msra.mxu0 %v1418_v38  ;;  %v1604_v16 = vld [vmem:[#allocation6 + $0xc70] sm:$0xff] }
 0x268   : > { %v1652_v38 = vld [vmem:[#allocation6 + $0xdf0] sm:$0xff] }
 0x269   : > { %1477 = vmatpush.msrb.mxu3 %v1447_v22  ;;  %1497 = vmatpush.msra.mxu0 %v1416_v39  ;;  %v1430_v22 = vld [vmem:[#allocation6 + $0xb58] sm:$0xff]  ;;  %v1590_v39 = vld [vmem:[#allocation6 + $0xc00] sm:$0xff] }
 0x26b   : > { %1478 = vmatpush.msrb.mxu3 %v1445_v23  ;;  %1498 = vmatpush.msra.mxu0 %v1414_v40  ;;  %v1600_v23 = vld [vmem:[#allocation6 + $0xc50] sm:$0xff]  ;;  %v4981_v40 = vld.sshfl [vmem:[#allocation1] sm:$0xff pattern:$0x75316420] }
 0x26d   : > { %1479 = vmatpush.msrb.mxu3 %v1443_v24  ;;  %1499 = vmatpush.msra.mxu0 %v1412_v41  ;;  %v1428_v24 = vld [vmem:[#allocation6 + $0xb48] sm:$0xff]  ;;  %v4983_v41 = vld.sshfl [vmem:[#allocation1 + $0x8] sm:$0xff pattern:$0x75316420] }
 0x26e   : > { %1857 = vst [vmem:[#allocation1] ss:$2 sm:$0xff] %v4868_v42 }
 0x26f   : > { %1480 = vmatpush.msrb.mxu3 %v1441_v25  ;;  %1500 = vmatpush.msra.mxu0 %v1410_v43  ;;  %v1598_v25 = vld [vmem:[#allocation6 + $0xc40] sm:$0xff] }
 0x270   : > { %v1650_v43 = vld [vmem:[#allocation6 + $0xde0] sm:$0xff] }
 0x271   : > { %1481 = vmatpush.msrb.mxu3 %v1439_v26  ;;  %1501 = vmatpush.msra.mxu0 %v1408_v44  ;;  %v1426_v26 = vld [vmem:[#allocation6 + $0xb38] sm:$0xff]  ;;  %v1648_v44 = vld [vmem:[#allocation6 + $0xdd0] sm:$0xff] }
 0x273   : > { %1482 = vmatpush.msrb.mxu3 %v1437_v27  ;;  %1502 = vmatpush.msra.mxu0 %v1406_v45  ;;  %v1596_v27 = vld [vmem:[#allocation6 + $0xc30] sm:$0xff]  ;;  %v1646_v45 = vld [vmem:[#allocation6 + $0xdc0] sm:$0xff] }
 0x275   : > { %1483 = vmatpush.msrb.mxu3 %v1435_v3  ;;  %1503 = vmatpush.msra.mxu0 %v1404_v46  ;;  %v1424_v3 = vld [vmem:[#allocation6 + $0xb28] sm:$0xff]  ;;  %v1644_v46 = vld [vmem:[#allocation6 + $0xdb0] sm:$0xff] }
 0x277   : > { %1484 = vmatpush.msrb.mxu3 %v1433_v28  ;;  %1504 = vmatpush.msra.mxu0 %v1402_v47  ;;  %v1594_v28 = vld [vmem:[#allocation6 + $0xc20] sm:$0xff] }
 0x278   : > { %v1642_v47 = vld [vmem:[#allocation6 + $0xda0] sm:$0xff] }
 0x279   : > { %1485 = vmatpush.msrb.mxu3 %v1431_v29  ;;  %1505 = vmatpush.msra.mxu0 %v1400_v48  ;;  %v1640_v48 = vld [vmem:[#allocation6 + $0xd90] sm:$0xff] }
 0x27b   : > { %1486 = vmatpush.msrb.mxu3 %v1429_v31  ;;  %1506 = vmatpush.msra.mxu0 %v1398_v50  ;;  %v1422_v31 = vld [vmem:[#allocation6 + $0xb18] sm:$0xff]  ;;  %v1636_v50 = vld [vmem:[#allocation6 + $0xd70] sm:$0xff] }
 0x27d   : > { %1487 = vmatpush.msrb.mxu3 %v1427_v33  ;;  %1507 = vmatpush.msra.mxu0 %v1396_v52  ;;  %v1592_v33 = vld [vmem:[#allocation6 + $0xc10] sm:$0xff]  ;;  %v1634_v52 = vld [vmem:[#allocation6 + $0xd60] sm:$0xff] }
 0x27f   : > { %1488 = vmatpush.msrb.mxu3 %v1425_v35  ;;  %1508 = vmatpush.msra.mxu0 %v1394_v34  ;;  %v1632_v34 = vld [vmem:[#allocation6 + $0xd50] sm:$0xff] }
 0x281   : > { %1489 = vmatpush.msrb.mxu3 %v1423_v36  ;;  %1509 = vmatpush.msra.mxu0 %v1392_v53  ;;  %v1420_v36 = vld [vmem:[#allocation6 + $0xb08] sm:$0xff]  ;;  %v1630_v53 = vld [vmem:[#allocation6 + $0xd40] sm:$0xff] }
 0x283   : > { %1490 = vmatpush.msrb.mxu3 %v1421_v0  ;;  %1510 = vmatpush.msra.mxu0 %v1390_v56  ;;  %v1624_v56 = vld [vmem:[#allocation6 + $0xd10] sm:$0xff] }
 0x285   : > { %1491 = vmatpush.msrb.mxu3 %v1419_v37  ;;  %1511 = vmatpush.msra.mxu0 %v1388_v58  ;;  %v4978_v37 = vld [vmem:[%s5323_s2 + $0x14] sm:$0xf] }
 0x286   : > { %1492 = vmatmul.f32.vlgmr.msrb.gmra.mxu3 %v4959_v21  ;;  %1512 = vmatmul.f32.vlgmr.msra.gmra.mxu0 %v4957_v18  ;;  %v1602_v18 = vld [vmem:[#allocation6 + $0xc60] sm:$0xff]  ;;  %v1621_v58 = vld [vmem:[#allocation6 + $0xcf8] sm:$0xff] }
 0x287   : > { %1659 = vmatpush.msrb.mxu0 %v1620_v62  ;;  %v1617_v62 = vld [vmem:[#allocation6 + $0xcd8] sm:$0xff] }
 0x289   : > { %1660 = vmatpush.msrb.mxu0 %v1618_v2  ;;  %v1613_v2 = vld [vmem:[#allocation6 + $0xcb8] sm:$0xff] }
 0x28b   : > { %1661 = vmatpush.msrb.mxu0 %v1616_v19  ;;  %v1609_v19 = vld [vmem:[#allocation6 + $0xc98] sm:$0xff] }
 0x28d   : > { %1662 = vmatpush.msrb.mxu0 %v1614_v5  ;;  %v1605_v5 = vld [vmem:[#allocation6 + $0xc78] sm:$0xff] }
 0x28f   : > { %1663 = vmatpush.msrb.mxu0 %v1612_v7 }
 0x291   : > { %1664 = vmatpush.msrb.mxu0 %v1610_v63 }
 0x293   : > { %1665 = vmatpush.msrb.mxu0 %v1608_v10  ;;  %v1597_v10 = vld [vmem:[#allocation6 + $0xc38] sm:$0xff] }
 0x295   : > { %1666 = vmatpush.msrb.mxu0 %v1606_v14 }
 0x297   : > { %1667 = vmatpush.msrb.mxu0 %v1604_v16  ;;  %v1593_v16 = vld [vmem:[#allocation6 + $0xc18] sm:$0xff] }
 0x299   : > { %1668 = vmatpush.msrb.mxu0 %v1602_v18  ;;  %v1591_v18 = vld [vmem:[#allocation6 + $0xc08] sm:$0xff] }
 0x29b   : > { %1669 = vmatpush.msrb.mxu0 %v1600_v23  ;;  %v1823_v23 = vld [vmem:[#allocation6 + $0xef0] sm:$0xff] }
 0x29d   : > { %1670 = vmatpush.msrb.mxu0 %v1598_v25  ;;  %v1821_v25 = vld [vmem:[#allocation6 + $0xee0] sm:$0xff] }
 0x29f   : > { %1671 = vmatpush.msrb.mxu0 %v1596_v27  ;;  %v1819_v27 = vld [vmem:[#allocation6 + $0xed0] sm:$0xff] }
 0x2a1   : > { %1672 = vmatpush.msrb.mxu0 %v1594_v28  ;;  %v1817_v28 = vld [vmem:[#allocation6 + $0xec0] sm:$0xff] }
 0x2a3   : > { %1673 = vmatpush.msrb.mxu0 %v1592_v33  ;;  %v1643_v33 = vld [vmem:[#allocation6 + $0xda8] sm:$0xff] }
 0x2a5   : > { %1674 = vmatpush.msrb.mxu0 %v1590_v39  ;;  %v1637_v39 = vld [vmem:[#allocation6 + $0xd78] sm:$0xff] }
 0x2a6   : > { %1675 = vmatmul.f32.vlgmr.msrb.gmra.mxu0 %v4981_v40 }
 0x2c9   : > { %v4969_v51 = vpop.f32.mrf.mxu3 }
 0x2df   : > { %v1473_v29 = vpop.f32.mrf.mxu2 }
 0x2e3   : > { %v4991_v7 = vpop.f32.mrf.mxu0 }
 0x2e9   : > { %v1330_v55 = vpop.f32.mrf.mxu3 }
 0x2ea   : > { %v1331_v57 = vadd.f32 %v1330_v55, %v1310_v54  ;;  %v1628_v54 = vld [vmem:[#allocation6 + $0xd30] sm:$0xff]  ;;  %v1626_v55 = vld [vmem:[#allocation6 + $0xd20] sm:$0xff] }
 0x2ec   : > { %3759 = vmatpush.msk.msrb.mxu1 %vm681_vm0, %v1331_v57  ;;  %v1622_v57 = vld [vmem:[#allocation6 + $0xd00] sm:$0xff] }
 0x2ed   : > { %3760 = vmatmul.msk.f32.vlgmr.msrb.gmra.mxu1 %vm677_vm1, %v4954_v15  ;;  %v1434_v15 = vld [vmem:[#allocation6 + $0xb78] sm:$0xff] }
 0x2ee   : > { %1516 = vmatpush.msra.mxu1 %v1450_v59  ;;  %v1619_v59 = vld [vmem:[#allocation6 + $0xce8] sm:$0xff] }
 0x2f0   : > { %1517 = vmatpush.msra.mxu1 %v1448_v1  ;;  %v1615_v1 = vld [vmem:[#allocation6 + $0xcc8] sm:$0xff] }
 0x2f2   : > { %1518 = vmatpush.msra.mxu1 %v1446_v4  ;;  %v1611_v4 = vld [vmem:[#allocation6 + $0xca8] sm:$0xff] }
 0x2f4   : > { %1519 = vmatpush.msra.mxu1 %v1444_v20  ;;  %v1607_v20 = vld [vmem:[#allocation6 + $0xc88] sm:$0xff] }
 0x2f6   : > { %1520 = vmatpush.msra.mxu1 %v1442_v6  ;;  %v1603_v6 = vld [vmem:[#allocation6 + $0xc68] sm:$0xff] }
 0x2f8   : > { %1521 = vmatpush.msra.mxu1 %v1440_v8  ;;  %v1601_v8 = vld [vmem:[#allocation6 + $0xc58] sm:$0xff] }
 0x2fa   : > { %1522 = vmatpush.msra.mxu1 %v1438_v9  ;;  %v1599_v9 = vld [vmem:[#allocation6 + $0xc48] sm:$0xff] }
 0x2fc   : > { %1523 = vmatpush.msra.mxu1 %v1436_v13  ;;  %v1595_v13 = vld [vmem:[#allocation6 + $0xc28] sm:$0xff] }
 0x2fe   : > { %1524 = vmatpush.msra.mxu1 %v1434_v15 }
 0x300   : > { %1525 = vmatpush.msra.mxu1 %v1432_v17 }
 0x302   : > { %1526 = vmatpush.msra.mxu1 %v1430_v22  ;;  %v1653_v22 = vld [vmem:[#allocation6 + $0xdf8] sm:$0xff] }
 0x303   : > { %v1513_v14 = vpop.f32.mrf.mxu0 }
 0x304   : > { %1527 = vmatpush.msra.mxu1 %v1428_v24  ;;  %v1651_v24 = vld [vmem:[#allocation6 + $0xde8] sm:$0xff] }
 0x306   : > { %1528 = vmatpush.msra.mxu1 %v1426_v26  ;;  %v1649_v26 = vld [vmem:[#allocation6 + $0xdd8] sm:$0xff] }
 0x308   : > { %1529 = vmatpush.msra.mxu1 %v1424_v3  ;;  %v1647_v3 = vld [vmem:[#allocation6 + $0xdc8] sm:$0xff] }
 0x309   : > { %v1493_v35 = vpop.f32.mrf.mxu3 }
 0x30a   : > { %v1494_v0 = vadd.f32 %v1493_v35, %v1473_v29  ;;  %1530 = vmatpush.msra.mxu1 %v1422_v31  ;;  %v1645_v29 = vld [vmem:[#allocation6 + $0xdb8] sm:$0xff]  ;;  %v1815_v31 = vld [vmem:[#allocation6 + $0xeb0] sm:$0xff]  ;;  %v1813_v35 = vld [vmem:[#allocation6 + $0xea0] sm:$0xff] }
 0x30c   : > { %1531 = vmatpush.msra.mxu1 %v1420_v36  ;;  %3762 = vmatpush.msk.msra.mxu2 %vm681_vm0, %v1494_v0  ;;  %v1641_v36 = vld [vmem:[#allocation6 + $0xd98] sm:$0xff]  ;;  %v1811_v0 = vld [vmem:[#allocation6 + $0xe90] sm:$0xff] }
 0x30d   : > { %1532 = vmatmul.f32.vlgmr.msra.gmra.mxu1 %v4959_v21  ;;  %3763 = vmatmul.msk.f32.vlgmr.msra.gmra.mxu2 %vm677_vm1, %v4978_v37  ;;  %v1638_v21 = vld [vmem:[#allocation6 + $0xd80] sm:$0xff] }
 0x30e   : > { %1679 = vmatpush.msrb.mxu1 %v1652_v38  ;;  %1699 = vmatpush.msrb.mxu2 %v1621_v58  ;;  %v1809_v38 = vld [vmem:[#allocation6 + $0xe80] sm:$0xff] }
 0x310   : > { %1680 = vmatpush.msrb.mxu1 %v1650_v43  ;;  %1700 = vmatpush.msrb.mxu2 %v1619_v59  ;;  %v1635_v43 = vld [vmem:[#allocation6 + $0xd68] sm:$0xff]  ;;  %v5002_v59 = vld [vmem:[%s5323_s2 + $0x18] sm:$0xf] }
 0x312   : > { %1681 = vmatpush.msrb.mxu1 %v1648_v44  ;;  %1701 = vmatpush.msrb.mxu2 %v1617_v62  ;;  %v1805_v44 = vld [vmem:[#allocation6 + $0xe60] sm:$0xff]  ;;  %v1855_v62 = vld [vmem:[#allocation6 + $0xff0] sm:$0xff] }
 0x314   : > { %1682 = vmatpush.msrb.mxu1 %v1646_v45  ;;  %1702 = vmatpush.msrb.mxu2 %v1615_v1  ;;  %v1633_v45 = vld [vmem:[#allocation6 + $0xd58] sm:$0xff]  ;;  %v1793_v1 = vld [vmem:[#allocation6 + $0xe00] sm:$0xff] }
 0x316   : > { %1683 = vmatpush.msrb.mxu1 %v1644_v46  ;;  %1703 = vmatpush.msrb.mxu2 %v1613_v2  ;;  %v1803_v46 = vld [vmem:[#allocation6 + $0xe50] sm:$0xff]  ;;  %v5005_v2 = vld.sshfl [vmem:[#allocation1] sm:$0xff pattern:$0x75316420] }
 0x318   : > { %1684 = vmatpush.msrb.mxu1 %v1642_v47  ;;  %1704 = vmatpush.msrb.mxu2 %v1611_v4  ;;  %v1631_v47 = vld [vmem:[#allocation6 + $0xd48] sm:$0xff]  ;;  %v5007_v4 = vld.sshfl [vmem:[#allocation1 + $0x8] sm:$0xff pattern:$0x75316420] }
 0x319   : > { %2060 = vst [vmem:[#allocation1] ss:$2 sm:$0xff] %v4868_v42 }
 0x31a   : > { %1685 = vmatpush.msrb.mxu1 %v1640_v48  ;;  %1705 = vmatpush.msrb.mxu2 %v1609_v19  ;;  %v1801_v48 = vld [vmem:[#allocation6 + $0xe40] sm:$0xff] }
 0x31b   : > { %v1853_v19 = vld [vmem:[#allocation6 + $0xfe0] sm:$0xff] }
 0x31c   : > { %1686 = vmatpush.msrb.mxu1 %v1638_v21  ;;  %1706 = vmatpush.msrb.mxu2 %v1607_v20  ;;  %v1629_v21 = vld [vmem:[#allocation6 + $0xd38] sm:$0xff]  ;;  %v1851_v20 = vld [vmem:[#allocation6 + $0xfd0] sm:$0xff] }
 0x31e   : > { %1687 = vmatpush.msrb.mxu1 %v1636_v50  ;;  %1707 = vmatpush.msrb.mxu2 %v1605_v5  ;;  %v1799_v50 = vld [vmem:[#allocation6 + $0xe30] sm:$0xff]  ;;  %v1849_v5 = vld [vmem:[#allocation6 + $0xfc0] sm:$0xff] }
 0x320   : > { %1688 = vmatpush.msrb.mxu1 %v1634_v52  ;;  %1708 = vmatpush.msrb.mxu2 %v1603_v6  ;;  %v1627_v52 = vld [vmem:[#allocation6 + $0xd28] sm:$0xff]  ;;  %v1847_v6 = vld [vmem:[#allocation6 + $0xfb0] sm:$0xff] }
 0x322   : > { %1689 = vmatpush.msrb.mxu1 %v1632_v34  ;;  %1709 = vmatpush.msrb.mxu2 %v1601_v8  ;;  %v1797_v34 = vld [vmem:[#allocation6 + $0xe20] sm:$0xff] }
 0x323   : > { %v1845_v8 = vld [vmem:[#allocation6 + $0xfa0] sm:$0xff] }
 0x324   : > { %1690 = vmatpush.msrb.mxu1 %v1630_v53  ;;  %1710 = vmatpush.msrb.mxu2 %v1599_v9  ;;  %v1676_v53 = vpop.f32.mrf.mxu0  ;;  %v1843_v9 = vld [vmem:[#allocation6 + $0xf90] sm:$0xff] }
 0x326   : > { %1691 = vmatpush.msrb.mxu1 %v1628_v54  ;;  %1711 = vmatpush.msrb.mxu2 %v1597_v10  ;;  %v1625_v54 = vld [vmem:[#allocation6 + $0xd18] sm:$0xff]  ;;  %v1839_v10 = vld [vmem:[#allocation6 + $0xf70] sm:$0xff] }
 0x328   : > { %1692 = vmatpush.msrb.mxu1 %v1626_v55  ;;  %1712 = vmatpush.msrb.mxu2 %v1595_v13  ;;  %v1795_v55 = vld [vmem:[#allocation6 + $0xe10] sm:$0xff]  ;;  %v1837_v13 = vld [vmem:[#allocation6 + $0xf60] sm:$0xff] }
 0x32a   : > { %1693 = vmatpush.msrb.mxu1 %v1624_v56  ;;  %1713 = vmatpush.msrb.mxu2 %v1593_v16  ;;  %v1831_v16 = vld [vmem:[#allocation6 + $0xf30] sm:$0xff] }
 0x32c   : > { %1694 = vmatpush.msrb.mxu1 %v1622_v57  ;;  %1714 = vmatpush.msrb.mxu2 %v1591_v18  ;;  %v1623_v57 = vld [vmem:[#allocation6 + $0xd08] sm:$0xff]  ;;  %v1827_v18 = vld [vmem:[#allocation6 + $0xf10] sm:$0xff] }
 0x32d   : > { %1695 = vmatmul.f32.vlgmr.msrb.gmra.mxu1 %v4983_v41  ;;  %1715 = vmatmul.f32.vlgmr.msrb.gmra.mxu2 %v4981_v40  ;;  %v1807_v40 = vld [vmem:[#allocation6 + $0xe70] sm:$0xff] }
 0x32e   : > { %1862 = vmatpush.msra.mxu2 %v1823_v23  ;;  %v1824_v23 = vld [vmem:[#allocation6 + $0xef8] sm:$0xff] }
 0x330   : > { %1863 = vmatpush.msra.mxu2 %v1821_v25  ;;  %v1820_v25 = vld [vmem:[#allocation6 + $0xed8] sm:$0xff] }
 0x332   : > { %1864 = vmatpush.msra.mxu2 %v1819_v27  ;;  %v1816_v27 = vld [vmem:[#allocation6 + $0xeb8] sm:$0xff] }
 0x334   : > { %1865 = vmatpush.msra.mxu2 %v1817_v28  ;;  %v1812_v28 = vld [vmem:[#allocation6 + $0xe98] sm:$0xff] }
 0x336   : > { %1866 = vmatpush.msra.mxu2 %v1815_v31  ;;  %v1808_v31 = vld [vmem:[#allocation6 + $0xe78] sm:$0xff] }
 0x338   : > { %1867 = vmatpush.msra.mxu2 %v1813_v35 }
 0x33a   : > { %1868 = vmatpush.msra.mxu2 %v1811_v0 }
 0x33c   : > { %1869 = vmatpush.msra.mxu2 %v1809_v38  ;;  %v1800_v38 = vld [vmem:[#allocation6 + $0xe38] sm:$0xff] }
 0x33e   : > { %1870 = vmatpush.msra.mxu2 %v1807_v40 }
 0x340   : > { %1871 = vmatpush.msra.mxu2 %v1805_v44  ;;  %v1796_v44 = vld [vmem:[#allocation6 + $0xe18] sm:$0xff] }
 0x342   : > { %1872 = vmatpush.msra.mxu2 %v1803_v46  ;;  %v1794_v46 = vld [vmem:[#allocation6 + $0xe08] sm:$0xff] }
 0x344   : > { %1873 = vmatpush.msra.mxu2 %v1801_v48  ;;  %v2026_v48 = vld [vmem:[#allocation6 + $0x10f0] sm:$0xff] }
 0x346   : > { %1874 = vmatpush.msra.mxu2 %v1799_v50  ;;  %v2024_v50 = vld [vmem:[#allocation6 + $0x10e0] sm:$0xff] }
 0x348   : > { %1875 = vmatpush.msra.mxu2 %v1797_v34  ;;  %v2022_v34 = vld [vmem:[#allocation6 + $0x10d0] sm:$0xff] }
 0x34a   : > { %1876 = vmatpush.msra.mxu2 %v1795_v55  ;;  %v1848_v55 = vld [vmem:[#allocation6 + $0xfb8] sm:$0xff] }
 0x34c   : > { %1877 = vmatpush.msra.mxu2 %v1793_v1  ;;  %v1842_v1 = vld [vmem:[#allocation6 + $0xf88] sm:$0xff] }
 0x34d   : > { %1878 = vmatmul.f32.vlgmr.msra.gmra.mxu2 %v5005_v2 }
 0x36a   : > { %v4993_v63 = vpop.f32.mrf.mxu1 }
 0x38a   : > { %v1533_v15 = vpop.f32.mrf.mxu1 }
 0x38b   : > { %v1534_v17 = vadd.f32 %v1533_v15, %v1513_v14  ;;  %v1835_v14 = vld [vmem:[#allocation6 + $0xf50] sm:$0xff]  ;;  %v1833_v15 = vld [vmem:[#allocation6 + $0xf40] sm:$0xff] }
 0x38d   : > { %3764 = vmatpush.msk.msra.mxu3 %vm681_vm0, %v1534_v17  ;;  %v1829_v17 = vld [vmem:[#allocation6 + $0xf20] sm:$0xff] }
 0x38e   : > { %3765 = vmatmul.msk.f32.vlgmr.msra.gmra.mxu3 %vm677_vm1, %v4978_v37  ;;  %v1639_v37 = vld [vmem:[#allocation6 + $0xd88] sm:$0xff] }
 0x38f   : > { %1719 = vmatpush.msrb.mxu3 %v1653_v22  ;;  %v1825_v22 = vld [vmem:[#allocation6 + $0xf00] sm:$0xff] }
 0x390   : > { %v5015_v35 = vpop.f32.mrf.mxu2 }
 0x391   : > { %1720 = vmatpush.msrb.mxu3 %v1651_v24  ;;  %v1822_v24 = vld [vmem:[#allocation6 + $0xee8] sm:$0xff] }
 0x393   : > { %1721 = vmatpush.msrb.mxu3 %v1649_v26  ;;  %v1818_v26 = vld [vmem:[#allocation6 + $0xec8] sm:$0xff] }
 0x395   : > { %1722 = vmatpush.msrb.mxu3 %v1647_v3  ;;  %v1814_v3 = vld [vmem:[#allocation6 + $0xea8] sm:$0xff] }
 0x397   : > { %1723 = vmatpush.msrb.mxu3 %v1645_v29  ;;  %v1810_v29 = vld [vmem:[#allocation6 + $0xe88] sm:$0xff] }
 0x399   : > { %1724 = vmatpush.msrb.mxu3 %v1643_v33  ;;  %v1806_v33 = vld [vmem:[#allocation6 + $0xe68] sm:$0xff] }
 0x39b   : > { %1725 = vmatpush.msrb.mxu3 %v1641_v36  ;;  %v1804_v36 = vld [vmem:[#allocation6 + $0xe58] sm:$0xff] }
 0x39d   : > { %1726 = vmatpush.msrb.mxu3 %v1639_v37  ;;  %v1802_v37 = vld [vmem:[#allocation6 + $0xe48] sm:$0xff] }
 0x39f   : > { %1727 = vmatpush.msrb.mxu3 %v1637_v39  ;;  %v1798_v39 = vld [vmem:[#allocation6 + $0xe28] sm:$0xff] }
 0x3a1   : > { %1728 = vmatpush.msrb.mxu3 %v1635_v43 }
 0x3a3   : > { %1729 = vmatpush.msrb.mxu3 %v1633_v45 }
 0x3a5   : > { %1730 = vmatpush.msrb.mxu3 %v1631_v47  ;;  %v1856_v47 = vld [vmem:[#allocation6 + $0xff8] sm:$0xff] }
 0x3a7   : > { %1731 = vmatpush.msrb.mxu3 %v1629_v21  ;;  %v1854_v21 = vld [vmem:[#allocation6 + $0xfe8] sm:$0xff] }
 0x3a9   : > { %1732 = vmatpush.msrb.mxu3 %v1627_v52  ;;  %v1852_v52 = vld [vmem:[#allocation6 + $0xfd8] sm:$0xff] }
 0x3aa   : > { %v1696_v56 = vpop.f32.mrf.mxu1 }
 0x3ab   : > { %v1697_v58 = vadd.f32 %v1696_v56, %v1676_v53  ;;  %1733 = vmatpush.msrb.mxu3 %v1625_v54  ;;  %v1850_v53 = vld [vmem:[#allocation6 + $0xfc8] sm:$0xff]  ;;  %v2020_v54 = vld [vmem:[#allocation6 + $0x10c0] sm:$0xff]  ;;  %v2018_v56 = vld [vmem:[#allocation6 + $0x10b0] sm:$0xff] }
 0x3ad   : > { %1734 = vmatpush.msrb.mxu3 %v1623_v57  ;;  %3767 = vmatpush.msk.msra.mxu0 %vm681_vm0, %v1697_v58  ;;  %v1846_v57 = vld [vmem:[#allocation6 + $0xfa8] sm:$0xff]  ;;  %v2016_v58 = vld [vmem:[#allocation6 + $0x10a0] sm:$0xff] }
 0x3ae   : > { %1735 = vmatmul.f32.vlgmr.msrb.gmra.mxu3 %v4983_v41  ;;  %3768 = vmatmul.msk.f32.vlgmr.msra.gmra.mxu0 %vm677_vm1, %v5002_v59  ;;  %v1841_v41 = vld [vmem:[#allocation6 + $0xf80] sm:$0xff] }
 0x3af   : > { %1882 = vmatpush.msra.mxu3 %v1855_v62  ;;  %1902 = vmatpush.msrb.mxu0 %v1824_v23  ;;  %v2014_v62 = vld [vmem:[#allocation6 + $0x1090] sm:$0xff] }
 0x3b0   : > { %v1716_v40 = vpop.f32.mrf.mxu2 }
 0x3b1   : > { %1883 = vmatpush.msra.mxu3 %v1853_v19  ;;  %1903 = vmatpush.msrb.mxu0 %v1822_v24  ;;  %v1840_v19 = vld [vmem:[#allocation6 + $0xf78] sm:$0xff]  ;;  %v1826_v24 = vld [vmem:[#allocation6 + $0xf08] sm:$0xff] }
 0x3b3   : > { %1884 = vmatpush.msra.mxu3 %v1851_v20  ;;  %1904 = vmatpush.msrb.mxu0 %v1820_v25  ;;  %v2010_v20 = vld [vmem:[#allocation6 + $0x1070] sm:$0xff] }
 0x3b5   : > { %1885 = vmatpush.msra.mxu3 %v1849_v5  ;;  %1905 = vmatpush.msrb.mxu0 %v1818_v26  ;;  %v1838_v5 = vld [vmem:[#allocation6 + $0xf68] sm:$0xff]  ;;  %v5026_v26 = vld [vmem:[%s5323_s2 + $0x1c] sm:$0xf] }
 0x3b7   : > { %1886 = vmatpush.msra.mxu3 %v1847_v6  ;;  %1906 = vmatpush.msrb.mxu0 %v1816_v27  ;;  %v2008_v6 = vld [vmem:[#allocation6 + $0x1060] sm:$0xff]  ;;  %v2058_v27 = vld [vmem:[#allocation6 + $0x11f0] sm:$0xff] }
 0x3b9   : > { %1887 = vmatpush.msra.mxu3 %v1845_v8  ;;  %1907 = vmatpush.msrb.mxu0 %v1814_v3  ;;  %v1836_v8 = vld [vmem:[#allocation6 + $0xf58] sm:$0xff]  ;;  %v1996_v3 = vld [vmem:[#allocation6 + $0x1000] sm:$0xff] }
 0x3bb   : > { %1888 = vmatpush.msra.mxu3 %v1843_v9  ;;  %1908 = vmatpush.msrb.mxu0 %v1812_v28  ;;  %v2006_v9 = vld [vmem:[#allocation6 + $0x1050] sm:$0xff]  ;;  %v5029_v28 = vld.sshfl [vmem:[#allocation1] sm:$0xff pattern:$0x75316420] }
 0x3bd   : > { %1889 = vmatpush.msra.mxu3 %v1841_v41  ;;  %1909 = vmatpush.msrb.mxu0 %v1810_v29  ;;  %v1834_v41 = vld [vmem:[#allocation6 + $0xf48] sm:$0xff]  ;;  %v5031_v29 = vld.sshfl [vmem:[#allocation1 + $0x8] sm:$0xff pattern:$0x75316420] }
 0x3be   : > { %3593 = vst [vmem:[#allocation1] ss:$2 sm:$0xff] %v4868_v42  ;;  %v2038_v42 = vld [vmem:[#allocation6 + $0x1150] sm:$0xff] }
 0x3bf   : > { %1890 = vmatpush.msra.mxu3 %v1839_v10  ;;  %1910 = vmatpush.msrb.mxu0 %v1808_v31  ;;  %v2004_v10 = vld [vmem:[#allocation6 + $0x1040] sm:$0xff] }
 0x3c0   : > { %v2056_v31 = vld [vmem:[#allocation6 + $0x11e0] sm:$0xff] }
 0x3c1   : > { %1891 = vmatpush.msra.mxu3 %v1837_v13  ;;  %1911 = vmatpush.msrb.mxu0 %v1806_v33  ;;  %v1832_v13 = vld [vmem:[#allocation6 + $0xf38] sm:$0xff]  ;;  %v2054_v33 = vld [vmem:[#allocation6 + $0x11d0] sm:$0xff] }
 0x3c3   : > { %1892 = vmatpush.msra.mxu3 %v1835_v14  ;;  %1912 = vmatpush.msrb.mxu0 %v1804_v36  ;;  %v2002_v14 = vld [vmem:[#allocation6 + $0x1030] sm:$0xff]  ;;  %v2052_v36 = vld [vmem:[#allocation6 + $0x11c0] sm:$0xff] }
 0x3c5   : > { %1893 = vmatpush.msra.mxu3 %v1833_v15  ;;  %1913 = vmatpush.msrb.mxu0 %v1802_v37  ;;  %v1830_v15 = vld [vmem:[#allocation6 + $0xf28] sm:$0xff]  ;;  %v2050_v37 = vld [vmem:[#allocation6 + $0x11b0] sm:$0xff] }
 0x3c7   : > { %1894 = vmatpush.msra.mxu3 %v1831_v16  ;;  %1914 = vmatpush.msrb.mxu0 %v1800_v38  ;;  %v2000_v16 = vld [vmem:[#allocation6 + $0x1020] sm:$0xff] }
 0x3c8   : > { %v2048_v38 = vld [vmem:[#allocation6 + $0x11a0] sm:$0xff] }
 0x3c9   : > { %1895 = vmatpush.msra.mxu3 %v1829_v17  ;;  %1915 = vmatpush.msrb.mxu0 %v1798_v39  ;;  %v2046_v39 = vld [vmem:[#allocation6 + $0x1190] sm:$0xff] }
 0x3cb   : > { %1896 = vmatpush.msra.mxu3 %v1827_v18  ;;  %1916 = vmatpush.msrb.mxu0 %v1796_v44  ;;  %v1828_v18 = vld [vmem:[#allocation6 + $0xf18] sm:$0xff]  ;;  %v2036_v44 = vld [vmem:[#allocation6 + $0x1140] sm:$0xff] }
 0x3cd   : > { %1897 = vmatpush.msra.mxu3 %v1825_v22  ;;  %1917 = vmatpush.msrb.mxu0 %v1794_v46  ;;  %v1998_v22 = vld [vmem:[#allocation6 + $0x1010] sm:$0xff]  ;;  %v2032_v46 = vld [vmem:[#allocation6 + $0x1120] sm:$0xff] }
 0x3ce   : > { %1898 = vmatmul.f32.vlgmr.msra.gmra.mxu3 %v5007_v4  ;;  %1918 = vmatmul.f32.vlgmr.msrb.gmra.mxu0 %v5005_v2  ;;  %v2012_v2 = vld [vmem:[#allocation6 + $0x1080] sm:$0xff] }
 0x3cf   : > { %2065 = vmatpush.msra.mxu0 %v2026_v48  ;;  %v2028_v48 = vld [vmem:[#allocation6 + $0x1100] sm:$0xff] }
 0x3d0   : > { %v1879_v17 = vpop.f32.mrf.mxu2 }
 0x3d1   : > { %2066 = vmatpush.msra.mxu0 %v2024_v50  ;;  %v2025_v50 = vld [vmem:[#allocation6 + $0x10e8] sm:$0xff] }
 0x3d3   : > { %2067 = vmatpush.msra.mxu0 %v2022_v34  ;;  %v2021_v34 = vld [vmem:[#allocation6 + $0x10c8] sm:$0xff] }
 0x3d5   : > { %2068 = vmatpush.msra.mxu0 %v2020_v54  ;;  %v2017_v54 = vld [vmem:[#allocation6 + $0x10a8] sm:$0xff] }
 0x3d7   : > { %2069 = vmatpush.msra.mxu0 %v2018_v56  ;;  %v2013_v56 = vld [vmem:[#allocation6 + $0x1088] sm:$0xff] }
 0x3d9   : > { %2070 = vmatpush.msra.mxu0 %v2016_v58  ;;  %v2009_v58 = vld [vmem:[#allocation6 + $0x1068] sm:$0xff] }
 0x3db   : > { %2071 = vmatpush.msra.mxu0 %v2014_v62  ;;  %v2007_v62 = vld [vmem:[#allocation6 + $0x1058] sm:$0xff] }
 0x3dd   : > { %2072 = vmatpush.msra.mxu0 %v2012_v2  ;;  %v2005_v2 = vld [vmem:[#allocation6 + $0x1048] sm:$0xff] }
 0x3df   : > { %2073 = vmatpush.msra.mxu0 %v2010_v20  ;;  %v2001_v20 = vld [vmem:[#allocation6 + $0x1028] sm:$0xff] }
 0x3e1   : > { %2074 = vmatpush.msra.mxu0 %v2008_v6 }
 0x3e3   : > { %2075 = vmatpush.msra.mxu0 %v2006_v9 }
 0x3e5   : > { %2076 = vmatpush.msra.mxu0 %v2004_v10  ;;  %v2059_v10 = vld [vmem:[#allocation6 + $0x11f8] sm:$0xff] }
 0x3e7   : > { %2077 = vmatpush.msra.mxu0 %v2002_v14  ;;  %v2198_v14 = vld [vmem:[%s5324_s3] sm:$0xf] }
 0x3e9   : > { %2078 = vmatpush.msra.mxu0 %v2000_v16  ;;  %v2055_v16 = vld [vmem:[#allocation6 + $0x11d8] sm:$0xff] }
 0x3eb   : > { %2079 = vmatpush.msra.mxu0 %v1998_v22  ;;  %v2049_v22 = vld [vmem:[#allocation6 + $0x11a8] sm:$0xff] }
 0x3ed   : > { %2080 = vmatpush.msra.mxu0 %v1996_v3  ;;  %v2037_v3 = vld [vmem:[#allocation6 + $0x1148] sm:$0xff] }
 0x3ee   : > { %2081 = vmatmul.f32.vlgmr.msra.gmra.mxu0 %v5029_v28 }
 0x411   : > { %v5017_v0 = vpop.f32.mrf.mxu3 }
 0x431   : > { %v1736_v43 = vpop.f32.mrf.mxu3 }
 0x432   : > { %v1737_v45 = vadd.f32 %v1736_v43, %v1716_v40  ;;  %v2042_v40 = vld [vmem:[#allocation6 + $0x1170] sm:$0xff]  ;;  %v2040_v43 = vld [vmem:[#allocation6 + $0x1160] sm:$0xff] }
 0x434   : > { %3769 = vmatpush.msk.msra.mxu1 %vm681_vm0, %v1737_v45  ;;  %v2034_v45 = vld [vmem:[#allocation6 + $0x1130] sm:$0xff] }
 0x435   : > { %3770 = vmatmul.msk.f32.vlgmr.msra.gmra.mxu1 %vm677_vm1, %v5002_v59  ;;  %v1844_v59 = vld [vmem:[#allocation6 + $0xf98] sm:$0xff] }
 0x436   : > { %1922 = vmatpush.msrb.mxu1 %v1856_v47  ;;  %v2030_v47 = vld [vmem:[#allocation6 + $0x1110] sm:$0xff] }
 0x438   : > { %1923 = vmatpush.msrb.mxu1 %v1854_v21  ;;  %v2027_v21 = vld [vmem:[#allocation6 + $0x10f8] sm:$0xff] }
 0x43a   : > { %1924 = vmatpush.msrb.mxu1 %v1852_v52  ;;  %v2023_v52 = vld [vmem:[#allocation6 + $0x10d8] sm:$0xff] }
 0x43c   : > { %1925 = vmatpush.msrb.mxu1 %v1850_v53  ;;  %v2019_v53 = vld [vmem:[#allocation6 + $0x10b8] sm:$0xff] }
 0x43e   : > { %1926 = vmatpush.msrb.mxu1 %v1848_v55  ;;  %v2015_v55 = vld [vmem:[#allocation6 + $0x1098] sm:$0xff] }
 0x440   : > { %1927 = vmatpush.msrb.mxu1 %v1846_v57  ;;  %v2011_v57 = vld [vmem:[#allocation6 + $0x1078] sm:$0xff] }
 0x442   : > { %1928 = vmatpush.msrb.mxu1 %v1844_v59  ;;  %v5039_v59 = vpop.f32.mrf.mxu0 }
 0x444   : > { %1929 = vmatpush.msrb.mxu1 %v1842_v1 }
 0x446   : > { %1930 = vmatpush.msrb.mxu1 %v1840_v19  ;;  %v2003_v19 = vld [vmem:[#allocation6 + $0x1038] sm:$0xff] }
 0x448   : > { %1931 = vmatpush.msrb.mxu1 %v1838_v5 }
 0x44a   : > { %1932 = vmatpush.msrb.mxu1 %v1836_v8  ;;  %v1999_v8 = vld [vmem:[#allocation6 + $0x1018] sm:$0xff] }
 0x44b   : > { %v1919_v5 = vpop.f32.mrf.mxu0 }
 0x44c   : > { %1933 = vmatpush.msrb.mxu1 %v1834_v41  ;;  %v1997_v41 = vld [vmem:[#allocation6 + $0x1008] sm:$0xff] }
 0x44e   : > { %1934 = vmatpush.msrb.mxu1 %v1832_v13  ;;  %v2057_v13 = vld [vmem:[#allocation6 + $0x11e8] sm:$0xff] }
 0x450   : > { %1935 = vmatpush.msrb.mxu1 %v1830_v15  ;;  %v4691_v15 = vmov 0  }
 0x451   : > { %v1899_v23 = vpop.f32.mrf.mxu3  ;;  %3910 = vset.pattern.permute.xlu0 %v4691_v15  ;;  %3911 = vset.pattern.permute.xlu1 %v4691_v15  ;;  %v3943_v15 = vld [vmem:[#allocation6 + $0x200] sm:$0xff] }
 0x452   : > { %v1900_v25 = vadd.f32 %v1899_v23, %v1879_v17  ;;  %1936 = vmatpush.msrb.mxu1 %v1828_v18  ;;  %2201 = vperm.xlu0 %3910, %v2198_v14   ;;  %v2053_v17 = vld [vmem:[#allocation6 + $0x11c8] sm:$0xff]  ;;  %v2051_v18 = vld [vmem:[#allocation6 + $0x11b8] sm:$0xff]  ;;  %v3942_v14 = vld [vmem:[#allocation6 + $0x210] sm:$0xff] }
 0x453   : > { %v2047_v23 = vld [vmem:[#allocation6 + $0x1198] sm:$0xff] }
 0x454   : > { %1937 = vmatpush.msrb.mxu1 %v1826_v24  ;;  %3772 = vmatpush.msk.msrb.mxu2 %vm681_vm0, %v1900_v25  ;;  %v2045_v24 = vld [vmem:[#allocation6 + $0x1188] sm:$0xff]  ;;  %v2043_v25 = vld [vmem:[#allocation6 + $0x1178] sm:$0xff] }
 0x455   : > { %1938 = vmatmul.f32.vlgmr.msrb.gmra.mxu1 %v5007_v4  ;;  %3773 = vmatmul.msk.f32.vlgmr.msrb.gmra.mxu2 %vm677_vm1, %v5026_v26  ;;  %v2044_v4 = vld [vmem:[#allocation6 + $0x1180] sm:$0xff] }
 0x456   : > { %2085 = vmatpush.msra.mxu1 %v2058_v27  ;;  %2105 = vmatpush.msra.mxu2 %v2027_v21  ;;  %v2039_v27 = vld [vmem:[#allocation6 + $0x1158] sm:$0xff]  ;;  %v3921_v21 = vld [vmem:[#allocation6 + $0x60] sm:$0xff] }
 0x458   : > { %2086 = vmatpush.msra.mxu1 %v2056_v31  ;;  %2106 = vmatpush.msra.mxu2 %v2025_v50  ;;  %v2033_v31 = vld [vmem:[#allocation6 + $0x1128] sm:$0xff]  ;;  %v3922_v50 = vld [vmem:[#allocation6 + $0x50] sm:$0xff] }
 0x45a   : > { %2087 = vmatpush.msra.mxu1 %v2054_v33  ;;  %2107 = vmatpush.msra.mxu2 %v2023_v52  ;;  %v3923_v52 = vld [vmem:[#allocation6 + $0x40] sm:$0xff] }
 0x45c   : > { %2088 = vmatpush.msra.mxu1 %v2052_v36  ;;  %2108 = vmatpush.msra.mxu2 %v2021_v34  ;;  %v2031_v36 = vld [vmem:[#allocation6 + $0x1118] sm:$0xff]  ;;  %v3924_v34 = vld [vmem:[#allocation6 + $0x30] sm:$0xff] }
 0x45e   : > { %2089 = vmatpush.msra.mxu1 %v2050_v37  ;;  %2109 = vmatpush.msra.mxu2 %v2019_v53  ;;  %v3925_v53 = vld [vmem:[#allocation6 + $0x20] sm:$0xff] }
 0x460   : > { %2090 = vmatpush.msra.mxu1 %v2048_v38  ;;  %2110 = vmatpush.msra.mxu2 %v2017_v54  ;;  %v2029_v38 = vld [vmem:[#allocation6 + $0x1108] sm:$0xff]  ;;  %v3926_v54 = vld [vmem:[#allocation6 + $0x10] sm:$0xff] }
 0x462   : > { %2091 = vmatpush.msra.mxu1 %v2046_v39  ;;  %2111 = vmatpush.msra.mxu2 %v2015_v55  ;;  %v3927_v55 = vld [vmem:[#allocation6] sm:$0xff] }
 0x464   : > { %2092 = vmatpush.msra.mxu1 %v2044_v4  ;;  %2112 = vmatpush.msra.mxu2 %v2013_v56  ;;  %v5053_v4 = vld [vmem:[%s5323_s2 + $0x20] sm:$0xf]  ;;  %v3928_v56 = vld [vmem:[#allocation6 + $0x2f0] sm:$0xff] }
 0x466   : > { %2093 = vmatpush.msra.mxu1 %v2042_v40  ;;  %2113 = vmatpush.msra.mxu2 %v2011_v57  ;;  %v3912_v40 = vld [vmem:[#allocation6 + $0xf0] sm:$0xff]  ;;  %v3929_v57 = vld [vmem:[#allocation6 + $0x2e0] sm:$0xff] }
 0x468   : > { %2094 = vmatpush.msra.mxu1 %v2040_v43  ;;  %2114 = vmatpush.msra.mxu2 %v2009_v58  ;;  %v3913_v43 = vld [vmem:[#allocation6 + $0xe0] sm:$0xff]  ;;  %v3930_v58 = vld [vmem:[#allocation6 + $0x2d0] sm:$0xff] }
 0x46a   : > { %2095 = vmatpush.msra.mxu1 %v2038_v42  ;;  %2115 = vmatpush.msra.mxu2 %v2007_v62  ;;  %v3914_v42 = vld [vmem:[#allocation6 + $0xd0] sm:$0xff]  ;;  %v3931_v62 = vld [vmem:[#allocation6 + $0x2c0] sm:$0xff] }
 0x46b   : > { %v2082_v33 = vpop.f32.mrf.mxu0 }
 0x46c   : > { %2096 = vmatpush.msra.mxu1 %v2036_v44  ;;  %2116 = vmatpush.msra.mxu2 %v2005_v2  ;;  %v3915_v44 = vld [vmem:[#allocation6 + $0xc0] sm:$0xff]  ;;  %v3932_v2 = vld [vmem:[#allocation6 + $0x2b0] sm:$0xff] }
 0x46e   : > { %2097 = vmatpush.msra.mxu1 %v2034_v45  ;;  %2117 = vmatpush.msra.mxu2 %v2003_v19  ;;  %v3916_v45 = vld [vmem:[#allocation6 + $0xb0] sm:$0xff]  ;;  %v3933_v19 = vld [vmem:[#allocation6 + $0x2a0] sm:$0xff] }
 0x470   : > { %2098 = vmatpush.msra.mxu1 %v2032_v46  ;;  %2118 = vmatpush.msra.mxu2 %v2001_v20  ;;  %v3917_v46 = vld [vmem:[#allocation6 + $0xa0] sm:$0xff]  ;;  %v3934_v20 = vld [vmem:[#allocation6 + $0x290] sm:$0xff] }
 0x472   : > { %2099 = vmatpush.msra.mxu1 %v2030_v47  ;;  %2119 = vmatpush.msra.mxu2 %v1999_v8  ;;  %v3918_v47 = vld [vmem:[#allocation6 + $0x90] sm:$0xff]  ;;  %v3937_v8 = vld [vmem:[#allocation6 + $0x260] sm:$0xff] }
 0x474   : > { %2100 = vmatpush.msra.mxu1 %v2028_v48  ;;  %2120 = vmatpush.msra.mxu2 %v1997_v41  ;;  %v3919_v48 = vld [vmem:[#allocation6 + $0x80] sm:$0xff] }
 0x475   : > { %2101 = vmatmul.f32.vlgmr.msra.gmra.mxu1 %v5031_v29  ;;  %2121 = vmatmul.f32.vlgmr.msra.gmra.mxu2 %v5029_v28  ;;  %v2035_v28 = vld [vmem:[#allocation6 + $0x1138] sm:$0xff]  ;;  %v3939_v41 = vld [vmem:[#allocation6 + $0x240] sm:$0xff] }
 0x4b2   : > { %v5041_v1 = vpop.f32.mrf.mxu1 }
 0x4d2   : > { %v1939_v6 = vpop.f32.mrf.mxu1 }
 0x4d3   : > { %v1940_v9 = vadd.f32 %v1939_v6, %v1919_v5  ;;  %v3935_v5 = vld [vmem:[#allocation6 + $0x280] sm:$0xff]  ;;  %v3936_v6 = vld [vmem:[#allocation6 + $0x270] sm:$0xff] }
 0x4d5   : > { %3774 = vmatpush.msk.msrb.mxu3 %vm681_vm0, %v1940_v9  ;;  %v3938_v9 = vld [vmem:[#allocation6 + $0x250] sm:$0xff] }
 0x4d6   : > { %3775 = vmatmul.msk.f32.vlgmr.msrb.gmra.mxu3 %vm677_vm1, %v5026_v26  ;;  %v2041_v26 = vld [vmem:[#allocation6 + $0x1168] sm:$0xff] }
 0x4d7   : > { %2125 = vmatpush.msra.mxu3 %v2059_v10  ;;  %v3940_v10 = vld [vmem:[#allocation6 + $0x230] sm:$0xff] }
 0x4d9   : > { %2126 = vmatpush.msra.mxu3 %v2057_v13  ;;  %v3941_v13 = vld [vmem:[#allocation6 + $0x220] sm:$0xff] }
 0x4db   : > { %2127 = vmatpush.msra.mxu3 %v2055_v16  ;;  %v755_v16 = vadd.f32 %v4911_v60, %v4920_v11  ;;  %v5073_v11 = vld [vmem:[#allocation8] sm:$0x1] }
 0x4dd   : > { %2128 = vmatpush.msra.mxu3 %v2053_v17  ;;  %v978_v17 = vadd.f32 %v4945_v32, %v755_v16  ;;  %v3984_v16 = vld [vmem:[#allocation6 + $0x2a8] sm:$0xff] }
 0x4df   : > { %2129 = vmatpush.msra.mxu3 %v2051_v18  ;;  %v1181_v18 = vadd.f32 %v4967_v49, %v978_v17  ;;  %v3985_v17 = vld [vmem:[#allocation6 + $0x3c0] sm:$0xff] }
 0x4e1   : > { %2130 = vmatpush.msra.mxu3 %v2049_v22  ;;  %v1384_v22 = vadd.f32 %v4991_v7, %v1181_v18  ;;  %v3986_v18 = vld [vmem:[#allocation6 + $0x298] sm:$0xff] }
 0x4e3   : > { %2131 = vmatpush.msra.mxu3 %v2047_v23  ;;  %v1587_v23 = vadd.f32 %v5015_v35, %v1384_v22  ;;  %v3944_v35 = vld [vmem:[#allocation6 + $0xf8] sm:$0xff]  ;;  %v3987_v22 = vld [vmem:[#allocation6 + $0x3b0] sm:$0xff] }
 0x4e5   : > { %2132 = vmatpush.msra.mxu3 %v2045_v24  ;;  %v1970_v24 = vpop.f32.mrf.mxu2 }
 0x4e7   : > { %2133 = vmatpush.msra.mxu3 %v2043_v25  ;;  %v1790_v25 = vadd.f32 %v5039_v59, %v1587_v23  ;;  %v3945_v59 = vld [vmem:[#allocation6 + $0xe8] sm:$0xff] }
 0x4e8   : > { %v3988_v23 = vld [vmem:[#allocation6 + $0x288] sm:$0xff] }
 0x4e9   : > { %2134 = vmatpush.msra.mxu3 %v2041_v26 }
 0x4eb   : > { %2135 = vmatpush.msra.mxu3 %v2039_v27  ;;  %v1993_v27 = vadd.f32 %v1970_v24, %v1790_v25  ;;  %v3989_v24 = vld [vmem:[#allocation6 + $0x3a0] sm:$0xff]  ;;  %v3990_v25 = vld [vmem:[#allocation6 + $0x278] sm:$0xff] }
 0x4ed   : > { %2136 = vmatpush.msra.mxu3 %v2037_v3 }
 0x4ef   : > { %2137 = vmatpush.msra.mxu3 %v2035_v28  ;;  %v5068_v28 = vpop.permute.xlu0 %2201 }
 0x4f1   : > { %2138 = vmatpush.msra.mxu3 %v2033_v31 }
 0x4f2   : > { %v2102_v37 = vpop.f32.mrf.mxu1 }
 0x4f3   : > { %v2103_v39 = vadd.f32 %v2102_v37, %v2082_v33  ;;  %2139 = vmatpush.msra.mxu3 %v2031_v36  ;;  %v3946_v33 = vld [vmem:[#allocation6 + $0xd8] sm:$0xff]  ;;  %v3947_v36 = vld [vmem:[#allocation6 + $0x1f0] sm:$0xff]  ;;  %v3948_v37 = vld [vmem:[#allocation6 + $0xc8] sm:$0xff] }
 0x4f5   : > { %2140 = vmatpush.msra.mxu3 %v2029_v38  ;;  %3777 = vmatpush.msk.msrb.mxu0 %vm681_vm0, %v2103_v39  ;;  %v3949_v38 = vld [vmem:[#allocation6 + $0x1e0] sm:$0xff]  ;;  %v3950_v39 = vld [vmem:[#allocation6 + $0xb8] sm:$0xff] }
 0x4f6   : > { %2141 = vmatmul.f32.vlgmr.msra.gmra.mxu3 %v5031_v29  ;;  %3778 = vmatmul.msk.f32.vlgmr.msrb.gmra.mxu0 %vm677_vm1, %v5053_v4  ;;  %v3920_v29 = vld [vmem:[#allocation6 + $0x70] sm:$0xff] }
 0x4f7   : > { %2278 = vmatpush.msra.mxu0 %v3912_v40  ;;  %v3951_v40 = vld [vmem:[#allocation6 + $0x1d0] sm:$0xff] }
 0x4f8   : > { %v2122_v32 = vpop.f32.mrf.mxu2 }
 0x4f9   : > { %2279 = vmatpush.msra.mxu0 %v3913_v43  ;;  %v3952_v43 = vld [vmem:[#allocation6 + $0xa8] sm:$0xff] }
 0x4fb   : > { %2280 = vmatpush.msra.mxu0 %v3914_v42  ;;  %v3953_v42 = vld [vmem:[#allocation6 + $0x1c0] sm:$0xff] }
 0x4fd   : > { %2281 = vmatpush.msra.mxu0 %v3915_v44  ;;  %v3954_v44 = vld [vmem:[#allocation6 + $0x98] sm:$0xff] }
 0x4ff   : > { %2282 = vmatpush.msra.mxu0 %v3916_v45  ;;  %v3955_v45 = vld [vmem:[#allocation6 + $0x1b0] sm:$0xff] }
 0x501   : > { %2283 = vmatpush.msra.mxu0 %v3917_v46  ;;  %v3957_v46 = vld [vmem:[#allocation6 + $0x1a0] sm:$0xff] }
 0x503   : > { %2284 = vmatpush.msra.mxu0 %v3918_v47  ;;  %v3958_v47 = vld [vmem:[#allocation6 + $0x78] sm:$0xff] }
 0x505   : > { %2285 = vmatpush.msra.mxu0 %v3919_v48  ;;  %v3959_v48 = vld [vmem:[#allocation6 + $0x190] sm:$0xff] }
 0x507   : > { %2286 = vmatpush.msra.mxu0 %v3920_v29  ;;  %v3960_v29 = vld [vmem:[#allocation6 + $0x68] sm:$0xff] }
 0x509   : > { %2287 = vmatpush.msra.mxu0 %v3921_v21  ;;  %v3961_v21 = vld [vmem:[#allocation6 + $0x180] sm:$0xff] }
 0x50b   : > { %2288 = vmatpush.msra.mxu0 %v3922_v50  ;;  %v3962_v50 = vld [vmem:[#allocation6 + $0x58] sm:$0xff] }
 0x50d   : > { %2289 = vmatpush.msra.mxu0 %v3923_v52  ;;  %v3963_v52 = vld [vmem:[#allocation6 + $0x170] sm:$0xff] }
 0x50f   : > { %2290 = vmatpush.msra.mxu0 %v3924_v34  ;;  %v3964_v34 = vld [vmem:[#allocation6 + $0x48] sm:$0xff] }
 0x511   : > { %2291 = vmatpush.msra.mxu0 %v3925_v53  ;;  %v3965_v53 = vld [vmem:[#allocation6 + $0x160] sm:$0xff] }
 0x513   : > { %2292 = vmatpush.msra.mxu0 %v3926_v54  ;;  %v3966_v54 = vld [vmem:[#allocation6 + $0x38] sm:$0xff] }
 0x515   : > { %2293 = vmatpush.msra.mxu0 %v3927_v55  ;;  %v3967_v55 = vld [vmem:[#allocation6 + $0x150] sm:$0xff] }
 0x517   : > { %2371 = vmatpush.msrb.mxu0 %v3928_v56  ;;  %v3968_v56 = vld [vmem:[#allocation6 + $0x28] sm:$0xff] }
 0x519   : > { %2372 = vmatpush.msrb.mxu0 %v3929_v57  ;;  %v3969_v57 = vld [vmem:[#allocation6 + $0x140] sm:$0xff] }
 0x51b   : > { %2373 = vmatpush.msrb.mxu0 %v3930_v58  ;;  %v3970_v58 = vld [vmem:[#allocation6 + $0x18] sm:$0xff] }
 0x51d   : > { %2374 = vmatpush.msrb.mxu0 %v3931_v62  ;;  %v3971_v62 = vld [vmem:[#allocation6 + $0x130] sm:$0xff] }
 0x51f   : > { %2375 = vmatpush.msrb.mxu0 %v3932_v2  ;;  %v3972_v2 = vld [vmem:[#allocation6 + $0x8] sm:$0xff] }
 0x521   : > { %2376 = vmatpush.msrb.mxu0 %v3933_v19  ;;  %v3973_v19 = vld [vmem:[#allocation6 + $0x120] sm:$0xff] }
 0x523   : > { %2377 = vmatpush.msrb.mxu0 %v3934_v20  ;;  %v3974_v20 = vld [vmem:[#allocation6 + $0x2f8] sm:$0xff] }
 0x525   : > { %2378 = vmatpush.msrb.mxu0 %v3935_v5  ;;  %v3975_v5 = vld [vmem:[#allocation6 + $0x110] sm:$0xff] }
 0x527   : > { %2379 = vmatpush.msrb.mxu0 %v3936_v6  ;;  %v3976_v6 = vld [vmem:[#allocation6 + $0x2e8] sm:$0xff] }
 0x529   : > { %2380 = vmatpush.msrb.mxu0 %v3937_v8  ;;  %v3977_v8 = vld [vmem:[#allocation6 + $0x100] sm:$0xff] }
 0x52b   : > { %2381 = vmatpush.msrb.mxu0 %v3938_v9  ;;  %v3978_v9 = vld [vmem:[#allocation6 + $0x2d8] sm:$0xff] }
 0x52d   : > { %2382 = vmatpush.msrb.mxu0 %v3939_v41  ;;  %v3979_v41 = vld [vmem:[#allocation6 + $0x3f0] sm:$0xff] }
 0x52f   : > { %2383 = vmatpush.msrb.mxu0 %v3940_v10  ;;  %v3980_v10 = vld [vmem:[#allocation6 + $0x2c8] sm:$0xff] }
 0x531   : > { %2384 = vmatpush.msrb.mxu0 %v3941_v13  ;;  %v3981_v13 = vld [vmem:[#allocation6 + $0x3e0] sm:$0xff] }
 0x533   : > { %2385 = vmatpush.msrb.mxu0 %v3942_v14  ;;  %v3982_v14 = vld [vmem:[#allocation6 + $0x2b8] sm:$0xff] }
 0x535   : > { %2386 = vmatpush.msrb.mxu0 %v3943_v15  ;;  %v3983_v15 = vld [vmem:[#allocation6 + $0x3d0] sm:$0xff] }
 0x559   : > { %v5066_v26 = vpop.f32.mrf.mxu3 }
 0x573   : > { %v2173_v3 = vpop.f32.mrf.mxu0 }
 0x574   : > { %v2196_v31 = vadd.f32 %v2173_v3, %v1993_v27  ;;  %v3991_v27 = vld [vmem:[#allocation6 + $0x390] sm:$0xff]  ;;  %v3992_v3 = vld [vmem:[#allocation6 + $0x268] sm:$0xff] }
 0x576   : > { %v5071_v60 = vadd.f32 %v5068_v28, %v2196_v31  ;;  %v3993_v31 = vld [vmem:[#allocation6 + $0x380] sm:$0xff] }
 0x578   : > { %3781 = vmatpush.msk.msrb.mxu2 %vm681_vm0, %v5071_v60 }
 0x579   : > { %v2142_v49 = vpop.f32.mrf.mxu3  ;;  %3782 = vmatmul.msk.f32.vlgmr.msrb.gmra.mxu2 %vm677_vm1, %v5073_v11 }
 0x57a   : > { %v2143_v7 = vadd.f32 %v2142_v49, %v2122_v32  ;;  %2324 = vmatpush.msra.mxu2 %v3944_v35  ;;  %v3994_v32 = vld [vmem:[#allocation6 + $0x258] sm:$0xff]  ;;  %v3995_v49 = vld [vmem:[#allocation6 + $0x370] sm:$0xff]  ;;  %v3997_v35 = vld [vmem:[#allocation6 + $0x360] sm:$0xff] }
 0x57c   : > { %3779 = vmatpush.msk.msrb.mxu1 %vm681_vm0, %v2143_v7  ;;  %2325 = vmatpush.msra.mxu2 %v3945_v59  ;;  %v3996_v7 = vld [vmem:[#allocation6 + $0x248] sm:$0xff]  ;;  %v3998_v59 = vld [vmem:[#allocation6 + $0x238] sm:$0xff] }
 0x57d   : > { %3780 = vmatmul.msk.f32.vlgmr.msrb.gmra.mxu1 %vm677_vm1, %v5053_v4  ;;  %v3956_v4 = vld [vmem:[#allocation6 + $0x88] sm:$0xff] }
 0x57e   : > { %2326 = vmatpush.msra.mxu2 %v3946_v33  ;;  %2301 = vmatpush.msra.mxu1 %v3947_v36  ;;  %v3999_v33 = vld [vmem:[#allocation6 + $0x350] sm:$0xff]  ;;  %v4000_v36 = vld [vmem:[#allocation6 + $0x228] sm:$0xff] }
 0x580   : > { %2327 = vmatpush.msra.mxu2 %v3948_v37  ;;  %2302 = vmatpush.msra.mxu1 %v3949_v38  ;;  %v4001_v37 = vld [vmem:[#allocation6 + $0x340] sm:$0xff]  ;;  %v4002_v38 = vld [vmem:[#allocation6 + $0x218] sm:$0xff] }
 0x582   : > { %2328 = vmatpush.msra.mxu2 %v3950_v39  ;;  %2303 = vmatpush.msra.mxu1 %v3951_v40  ;;  %v4003_v39 = vld [vmem:[#allocation6 + $0x330] sm:$0xff]  ;;  %v4004_v40 = vld [vmem:[#allocation6 + $0x208] sm:$0xff] }
 0x584   : > { %2329 = vmatpush.msra.mxu2 %v3952_v43  ;;  %2304 = vmatpush.msra.mxu1 %v3953_v42  ;;  %v4005_v43 = vld [vmem:[#allocation6 + $0x320] sm:$0xff]  ;;  %v4006_v42 = vld [vmem:[#allocation6 + $0x310] sm:$0xff] }
 0x586   : > { %2330 = vmatpush.msra.mxu2 %v3954_v44  ;;  %2305 = vmatpush.msra.mxu1 %v3955_v45  ;;  %v4007_v44 = vld [vmem:[#allocation6 + $0x300] sm:$0xff]  ;;  %v775_v45 = vadd.f32 %v4913_v61, %v4922_v12  ;;  %v2206_v61 = vsel %vm681_vm0, %v5071_v60, 0.0 }
 0x588   : > { %2331 = vmatpush.msra.mxu2 %v3956_v4  ;;  %2306 = vmatpush.msra.mxu1 %v3957_v46  ;;  %v979_v4 = vadd.f32 %v4943_v30, %v775_v45 }
 0x58a   : > { %2332 = vmatpush.msra.mxu2 %v3958_v47  ;;  %2307 = vmatpush.msra.mxu1 %v3959_v48  ;;  %v1182_v46 = vadd.f32 %v4969_v51, %v979_v4  ;;  %v4008_v51 = vld [vmem:[#allocation6 + $0x1f8] sm:$0xff] }
 0x58c   : > { %2333 = vmatpush.msra.mxu2 %v3960_v29  ;;  %2308 = vmatpush.msra.mxu1 %v3961_v21  ;;  %v1385_v47 = vadd.f32 %v4993_v63, %v1182_v46  ;;  %v4009_v63 = vld [vmem:[#allocation6 + $0x1e8] sm:$0xff] }
 0x58e   : > { %2334 = vmatpush.msra.mxu2 %v3962_v50  ;;  %2309 = vmatpush.msra.mxu1 %v3963_v52  ;;  %v1588_v48 = vadd.f32 %v5017_v0, %v1385_v47  ;;  %v4010_v0 = vld [vmem:[#allocation6 + $0x1d8] sm:$0xff] }
 0x590   : > { %2335 = vmatpush.msra.mxu2 %v3964_v34  ;;  %2310 = vmatpush.msra.mxu1 %v3965_v53  ;;  %v1791_v29 = vadd.f32 %v5041_v1, %v1588_v48  ;;  %v4011_v1 = vld [vmem:[#allocation6 + $0x1c8] sm:$0xff]  ;;  %v4014_v53 = vld [vmem:[#allocation6 + $0x198] sm:$0xff] }
 0x592   : > { %2336 = vmatpush.msra.mxu2 %v3966_v54  ;;  %2311 = vmatpush.msra.mxu1 %v3967_v55  ;;  %v1994_v21 = vadd.f32 %v5066_v26, %v1791_v29  ;;  %v4012_v26 = vld [vmem:[#allocation6 + $0x1b8] sm:$0xff]  ;;  %v4015_v54 = vld [vmem:[#allocation6 + $0x188] sm:$0xff] }
 0x593   : > { %v4016_v55 = vld [vmem:[#allocation6 + $0x178] sm:$0xff] }
 0x594   : > { %2337 = vmatpush.msra.mxu2 %v3968_v56  ;;  %2312 = vmatpush.msra.mxu1 %v3969_v57  ;;  %v4018_v56 = vld [vmem:[#allocation6 + $0x158] sm:$0xff]  ;;  %v4019_v57 = vld [vmem:[#allocation6 + $0x148] sm:$0xff] }
 0x596   : > { %2338 = vmatpush.msra.mxu2 %v3970_v58  ;;  %2313 = vmatpush.msra.mxu1 %v3971_v62  ;;  %v4020_v58 = vld [vmem:[#allocation6 + $0x138] sm:$0xff]  ;;  %v4021_v62 = vld [vmem:[#allocation6 + $0x128] sm:$0xff] }
 0x598   : > { %2339 = vmatpush.msra.mxu2 %v3972_v2  ;;  %2314 = vmatpush.msra.mxu1 %v3973_v19  ;;  %v4022_v2 = vld [vmem:[#allocation6 + $0x118] sm:$0xff]  ;;  %v4023_v19 = vld [vmem:[#allocation6 + $0x108] sm:$0xff] }
 0x59a   : > { %2417 = vmatpush.msrb.mxu2 %v3974_v20  ;;  %2315 = vmatpush.msra.mxu1 %v3975_v5  ;;  %v4024_v20 = vld [vmem:[#allocation6 + $0x3f8] sm:$0xff]  ;;  %v4025_v5 = vld [vmem:[#allocation6 + $0x3e8] sm:$0xff] }
 0x59c   : > { %2418 = vmatpush.msrb.mxu2 %v3976_v6  ;;  %2316 = vmatpush.msra.mxu1 %v3977_v8  ;;  %v4026_v6 = vld [vmem:[#allocation6 + $0x3d8] sm:$0xff]  ;;  %v4027_v8 = vld [vmem:[#allocation6 + $0x3c8] sm:$0xff] }
 0x59e   : > { %2419 = vmatpush.msrb.mxu2 %v3978_v9  ;;  %2394 = vmatpush.msrb.mxu1 %v3979_v41  ;;  %v4028_v9 = vld [vmem:[#allocation6 + $0x3b8] sm:$0xff]  ;;  %v4029_v41 = vld [vmem:[#allocation6 + $0x3a8] sm:$0xff] }
 0x5a0   : > { %2420 = vmatpush.msrb.mxu2 %v3980_v10  ;;  %2395 = vmatpush.msrb.mxu1 %v3981_v13  ;;  %v4030_v10 = vld [vmem:[#allocation6 + $0x398] sm:$0xff]  ;;  %v4031_v13 = vld [vmem:[#allocation6 + $0x388] sm:$0xff] }
 0x5a2   : > { %2421 = vmatpush.msrb.mxu2 %v3982_v14  ;;  %2396 = vmatpush.msrb.mxu1 %v3983_v15  ;;  %v4032_v14 = vld [vmem:[#allocation6 + $0x378] sm:$0xff]  ;;  %v4033_v15 = vld [vmem:[#allocation6 + $0x368] sm:$0xff] }
 0x5a4   : > { %2422 = vmatpush.msrb.mxu2 %v3984_v16  ;;  %2397 = vmatpush.msrb.mxu1 %v3985_v17  ;;  %v4034_v16 = vld [vmem:[#allocation6 + $0x358] sm:$0xff]  ;;  %v4035_v17 = vld [vmem:[#allocation6 + $0x348] sm:$0xff] }
 0x5a6   : > { %2423 = vmatpush.msrb.mxu2 %v3986_v18  ;;  %2398 = vmatpush.msrb.mxu1 %v3987_v22  ;;  %v4036_v18 = vld [vmem:[#allocation6 + $0x338] sm:$0xff]  ;;  %v4037_v22 = vld [vmem:[#allocation6 + $0x328] sm:$0xff] }
 0x5a8   : > { %2424 = vmatpush.msrb.mxu2 %v3988_v23  ;;  %2399 = vmatpush.msrb.mxu1 %v3989_v24  ;;  %v4038_v23 = vld [vmem:[#allocation6 + $0x318] sm:$0xff]  ;;  %v4039_v24 = vld [vmem:[#allocation6 + $0x308] sm:$0xff] }
 0x5aa   : > { %2425 = vmatpush.msrb.mxu2 %v3990_v25  ;;  %2400 = vmatpush.msrb.mxu1 %v3991_v27 }
 0x5ac   : > { %2426 = vmatpush.msrb.mxu2 %v3992_v3  ;;  %2401 = vmatpush.msrb.mxu1 %v3993_v31  ;;  %v2214_v3 = vstv %s2213_s26 }
 0x5ae   : > { %2427 = vmatpush.msrb.mxu2 %v3994_v32  ;;  %2402 = vmatpush.msrb.mxu1 %v3995_v49 }
 0x5b0   : > { %2428 = vmatpush.msrb.mxu2 %v3996_v7  ;;  %2403 = vmatpush.msrb.mxu1 %v3997_v35 }
 0x5b2   : > { %2429 = vmatpush.msrb.mxu2 %v3998_v59  ;;  %2404 = vmatpush.msrb.mxu1 %v3999_v33 }
 0x5b4   : > { %2430 = vmatpush.msrb.mxu2 %v4000_v36  ;;  %2405 = vmatpush.msrb.mxu1 %v4001_v37 }
 0x5b6   : > { %2431 = vmatpush.msrb.mxu2 %v4002_v38  ;;  %2406 = vmatpush.msrb.mxu1 %v4003_v39 }
 0x5b8   : > { %2432 = vmatpush.msrb.mxu2 %v4004_v40  ;;  %2407 = vmatpush.msrb.mxu1 %v4005_v43 }
 0x5ba   : > { %2408 = vmatpush.msrb.mxu1 %v4006_v42 }
 0x5bc   : > { %2409 = vmatpush.msrb.mxu1 %v4007_v44 }
 0x5fa   : > { %v2193_v50 = vpop.f32.mrf.mxu1 }
 0x5fb   : > { %v2197_v52 = vadd.f32 %v2193_v50, %v1994_v21  ;;  %v2370_v50 = vld [vmem:[#allocation9] sm:$0xf] }
 0x5fc   : > { %v2241_v31 = vpop.f32.mrf.mxu2 }
 0x5fd   : > { %v5091_v34 = vadd.f32 %v5068_v28, %v2197_v52  ;;  %v4013_v28 = vld [vmem:[#allocation6 + $0x1a8] sm:$0xff]  ;;  %v2242_v59 = vadd.f32 %v2241_v31, %v2214_v3 }
 0x5fe   : > { %v4064_v31 = vld [vmem:[#allocation6 + $0x448] sm:$0xff] }
 0x5ff   : > { %3783 = vmatpush.msk.msrb.mxu3 %vm681_vm0, %v5091_v34  ;;  %v2207_v12 = vsel %vm681_vm0, %v5091_v34, 0.0  ;;  %v2266_v37 = vperm.slane %v2242_v59, 0  ;;  %v4069_v59 = vld [vmem:[#allocation6 + $0x568] sm:$0xff] }
 0x600   : > { %3784 = vmatmul.msk.f32.vlgmr.msrb.gmra.mxu3 %vm677_vm1, %v5073_v11  ;;  %v2208_v30 = vadd.f32 %v2207_v12, %v2206_v61  ;;  %v4017_v11 = vld [vmem:[#allocation6 + $0x168] sm:$0xff]  ;;  %v4040_v61 = vld [vmem:[#allocation6 + $0x4f8] sm:$0xff] }
 0x601   : > { %2347 = vmatpush.msra.mxu3 %v4008_v51  ;;  %v5116_v38 = vmul.f32 %v2266_v37, %v5071_v60  ;;  %v4041_v51 = vld [vmem:[#allocation6 + $0x4e8] sm:$0xff]  ;;  %v4070_v37 = vld [vmem:[#allocation6 + $0x4a0] sm:$0xff] }
 0x602   : > { %2209 = vadd.xlane.f32.xlu0 %v2208_v30 }
 0x603   : > { %2348 = vmatpush.msra.mxu3 %v4009_v63 }
 0x605   : > { %2349 = vmatpush.msra.mxu3 %v4010_v0  ;;  %v4042_v0 = vld [vmem:[#allocation6 + $0x4d8] sm:$0xff] }
 0x607   : > { %2350 = vmatpush.msra.mxu3 %v4011_v1 }
 0x609   : > { %2351 = vmatpush.msra.mxu3 %v4012_v26  ;;  %v4043_v26 = vld [vmem:[#allocation6 + $0x4c8] sm:$0xff] }
 0x60b   : > { %2352 = vmatpush.msra.mxu3 %v4013_v28  ;;  %v4044_v28 = vld [vmem:[#allocation6 + $0x5f8] sm:$0xff] }
 0x60d   : > { %2353 = vmatpush.msra.mxu3 %v4014_v53 }
 0x60f   : > { %2354 = vmatpush.msra.mxu3 %v4015_v54  ;;  %v4045_v54 = vld [vmem:[#allocation6 + $0x4b8] sm:$0xff] }
 0x611   : > { %2355 = vmatpush.msra.mxu3 %v4016_v55  ;;  %v4046_v55 = vld [vmem:[#allocation6 + $0x5e8] sm:$0xff] }
 0x613   : > { %2356 = vmatpush.msra.mxu3 %v4017_v11 }
 0x615   : > { %2357 = vmatpush.msra.mxu3 %v4018_v56 }
 0x617   : > { %2358 = vmatpush.msra.mxu3 %v4019_v57  ;;  %v4047_v57 = vld [vmem:[#allocation6 + $0x4a8] sm:$0xff] }
 0x619   : > { %2359 = vmatpush.msra.mxu3 %v4020_v58  ;;  %v4048_v58 = vld [vmem:[#allocation6 + $0x5d8] sm:$0xff] }
 0x61b   : > { %2360 = vmatpush.msra.mxu3 %v4021_v62 }
 0x61d   : > { %2361 = vmatpush.msra.mxu3 %v4022_v2  ;;  %v4049_v2 = vld [vmem:[#allocation6 + $0x498] sm:$0xff] }
 0x61f   : > { %2362 = vmatpush.msra.mxu3 %v4023_v19  ;;  %v4050_v19 = vld [vmem:[#allocation6 + $0x5c8] sm:$0xff] }
 0x621   : > { %2440 = vmatpush.msrb.mxu3 %v4024_v20 }
 0x623   : > { %2441 = vmatpush.msrb.mxu3 %v4025_v5  ;;  %v4051_v5 = vld [vmem:[#allocation6 + $0x488] sm:$0xff] }
 0x625   : > { %2442 = vmatpush.msrb.mxu3 %v4026_v6  ;;  %v4052_v6 = vld [vmem:[#allocation6 + $0x5b8] sm:$0xff] }
 0x627   : > { %2443 = vmatpush.msrb.mxu3 %v4027_v8  ;;  %v5138_v8 = vld [vmem:[#allocation9 + $0x4] sm:$0xf] }
 0x629   : > { %2444 = vmatpush.msrb.mxu3 %v4028_v9 }
 0x62b   : > { %2445 = vmatpush.msrb.mxu3 %v4029_v41 }
 0x62d   : > { %2446 = vmatpush.msrb.mxu3 %v4030_v10  ;;  %v4053_v10 = vld [vmem:[#allocation6 + $0x4f0] sm:$0xff] }
 0x62f   : > { %2447 = vmatpush.msrb.mxu3 %v4031_v13  ;;  %v4054_v13 = vld [vmem:[#allocation6 + $0x478] sm:$0xff] }
 0x631   : > { %2448 = vmatpush.msrb.mxu3 %v4032_v14 }
 0x633   : > { %2449 = vmatpush.msrb.mxu3 %v4033_v15  ;;  %v4055_v15 = vld [vmem:[#allocation6 + $0x5a8] sm:$0xff] }
 0x635   : > { %2450 = vmatpush.msrb.mxu3 %v4034_v16  ;;  %v4056_v16 = vld [vmem:[#allocation6 + $0x4e0] sm:$0xff] }
 0x637   : > { %2451 = vmatpush.msrb.mxu3 %v4035_v17  ;;  %v4057_v17 = vld [vmem:[#allocation6 + $0x468] sm:$0xff] }
 0x639   : > { %2452 = vmatpush.msrb.mxu3 %v4036_v18 }
 0x63b   : > { %2453 = vmatpush.msrb.mxu3 %v4037_v22  ;;  %v4058_v22 = vld [vmem:[#allocation6 + $0x598] sm:$0xff] }
 0x63d   : > { %2454 = vmatpush.msrb.mxu3 %v4038_v23  ;;  %v4059_v23 = vld [vmem:[#allocation6 + $0x4d0] sm:$0xff] }
 0x63f   : > { %2455 = vmatpush.msrb.mxu3 %v4039_v24  ;;  %v4060_v24 = vld [vmem:[#allocation6 + $0x458] sm:$0xff] }
 0x675   : > { %v2210_v25 = vpop.xlane.xlu0 %2209 }
 0x676   : > { %v2211_v27 = vmul.f32 0.00390625, %v2210_v25  ;;  %v4061_v25 = vld [vmem:[#allocation6 + $0x588] sm:$0xff] }
 0x678   : > { %v2264_v32 = vmul.f32 %v2211_v27, %v5071_v60  ;;  %v2265_v49 = vmul.f32 %v2211_v27, %v5091_v34  ;;  %v4062_v27 = vld [vmem:[#allocation6 + $0x4c0] sm:$0xff] }
 0x67a   : > { %v2272_v7 = vrot.slane %v2264_v32, 4  ;;  %v2273_v35 = vrot.slane %v2265_v49, 4  ;;  %v4065_v32 = vld [vmem:[#allocation6 + $0x578] sm:$0xff]  ;;  %v4066_v49 = vld [vmem:[#allocation6 + $0x4b0] sm:$0xff] }
 0x67c   : > { %v5105_v33 = vsel %vm681_vm0, %v5071_v60, %v2272_v7  ;;  %v5109_v36 = vsel %vm681_vm0, %v5091_v34, %v2273_v35  ;;  %v4067_v7 = vld [vmem:[#allocation6 + $0x5e0] sm:$0xff]  ;;  %v4068_v35 = vld [vmem:[#allocation6 + $0x438] sm:$0xff] }
 0x67d   : > { %2294 = vmatmul.f32.vlgmr.msra.gmra.mxu0 %v5105_v33  ;;  %2317 = vmatmul.f32.vlgmr.msra.gmra.mxu1 %v5109_v36 }
 0x67e   : > { %2340 = vmatmul.f32.vlgmr.msra.gmra.mxu2 %v5105_v33  ;;  %2363 = vmatmul.f32.vlgmr.msra.gmra.mxu3 %v5109_v36 }
 0x683   : > { %v2261_v39 = vpop.f32.mrf.mxu3 }
 0x684   : > { %v2262_v40 = vadd.f32 %v2261_v39, %v2214_v3  ;;  %v4063_v3 = vld [vmem:[#allocation6 + $0x5f0] sm:$0xff] }
 0x685   : > { %2297 = vmatmul.f32.gmra.mxu0 %v5116_v38  ;;  %v4071_v39 = vld [vmem:[#allocation6 + $0x5d0] sm:$0xff] }
 0x686   : > { %v2267_v43 = vperm.slane %v2262_v40, 0  ;;  %2343 = vmatmul.f32.gmra.mxu2 %v5116_v38  ;;  %v4072_v40 = vld [vmem:[#allocation6 + $0x428] sm:$0xff] }
 0x688   : > { %v5121_v42 = vmul.f32 %v2267_v43, %v5091_v34  ;;  %v4073_v43 = vld [vmem:[#allocation6 + $0x558] sm:$0xff] }
 0x68a   : > { %2320 = vmatmul.f32.gmra.mxu1 %v5121_v42  ;;  %2366 = vmatmul.f32.gmra.mxu3 %v5121_v42 }
 0x68d   : > { %2387 = vmatmul.f32.vlgmr.msrb.gmra.mxu0 %v5105_v33 }
 0x68e   : > { %2433 = vmatmul.f32.vlgmr.msrb.gmra.mxu2 %v5105_v33 }
 0x692   : > { %2410 = vmatmul.f32.vlgmr.msrb.gmra.mxu1 %v5109_v36  ;;  %2456 = vmatmul.f32.vlgmr.msrb.gmra.mxu3 %v5109_v36 }
 0x695   : > { %2390 = vmatmul.f32.gmra.mxu0 %v5116_v38 }
 0x696   : > { %2436 = vmatmul.f32.gmra.mxu2 %v5116_v38 }
 0x69a   : > { %2413 = vmatmul.f32.gmra.mxu1 %v5121_v42  ;;  %2459 = vmatmul.f32.gmra.mxu3 %v5121_v42 }
 0x6fa   : > { %v2295_v60 = vpop.f32.mrf.mxu0  ;;  %v2318_v44 = vpop.f32.mrf.mxu1 }
 0x6fb   : > { %v2319_v21 = vadd.f32 %v2318_v44, %v2295_v60  ;;  %v4074_v60 = vld [vmem:[#allocation6 + $0x490] sm:$0xff]  ;;  %v4075_v44 = vld [vmem:[#allocation6 + $0x5c0] sm:$0xff] }
 0x701   : > { %v2341_v45 = vpop.f32.mrf.mxu2  ;;  %v2364_v46 = vpop.f32.mrf.mxu3 }
 0x702   : > { %v2298_v4 = vpop.f32.mrf.mxu0  ;;  %v2365_v63 = vadd.f32 %v2364_v46, %v2341_v45  ;;  %v4076_v45 = vld [vmem:[#allocation6 + $0x418] sm:$0xff]  ;;  %v4078_v46 = vld [vmem:[#allocation6 + $0x480] sm:$0xff] }
 0x707   : > { %v2321_v47 = vpop.f32.mrf.mxu1 }
 0x708   : > { %v2322_v48 = vadd.f32 %v2321_v47, %v2298_v4  ;;  %v4077_v4 = vld [vmem:[#allocation6 + $0x548] sm:$0xff]  ;;  %v4079_v47 = vld [vmem:[#allocation6 + $0x5b0] sm:$0xff] }
 0x709   : > { %v2344_v29 = vpop.f32.mrf.mxu2 }
 0x70a   : > { %3789 = vmatpush.msk.msra.mxu2 %vm681_vm0, %v2322_v48  ;;  %v2388_v52 = vpop.f32.mrf.mxu0  ;;  %v4080_v48 = vld [vmem:[#allocation6 + $0x408] sm:$0xff] }
 0x70c   : > { %2539 = vmatpush.msra.mxu2 %v2319_v21  ;;  %v4082_v21 = vld [vmem:[#allocation6 + $0x470] sm:$0xff] }
 0x70d   : > { %v2367_v34 = vpop.f32.mrf.mxu3  ;;  %3790 = vmatmul.msk.f32.vlgmr.msra.gmra.mxu2 %vm2465_vm2, %v2370_v50 }
 0x70e   : > { %2610 = vmatpush.msrb.mxu2 %v4040_v61  ;;  %v2368_v12 = vadd.f32 %v2367_v34, %v2344_v29  ;;  %v4081_v29 = vld [vmem:[#allocation6 + $0x538] sm:$0xff]  ;;  %v4085_v34 = vld [vmem:[#allocation6 + $0x528] sm:$0xff]  ;;  %v4086_v61 = vld [vmem:[#allocation6 + $0x460] sm:$0xff] }
 0x70f   : > { %v2411_v30 = vpop.f32.mrf.mxu1 }
 0x710   : > { %2611 = vmatpush.msrb.mxu2 %v4041_v51  ;;  %3791 = vmatpush.msk.msra.mxu3 %vm681_vm0, %v2368_v12  ;;  %v2412_v20 = vadd.f32 %v2411_v30, %v2388_v52  ;;  %v4084_v52 = vld [vmem:[#allocation6 + $0x5a0] sm:$0xff]  ;;  %v4088_v30 = vld [vmem:[#allocation6 + $0x590] sm:$0xff]  ;;  %v4089_v51 = vld [vmem:[#allocation6 + $0x518] sm:$0xff] }
 0x711   : > { %v2434_v1 = vpop.f32.mrf.mxu2  ;;  %v4087_v12 = vld [vmem:[#allocation6 + $0x6e0] sm:$0xff] }
 0x712   : > { %2612 = vmatpush.msrb.mxu2 %v4042_v0  ;;  %2559 = vmatpush.msra.mxu3 %v2365_v63  ;;  %v2391_v11 = vpop.f32.mrf.mxu0  ;;  %v4090_v63 = vld [vmem:[#allocation6 + $0x450] sm:$0xff] }
 0x713   : > { %3792 = vmatmul.msk.f32.vlgmr.msra.gmra.mxu3 %vm2465_vm2, %v2370_v50  ;;  %v4083_v50 = vld [vmem:[#allocation6 + $0x6f0] sm:$0xff] }
 0x714   : > { %2613 = vmatpush.msrb.mxu2 %v4043_v26  ;;  %2633 = vmatpush.msrb.mxu3 %v4044_v28  ;;  %v4091_v0 = vld [vmem:[#allocation6 + $0x6d0] sm:$0xff]  ;;  %v4093_v26 = vld [vmem:[#allocation6 + $0x508] sm:$0xff]  ;;  %v4094_v28 = vld [vmem:[#allocation6 + $0x440] sm:$0xff] }
 0x715   : > { %v2457_v53 = vpop.f32.mrf.mxu3 }
 0x716   : > { %2614 = vmatpush.msrb.mxu2 %v4045_v54  ;;  %2634 = vmatpush.msrb.mxu3 %v4046_v55  ;;  %v2458_v18 = vadd.f32 %v2457_v53, %v2434_v1  ;;  %v4092_v1 = vld [vmem:[#allocation6 + $0x580] sm:$0xff]  ;;  %v4096_v54 = vld [vmem:[#allocation6 + $0x7f0] sm:$0xff] }
 0x717   : > { %v2414_v56 = vpop.f32.mrf.mxu1  ;;  %v4095_v53 = vld [vmem:[#allocation6 + $0x6c0] sm:$0xff]  ;;  %v4097_v55 = vld [vmem:[#allocation6 + $0x570] sm:$0xff] }
 0x718   : > { %2615 = vmatpush.msrb.mxu2 %v4047_v57  ;;  %2635 = vmatpush.msrb.mxu3 %v4048_v58  ;;  %v2415_v62 = vadd.f32 %v2414_v56, %v2391_v11  ;;  %v4098_v11 = vld [vmem:[#allocation6 + $0x430] sm:$0xff]  ;;  %v4100_v57 = vld [vmem:[#allocation6 + $0x7e0] sm:$0xff] }
 0x719   : > { %v2437_v9 = vpop.f32.mrf.mxu2  ;;  %v4099_v56 = vld [vmem:[#allocation6 + $0x6b0] sm:$0xff]  ;;  %v4101_v58 = vld [vmem:[#allocation6 + $0x560] sm:$0xff] }
 0x71a   : > { %2616 = vmatpush.msrb.mxu2 %v4049_v2  ;;  %2636 = vmatpush.msrb.mxu3 %v4050_v19  ;;  %v4103_v2 = vld [vmem:[#allocation6 + $0x6a0] sm:$0xff]  ;;  %v4104_v19 = vld [vmem:[#allocation6 + $0x7d0] sm:$0xff] }
 0x71b   : > { %3785 = vmatpush.msk.msra.mxu0 %vm681_vm0, %v2415_v62  ;;  %v4102_v62 = vld [vmem:[#allocation6 + $0x420] sm:$0xff] }
 0x71c   : > { %2617 = vmatpush.msrb.mxu2 %v4051_v5  ;;  %2637 = vmatpush.msrb.mxu3 %v4052_v6  ;;  %v4106_v5 = vld [vmem:[#allocation6 + $0x410] sm:$0xff] }
 0x71d   : > { %2490 = vmatpush.msra.mxu0 %v2412_v20  ;;  %v2460_v41 = vpop.f32.mrf.mxu3  ;;  %v4105_v20 = vld [vmem:[#allocation6 + $0x550] sm:$0xff] }
 0x71e   : > { %2618 = vmatpush.msrb.mxu2 %v4054_v13  ;;  %v2461_v14 = vadd.f32 %v2460_v41, %v2437_v9  ;;  %2638 = vmatpush.msrb.mxu3 %v4055_v15  ;;  %v4107_v6 = vld [vmem:[#allocation6 + $0x690] sm:$0xff]  ;;  %v4108_v9 = vld [vmem:[#allocation6 + $0x7c0] sm:$0xff] }
 0x71f   : > { %2564 = vmatpush.msrb.mxu0 %v4053_v10  ;;  %v4109_v41 = vld [vmem:[#allocation6 + $0x540] sm:$0xff]  ;;  %v4111_v13 = vld [vmem:[#allocation6 + $0x7b0] sm:$0xff] }
 0x720   : > { %3786 = vmatmul.msk.f32.vlgmr.msra.gmra.mxu0 %vm2465_vm2, %v5138_v8  ;;  %2619 = vmatpush.msrb.mxu2 %v4057_v17  ;;  %v4110_v10 = vld [vmem:[#allocation6 + $0x680] sm:$0xff]  ;;  %v4113_v15 = vld [vmem:[#allocation6 + $0x530] sm:$0xff] }
 0x721   : > { %2565 = vmatpush.msrb.mxu0 %v4056_v16  ;;  %2639 = vmatpush.msrb.mxu3 %v4058_v22  ;;  %v4114_v16 = vld [vmem:[#allocation6 + $0x670] sm:$0xff]  ;;  %v4115_v17 = vld [vmem:[#allocation6 + $0x7a0] sm:$0xff] }
 0x722   : > { %3787 = vmatpush.msk.msra.mxu1 %vm681_vm0, %v2461_v14  ;;  %2620 = vmatpush.msrb.mxu2 %v4060_v24  ;;  %v4112_v14 = vld [vmem:[#allocation6 + $0x400] sm:$0xff]  ;;  %v4120_v24 = vld [vmem:[#allocation6 + $0x650] sm:$0xff] }
 0x723   : > { %2566 = vmatpush.msrb.mxu0 %v4059_v23  ;;  %2640 = vmatpush.msrb.mxu3 %v4061_v25  ;;  %v4117_v22 = vld [vmem:[#allocation6 + $0x660] sm:$0xff]  ;;  %v4118_v23 = vld [vmem:[#allocation6 + $0x790] sm:$0xff] }
 0x724   : > { %2510 = vmatpush.msra.mxu1 %v2458_v18  ;;  %2621 = vmatpush.msrb.mxu2 %v4064_v31  ;;  %v4116_v18 = vld [vmem:[#allocation6 + $0x520] sm:$0xff]  ;;  %v4124_v31 = vld [vmem:[#allocation6 + $0x770] sm:$0xff] }
 0x725   : > { %2567 = vmatpush.msrb.mxu0 %v4062_v27  ;;  %2641 = vmatpush.msrb.mxu3 %v4065_v32  ;;  %v4121_v25 = vld [vmem:[#allocation6 + $0x780] sm:$0xff]  ;;  %v4125_v32 = vld [vmem:[#allocation6 + $0x630] sm:$0xff] }
 0x726   : > { %2587 = vmatpush.msrb.mxu1 %v4063_v3  ;;  %2622 = vmatpush.msrb.mxu2 %v4068_v35  ;;  %v4122_v27 = vld [vmem:[#allocation6 + $0x500] sm:$0xff]  ;;  %v4128_v35 = vld [vmem:[#allocation6 + $0x750] sm:$0xff] }
 0x727   : > { %2568 = vmatpush.msrb.mxu0 %v4066_v49  ;;  %2642 = vmatpush.msrb.mxu3 %v4069_v59  ;;  %v4123_v3 = vld [vmem:[#allocation6 + $0x640] sm:$0xff]  ;;  %v4129_v59 = vld [vmem:[#allocation6 + $0x610] sm:$0xff] }
 0x728   : > { %2588 = vmatpush.msrb.mxu1 %v4067_v7  ;;  %2623 = vmatpush.msrb.mxu2 %v4072_v40  ;;  %v4126_v49 = vld [vmem:[#allocation6 + $0x760] sm:$0xff]  ;;  %v4132_v40 = vld [vmem:[#allocation6 + $0x730] sm:$0xff] }
 0x729   : > { %2569 = vmatpush.msrb.mxu0 %v4070_v37  ;;  %2643 = vmatpush.msrb.mxu3 %v4073_v43  ;;  %v4127_v7 = vld [vmem:[#allocation6 + $0x620] sm:$0xff] }
 0x72a   : > { %2589 = vmatpush.msrb.mxu1 %v4071_v39  ;;  %2624 = vmatpush.msrb.mxu2 %v4076_v45  ;;  %v4130_v37 = vld [vmem:[#allocation6 + $0x740] sm:$0xff] }
 0x72b   : > { %2570 = vmatpush.msrb.mxu0 %v4074_v60  ;;  %2644 = vmatpush.msrb.mxu3 %v4077_v4  ;;  %v4131_v39 = vld [vmem:[#allocation6 + $0x600] sm:$0xff]  ;;  %v4134_v60 = vld [vmem:[#allocation6 + $0x710] sm:$0xff] }
 0x72c   : > { %2590 = vmatpush.msrb.mxu1 %v4075_v44  ;;  %2625 = vmatpush.msrb.mxu2 %v4080_v48  ;;  %v4133_v43 = vld [vmem:[#allocation6 + $0x720] sm:$0xff] }
 0x72d   : > { %2571 = vmatpush.msrb.mxu0 %v4078_v46  ;;  %2645 = vmatpush.msrb.mxu3 %v4081_v29  ;;  %v4135_v44 = vld [vmem:[#allocation6 + $0x700] sm:$0xff] }
 0x72e   : > { %2591 = vmatpush.msrb.mxu1 %v4079_v47  ;;  %2626 = vmatmul.f32.vlgmr.msrb.gmra.mxu2 %v5105_v33 }
 0x72f   : > { %2572 = vmatpush.msrb.mxu0 %v4082_v21  ;;  %2709 = vmatpush.msra.mxu2 %v4083_v50 }
 0x730   : > { %2592 = vmatpush.msrb.mxu1 %v4084_v52  ;;  %2646 = vmatpush.msrb.mxu3 %v4085_v34 }
 0x731   : > { %2573 = vmatpush.msrb.mxu0 %v4086_v61  ;;  %2710 = vmatpush.msra.mxu2 %v4087_v12 }
 0x732   : > { %2593 = vmatpush.msrb.mxu1 %v4088_v30  ;;  %2647 = vmatpush.msrb.mxu3 %v4089_v51  ;;  %v2657_v51 = vld [vmem:[#allocation9 + $0x8] sm:$0xf] }
 0x733   : > { %2574 = vmatpush.msrb.mxu0 %v4090_v63  ;;  %2711 = vmatpush.msra.mxu2 %v4091_v0  ;;  %v4136_v0 = vld [vmem:[#allocation6 + $0x7f8] sm:$0xff] }
 0x734   : > { %2594 = vmatpush.msrb.mxu1 %v4092_v1  ;;  %2648 = vmatpush.msrb.mxu3 %v4093_v26  ;;  %v4137_v1 = vld [vmem:[#allocation6 + $0x7e8] sm:$0xff]  ;;  %v4138_v26 = vld [vmem:[#allocation6 + $0x7d8] sm:$0xff] }
 0x735   : > { %2575 = vmatpush.msrb.mxu0 %v4094_v28  ;;  %2649 = vmatmul.f32.vlgmr.msrb.gmra.mxu3 %v5109_v36 }
 0x736   : > { %2712 = vmatpush.msra.mxu2 %v4095_v53  ;;  %2732 = vmatpush.msra.mxu3 %v4096_v54 }
 0x737   : > { %2595 = vmatpush.msrb.mxu1 %v4097_v55  ;;  %2629 = vmatmul.f32.gmra.mxu2 %v5116_v38  ;;  %v4139_v55 = vld [vmem:[#allocation6 + $0x7c8] sm:$0xff] }
 0x738   : > { %2576 = vmatpush.msrb.mxu0 %v4098_v11  ;;  %2713 = vmatpush.msra.mxu2 %v4099_v56  ;;  %v4140_v56 = vld [vmem:[#allocation6 + $0x7b8] sm:$0xff] }
 0x739   : > { %2733 = vmatpush.msra.mxu3 %v4100_v57  ;;  %2596 = vmatpush.msrb.mxu1 %v4101_v58  ;;  %v4141_v57 = vld [vmem:[#allocation6 + $0x7a8] sm:$0xff]  ;;  %v4142_v58 = vld [vmem:[#allocation6 + $0x6f8] sm:$0xff] }
 0x73a   : > { %2577 = vmatpush.msrb.mxu0 %v4102_v62  ;;  %2714 = vmatpush.msra.mxu2 %v4103_v2  ;;  %v4143_v62 = vld [vmem:[#allocation6 + $0x798] sm:$0xff]  ;;  %v4144_v2 = vld [vmem:[#allocation6 + $0x6e8] sm:$0xff] }
 0x73b   : > { %2734 = vmatpush.msra.mxu3 %v4104_v19  ;;  %2597 = vmatpush.msrb.mxu1 %v4105_v20  ;;  %v4145_v19 = vld [vmem:[#allocation6 + $0x788] sm:$0xff]  ;;  %v4146_v20 = vld [vmem:[#allocation6 + $0x6d8] sm:$0xff] }
 0x73c   : > { %2578 = vmatpush.msrb.mxu0 %v4106_v5  ;;  %2715 = vmatpush.msra.mxu2 %v4107_v6  ;;  %v4147_v5 = vld [vmem:[#allocation6 + $0x778] sm:$0xff] }
 0x73d   : > { %2735 = vmatpush.msra.mxu3 %v4108_v9  ;;  %2598 = vmatpush.msrb.mxu1 %v4109_v41  ;;  %v4148_v9 = vld [vmem:[#allocation6 + $0x6c8] sm:$0xff] }
 0x73e   : > { %2652 = vmatmul.f32.gmra.mxu3 %v5121_v42  ;;  %3788 = vmatmul.msk.f32.vlgmr.msra.gmra.mxu1 %vm2465_vm2, %v5138_v8  ;;  %v4119_v8 = vld [vmem:[#allocation6 + $0x510] sm:$0xff]  ;;  %v4149_v41 = vld [vmem:[#allocation6 + $0x768] sm:$0xff] }
 0x73f   : > { %2716 = vmatpush.msra.mxu2 %v4110_v10  ;;  %2736 = vmatpush.msra.mxu3 %v4111_v13  ;;  %v4150_v13 = vld [vmem:[#allocation6 + $0x6b8] sm:$0xff] }
 0x740   : > { %2579 = vmatpush.msrb.mxu0 %v4112_v14  ;;  %2599 = vmatpush.msrb.mxu1 %v4113_v15  ;;  %v4151_v14 = vld [vmem:[#allocation6 + $0x758] sm:$0xff]  ;;  %v4152_v15 = vld [vmem:[#allocation6 + $0x6a8] sm:$0xff] }
 0x741   : > { %2580 = vmatmul.f32.vlgmr.msrb.gmra.mxu0 %v5105_v33  ;;  %2717 = vmatpush.msra.mxu2 %v4114_v16  ;;  %v4153_v16 = vld [vmem:[#allocation6 + $0x748] sm:$0xff] }
 0x742   : > { %2737 = vmatpush.msra.mxu3 %v4115_v17  ;;  %2600 = vmatpush.msrb.mxu1 %v4116_v18  ;;  %v4154_v17 = vld [vmem:[#allocation6 + $0x698] sm:$0xff] }
 0x743   : > { %2718 = vmatpush.msra.mxu2 %v4117_v22  ;;  %v4155_v18 = vld [vmem:[#allocation6 + $0x738] sm:$0xff]  ;;  %v4156_v22 = vld [vmem:[#allocation6 + $0x688] sm:$0xff] }
 0x744   : > { %2738 = vmatpush.msra.mxu3 %v4118_v23  ;;  %2601 = vmatpush.msrb.mxu1 %v4119_v8  ;;  %v4157_v23 = vld [vmem:[#allocation6 + $0x728] sm:$0xff] }
 0x745   : > { %2719 = vmatpush.msra.mxu2 %v4120_v24 }
 0x746   : > { %2739 = vmatpush.msra.mxu3 %v4121_v25  ;;  %2602 = vmatpush.msrb.mxu1 %v4122_v27  ;;  %v4158_v27 = vld [vmem:[#allocation6 + $0x678] sm:$0xff] }
 0x747   : > { %2603 = vmatmul.f32.vlgmr.msrb.gmra.mxu1 %v5109_v36  ;;  %2720 = vmatpush.msra.mxu2 %v4123_v3  ;;  %v4159_v3 = vld [vmem:[#allocation6 + $0x718] sm:$0xff] }
 0x748   : > { %2740 = vmatpush.msra.mxu3 %v4124_v31 }
 0x749   : > { %2583 = vmatmul.f32.gmra.mxu0 %v5116_v38  ;;  %2721 = vmatpush.msra.mxu2 %v4125_v32  ;;  %v4160_v32 = vld [vmem:[#allocation6 + $0x668] sm:$0xff] }
 0x74a   : > { %2741 = vmatpush.msra.mxu3 %v4126_v49  ;;  %v5166_v49 = vld [vmem:[#allocation9 + $0xc] sm:$0xf] }
 0x74b   : > { %2722 = vmatpush.msra.mxu2 %v4127_v7  ;;  %v4161_v7 = vld [vmem:[#allocation6 + $0x708] sm:$0xff] }
 0x74c   : > { %2742 = vmatpush.msra.mxu3 %v4128_v35  ;;  %v4162_v35 = vld [vmem:[#allocation6 + $0x658] sm:$0xff] }
 0x74d   : > { %2723 = vmatpush.msra.mxu2 %v4129_v59  ;;  %v4163_v59 = vld [vmem:[#allocation6 + $0x9f0] sm:$0xff] }
 0x74e   : > { %2743 = vmatpush.msra.mxu3 %v4130_v37  ;;  %v4164_v37 = vld [vmem:[#allocation6 + $0x8f8] sm:$0xff] }
 0x74f   : > { %2606 = vmatmul.f32.gmra.mxu1 %v5121_v42  ;;  %2724 = vmatpush.msra.mxu2 %v4131_v39  ;;  %v4165_v39 = vld [vmem:[#allocation6 + $0x648] sm:$0xff] }
 0x750   : > { %2744 = vmatpush.msra.mxu3 %v4132_v40  ;;  %2725 = vmatmul.f32.vlgmr.msra.gmra.mxu2 %v5105_v33  ;;  %v4166_v40 = vld [vmem:[#allocation6 + $0x9e0] sm:$0xff] }
 0x752   : > { %2745 = vmatpush.msra.mxu3 %v4133_v43  ;;  %v4167_v43 = vld [vmem:[#allocation6 + $0x8e8] sm:$0xff] }
 0x754   : > { %2746 = vmatpush.msra.mxu3 %v4134_v60  ;;  %v4168_v60 = vld [vmem:[#allocation6 + $0x638] sm:$0xff] }
 0x756   : > { %2747 = vmatpush.msra.mxu3 %v4135_v44  ;;  %v4169_v44 = vld [vmem:[#allocation6 + $0x9d0] sm:$0xff] }
 0x757   : > { %2748 = vmatmul.f32.vlgmr.msra.gmra.mxu3 %v5109_v36 }
 0x758   : > { %2728 = vmatmul.f32.gmra.mxu2 %v5116_v38 }
 0x75f   : > { %2751 = vmatmul.f32.gmra.mxu3 %v5121_v42 }
 0x790   : > { %v2541_v45 = vpop.f32.mrf.mxu2 }
 0x796   : > { %v2561_v47 = vpop.f32.mrf.mxu3 }
 0x79d   : > { %v2492_v4 = vpop.f32.mrf.mxu0 }
 0x79e   : > { %v5157_v46 = vadd.f32 %v2541_v45, %v2492_v4  ;;  %v4170_v45 = vld [vmem:[#allocation6 + $0x8d8] sm:$0xff]  ;;  %v4171_v4 = vld [vmem:[#allocation6 + $0x628] sm:$0xff] }
 0x7b1   : > { %v2627_v48 = vpop.f32.mrf.mxu2 }
 0x7b8   : > { %v2650_v29 = vpop.f32.mrf.mxu3 }
 0x7b9   : > { %v2651_v30 = vadd.f32 %v2650_v29, %v2627_v48  ;;  %v4173_v48 = vld [vmem:[#allocation6 + $0x8c8] sm:$0xff]  ;;  %v4174_v29 = vld [vmem:[#allocation6 + $0x618] sm:$0xff] }
 0x7ba   : > { %v2630_v52 = vpop.f32.mrf.mxu2 }
 0x7bb   : > { %v2512_v21 = vpop.f32.mrf.mxu1 }
 0x7bc   : > { %v5159_v50 = vadd.f32 %v2561_v47, %v2512_v21  ;;  %v4172_v47 = vld [vmem:[#allocation6 + $0x9c0] sm:$0xff]  ;;  %v4175_v21 = vld [vmem:[#allocation6 + $0x9b0] sm:$0xff] }
 0x7be   : > { %v2581_v12 = vpop.f32.mrf.mxu0 }
 0x7c1   : > { %v2653_v34 = vpop.f32.mrf.mxu3 }
 0x7c2   : > { %v2654_v61 = vadd.f32 %v2653_v34, %v2630_v52  ;;  %v4176_v52 = vld [vmem:[#allocation6 + $0x8b8] sm:$0xff]  ;;  %v4177_v34 = vld [vmem:[#allocation6 + $0x608] sm:$0xff] }
 0x7c4   : > { %3795 = vmatpush.msk.msra.mxu1 %vm681_vm0, %v2654_v61  ;;  %v2604_v63 = vpop.f32.mrf.mxu1  ;;  %v4178_v61 = vld [vmem:[#allocation6 + $0x9a0] sm:$0xff] }
 0x7c5   : > { %v2605_v11 = vadd.f32 %v2604_v63, %v2581_v12  ;;  %v4179_v12 = vld [vmem:[#allocation6 + $0x8f0] sm:$0xff]  ;;  %v4182_v63 = vld [vmem:[#allocation6 + $0x8e0] sm:$0xff] }
 0x7c6   : > { %2702 = vmatpush.msra.mxu1 %v2651_v30  ;;  %v2584_v28 = vpop.f32.mrf.mxu0  ;;  %v4180_v30 = vld [vmem:[#allocation6 + $0x8a8] sm:$0xff] }
 0x7c7   : > { %3796 = vmatmul.msk.f32.vlgmr.msra.gmra.mxu1 %vm2465_vm2, %v2657_v51 }
 0x7c8   : > { %2778 = vmatpush.msrb.mxu1 %v4136_v0  ;;  %v4183_v0 = vld [vmem:[#allocation6 + $0x898] sm:$0xff] }
 0x7ca   : > { %2779 = vmatpush.msrb.mxu1 %v4137_v1  ;;  %v4184_v1 = vld [vmem:[#allocation6 + $0x980] sm:$0xff] }
 0x7cc   : > { %2780 = vmatpush.msrb.mxu1 %v4138_v26  ;;  %v2607_v53 = vpop.f32.mrf.mxu1  ;;  %v4185_v26 = vld [vmem:[#allocation6 + $0x8d0] sm:$0xff] }
 0x7cd   : > { %v2608_v54 = vadd.f32 %v2607_v53, %v2584_v28  ;;  %v4186_v28 = vld [vmem:[#allocation6 + $0x888] sm:$0xff]  ;;  %v4187_v53 = vld [vmem:[#allocation6 + $0x970] sm:$0xff] }
 0x7ce   : > { %2781 = vmatpush.msrb.mxu1 %v4139_v55  ;;  %v4189_v55 = vld [vmem:[#allocation6 + $0x878] sm:$0xff] }
 0x7cf   : > { %3793 = vmatpush.msk.msra.mxu0 %vm681_vm0, %v2608_v54  ;;  %v4188_v54 = vld [vmem:[#allocation6 + $0x8c0] sm:$0xff] }
 0x7d0   : > { %2782 = vmatpush.msrb.mxu1 %v4140_v56  ;;  %v4191_v56 = vld [vmem:[#allocation6 + $0x8b0] sm:$0xff] }
 0x7d1   : > { %2682 = vmatpush.msra.mxu0 %v2605_v11  ;;  %v4190_v11 = vld [vmem:[#allocation6 + $0x960] sm:$0xff] }
 0x7d2   : > { %2783 = vmatpush.msrb.mxu1 %v4141_v57  ;;  %3794 = vmatmul.msk.f32.vlgmr.msra.gmra.mxu0 %vm2465_vm2, %v2657_v51  ;;  %v4181_v51 = vld [vmem:[#allocation6 + $0x990] sm:$0xff]  ;;  %v4192_v57 = vld [vmem:[#allocation6 + $0x868] sm:$0xff] }
 0x7d3   : > { %2755 = vmatpush.msrb.mxu0 %v4142_v58  ;;  %v2726_v6 = vpop.f32.mrf.mxu2  ;;  %v4193_v58 = vld [vmem:[#allocation6 + $0x950] sm:$0xff] }
 0x7d4   : > { %2784 = vmatpush.msrb.mxu1 %v4143_v62  ;;  %v4194_v62 = vld [vmem:[#allocation6 + $0x8a0] sm:$0xff] }
 0x7d5   : > { %2756 = vmatpush.msrb.mxu0 %v4144_v2  ;;  %v4195_v2 = vld [vmem:[#allocation6 + $0x858] sm:$0xff] }
 0x7d6   : > { %2785 = vmatpush.msrb.mxu1 %v4145_v19  ;;  %v4196_v19 = vld [vmem:[#allocation6 + $0x940] sm:$0xff] }
 0x7d7   : > { %2757 = vmatpush.msrb.mxu0 %v4146_v20  ;;  %v4197_v20 = vld [vmem:[#allocation6 + $0x890] sm:$0xff] }
 0x7d8   : > { %2786 = vmatpush.msrb.mxu1 %v4147_v5  ;;  %v4198_v5 = vld [vmem:[#allocation6 + $0x848] sm:$0xff] }
 0x7d9   : > { %2758 = vmatpush.msrb.mxu0 %v4148_v9  ;;  %v4200_v9 = vld [vmem:[#allocation6 + $0x880] sm:$0xff] }
 0x7da   : > { %2787 = vmatpush.msrb.mxu1 %v4149_v41  ;;  %v2749_v10 = vpop.f32.mrf.mxu3  ;;  %v4201_v41 = vld [vmem:[#allocation6 + $0x838] sm:$0xff] }
 0x7db   : > { %2759 = vmatpush.msrb.mxu0 %v4150_v13  ;;  %v2729_v8 = vpop.f32.mrf.mxu2  ;;  %v2750_v31 = vadd.f32 %v2749_v10, %v2726_v6  ;;  %v4199_v6 = vld [vmem:[#allocation6 + $0x930] sm:$0xff]  ;;  %v4202_v10 = vld [vmem:[#allocation6 + $0x920] sm:$0xff] }
 0x7dc   : > { %2788 = vmatpush.msrb.mxu1 %v4151_v14  ;;  %v4203_v13 = vld [vmem:[#allocation6 + $0x870] sm:$0xff]  ;;  %v4204_v14 = vld [vmem:[#allocation6 + $0x828] sm:$0xff] }
 0x7dd   : > { %2760 = vmatpush.msrb.mxu0 %v4152_v15  ;;  %v4205_v15 = vld [vmem:[#allocation6 + $0x910] sm:$0xff] }
 0x7de   : > { %2789 = vmatpush.msrb.mxu1 %v4153_v16  ;;  %v4206_v16 = vld [vmem:[#allocation6 + $0x860] sm:$0xff] }
 0x7df   : > { %2761 = vmatpush.msrb.mxu0 %v4154_v17  ;;  %v4207_v17 = vld [vmem:[#allocation6 + $0x818] sm:$0xff] }
 0x7e0   : > { %2790 = vmatpush.msrb.mxu1 %v4155_v18  ;;  %v4208_v18 = vld [vmem:[#allocation6 + $0x900] sm:$0xff] }
 0x7e1   : > { %2762 = vmatpush.msrb.mxu0 %v4156_v22  ;;  %v4209_v22 = vld [vmem:[#allocation6 + $0x850] sm:$0xff] }
 0x7e2   : > { %2791 = vmatpush.msrb.mxu1 %v4157_v23  ;;  %v2752_v24 = vpop.f32.mrf.mxu3  ;;  %v4210_v23 = vld [vmem:[#allocation6 + $0x808] sm:$0xff] }
 0x7e3   : > { %v2753_v25 = vadd.f32 %v2752_v24, %v2729_v8  ;;  %2763 = vmatpush.msrb.mxu0 %v4158_v27  ;;  %v4211_v8 = vld [vmem:[#allocation6 + $0xaf0] sm:$0xff]  ;;  %v4212_v24 = vld [vmem:[#allocation6 + $0x840] sm:$0xff] }
 0x7e4   : > { %2792 = vmatpush.msrb.mxu1 %v4159_v3  ;;  %v4214_v27 = vld [vmem:[#allocation6 + $0x830] sm:$0xff] }
 0x7e5   : > { %2764 = vmatpush.msrb.mxu0 %v4160_v32  ;;  %3797 = vmatpush.msk.msrb.mxu2 %vm681_vm0, %v2753_v25  ;;  %v4213_v25 = vld [vmem:[#allocation6 + $0xae0] sm:$0xff]  ;;  %v4215_v3 = vld [vmem:[#allocation6 + $0xad0] sm:$0xff] }
 0x7e6   : > { %2793 = vmatpush.msrb.mxu1 %v4161_v7  ;;  %v4217_v32 = vld [vmem:[#allocation6 + $0xac0] sm:$0xff]  ;;  %v4218_v7 = vld [vmem:[#allocation6 + $0x810] sm:$0xff] }
 0x7e7   : > { %2765 = vmatpush.msrb.mxu0 %v4162_v35  ;;  %2827 = vmatpush.msrb.mxu2 %v2750_v31  ;;  %v4216_v31 = vld [vmem:[#allocation6 + $0x820] sm:$0xff]  ;;  %v4219_v35 = vld [vmem:[#allocation6 + $0xab0] sm:$0xff] }
 0x7e8   : > { %2794 = vmatmul.f32.vlgmr.msrb.gmra.mxu1 %v5109_v36  ;;  %3798 = vmatmul.msk.f32.vlgmr.msrb.gmra.mxu2 %vm2465_vm2, %v5166_v49 }
 0x7e9   : > { %2877 = vmatpush.msra.mxu1 %v4163_v59  ;;  %2900 = vmatpush.msra.mxu2 %v4164_v37  ;;  %v4220_v59 = vld [vmem:[#allocation6 + $0x800] sm:$0xff] }
 0x7ea   : > { %2766 = vmatpush.msrb.mxu0 %v4165_v39  ;;  %v4221_v37 = vld [vmem:[#allocation6 + $0xaa0] sm:$0xff]  ;;  %v4222_v39 = vld [vmem:[#allocation6 + $0xa90] sm:$0xff] }
 0x7eb   : > { %2878 = vmatpush.msra.mxu1 %v4166_v40  ;;  %2901 = vmatpush.msra.mxu2 %v4167_v43  ;;  %v4223_v40 = vld [vmem:[#allocation6 + $0xa80] sm:$0xff]  ;;  %v4224_v43 = vld [vmem:[#allocation6 + $0xa70] sm:$0xff] }
 0x7ec   : > { %2767 = vmatpush.msrb.mxu0 %v4168_v60  ;;  %v4225_v60 = vld [vmem:[#allocation6 + $0xa60] sm:$0xff] }
 0x7ed   : > { %2879 = vmatpush.msra.mxu1 %v4169_v44  ;;  %2902 = vmatpush.msra.mxu2 %v4170_v45  ;;  %v4226_v44 = vld [vmem:[#allocation6 + $0xa50] sm:$0xff]  ;;  %v4227_v45 = vld [vmem:[#allocation6 + $0xa40] sm:$0xff] }
 0x7ee   : > { %2768 = vmatpush.msrb.mxu0 %v4171_v4  ;;  %v4228_v4 = vld [vmem:[#allocation6 + $0xa30] sm:$0xff] }
 0x7ef   : > { %2880 = vmatpush.msra.mxu1 %v4172_v47  ;;  %2903 = vmatpush.msra.mxu2 %v4173_v48  ;;  %v4229_v47 = vld [vmem:[#allocation6 + $0xa20] sm:$0xff]  ;;  %v4230_v48 = vld [vmem:[#allocation6 + $0xa10] sm:$0xff] }
 0x7f0   : > { %2769 = vmatpush.msrb.mxu0 %v4174_v29  ;;  %2797 = vmatmul.f32.gmra.mxu1 %v5121_v42  ;;  %v4231_v29 = vld [vmem:[#allocation6 + $0xa00] sm:$0xff] }
 0x7f1   : > { %2881 = vmatpush.msra.mxu1 %v4175_v21  ;;  %2904 = vmatpush.msra.mxu2 %v4176_v52 }
 0x7f2   : > { %2770 = vmatpush.msrb.mxu0 %v4177_v34 }
 0x7f3   : > { %2771 = vmatmul.f32.vlgmr.msrb.gmra.mxu0 %v5105_v33  ;;  %2882 = vmatpush.msra.mxu1 %v4178_v61 }
 0x7f4   : > { %2854 = vmatpush.msra.mxu0 %v4179_v12  ;;  %2905 = vmatpush.msra.mxu2 %v4180_v30 }
 0x7f5   : > { %2883 = vmatpush.msra.mxu1 %v4181_v51 }
 0x7f6   : > { %2855 = vmatpush.msra.mxu0 %v4182_v63  ;;  %2906 = vmatpush.msra.mxu2 %v4183_v0 }
 0x7f7   : > { %2884 = vmatpush.msra.mxu1 %v4184_v1 }
 0x7f8   : > { %2856 = vmatpush.msra.mxu0 %v4185_v26  ;;  %2907 = vmatpush.msra.mxu2 %v4186_v28 }
 0x7f9   : > { %2885 = vmatpush.msra.mxu1 %v4187_v53  ;;  %v4233_v53 = vld [vmem:[#allocation6 + $0x9e8] sm:$0xff] }
 0x7fa   : > { %2857 = vmatpush.msra.mxu0 %v4188_v54  ;;  %2908 = vmatpush.msra.mxu2 %v4189_v55  ;;  %v4235_v54 = vld [vmem:[#allocation6 + $0x9c8] sm:$0xff]  ;;  %v4236_v55 = vld [vmem:[#allocation6 + $0x9b8] sm:$0xff] }
 0x7fb   : > { %2774 = vmatmul.f32.gmra.mxu0 %v5116_v38  ;;  %2886 = vmatpush.msra.mxu1 %v4190_v11  ;;  %v4237_v11 = vld [vmem:[#allocation6 + $0x9a8] sm:$0xff] }
 0x7fc   : > { %2858 = vmatpush.msra.mxu0 %v4191_v56  ;;  %2909 = vmatpush.msra.mxu2 %v4192_v57  ;;  %v4238_v56 = vld [vmem:[#allocation6 + $0x998] sm:$0xff]  ;;  %v4239_v57 = vld [vmem:[#allocation6 + $0x988] sm:$0xff] }
 0x7fd   : > { %2887 = vmatpush.msra.mxu1 %v4193_v58 }
 0x7fe   : > { %2859 = vmatpush.msra.mxu0 %v4194_v62  ;;  %2910 = vmatpush.msra.mxu2 %v4195_v2  ;;  %v4240_v62 = vld [vmem:[#allocation6 + $0x978] sm:$0xff]  ;;  %v4241_v2 = vld [vmem:[#allocation6 + $0x968] sm:$0xff] }
 0x7ff   : > { %2888 = vmatpush.msra.mxu1 %v4196_v19  ;;  %v4242_v19 = vld [vmem:[#allocation6 + $0x958] sm:$0xff] }
 0x800   : > { %2860 = vmatpush.msra.mxu0 %v4197_v20  ;;  %2911 = vmatpush.msra.mxu2 %v4198_v5  ;;  %v4243_v20 = vld [vmem:[#allocation6 + $0x948] sm:$0xff]  ;;  %v4244_v5 = vld [vmem:[#allocation6 + $0x938] sm:$0xff] }
 0x801   : > { %2889 = vmatpush.msra.mxu1 %v4199_v6 }
 0x802   : > { %2861 = vmatpush.msra.mxu0 %v4200_v9  ;;  %2912 = vmatpush.msra.mxu2 %v4201_v41 }
 0x803   : > { %2890 = vmatpush.msra.mxu1 %v4202_v10  ;;  %v4245_v10 = vld [vmem:[#allocation6 + $0x928] sm:$0xff] }
 0x804   : > { %2862 = vmatpush.msra.mxu0 %v4203_v13  ;;  %2913 = vmatpush.msra.mxu2 %v4204_v14  ;;  %v4246_v14 = vld [vmem:[#allocation6 + $0x918] sm:$0xff] }
 0x805   : > { %2891 = vmatpush.msra.mxu1 %v4205_v15  ;;  %v5192_v15 = vld [vmem:[#allocation9 + $0x10] sm:$0xf] }
 0x806   : > { %2863 = vmatpush.msra.mxu0 %v4206_v16  ;;  %2914 = vmatpush.msra.mxu2 %v4207_v17  ;;  %v4247_v16 = vld [vmem:[#allocation6 + $0x908] sm:$0xff]  ;;  %v4248_v17 = vld [vmem:[#allocation6 + $0xbf0] sm:$0xff] }
 0x807   : > { %2892 = vmatpush.msra.mxu1 %v4208_v18  ;;  %v4249_v18 = vld [vmem:[#allocation6 + $0xaf8] sm:$0xff] }
 0x808   : > { %2864 = vmatpush.msra.mxu0 %v4209_v22  ;;  %2915 = vmatpush.msra.mxu2 %v4210_v23  ;;  %v4250_v22 = vld [vmem:[#allocation6 + $0xbe0] sm:$0xff]  ;;  %v4251_v23 = vld [vmem:[#allocation6 + $0xae8] sm:$0xff] }
 0x809   : > { %2893 = vmatmul.f32.vlgmr.msra.gmra.mxu1 %v5109_v36  ;;  %2916 = vmatmul.f32.vlgmr.msra.gmra.mxu2 %v5105_v33 }
 0x80a   : > { %2999 = vmatpush.msrb.mxu2 %v4211_v8  ;;  %2865 = vmatpush.msra.mxu0 %v4212_v24  ;;  %v4252_v8 = vld [vmem:[#allocation6 + $0xbd0] sm:$0xff]  ;;  %v4253_v24 = vld [vmem:[#allocation6 + $0xad8] sm:$0xff] }
 0x80c   : > { %3000 = vmatpush.msrb.mxu2 %v4213_v25  ;;  %2866 = vmatpush.msra.mxu0 %v4214_v27  ;;  %v4254_v25 = vld [vmem:[#allocation6 + $0xbc0] sm:$0xff]  ;;  %v4255_v27 = vld [vmem:[#allocation6 + $0xac8] sm:$0xff] }
 0x80e   : > { %3001 = vmatpush.msrb.mxu2 %v4215_v3  ;;  %2867 = vmatpush.msra.mxu0 %v4216_v31  ;;  %v4256_v3 = vld [vmem:[#allocation6 + $0xbb0] sm:$0xff]  ;;  %v4257_v31 = vld [vmem:[#allocation6 + $0xab8] sm:$0xff] }
 0x810   : > { %3002 = vmatpush.msrb.mxu2 %v4217_v32  ;;  %2868 = vmatpush.msra.mxu0 %v4218_v7  ;;  %v4258_v32 = vld [vmem:[#allocation6 + $0xba0] sm:$0xff]  ;;  %v4259_v7 = vld [vmem:[#allocation6 + $0xaa8] sm:$0xff] }
 0x811   : > { %2896 = vmatmul.f32.gmra.mxu1 %v5121_v42  ;;  %2919 = vmatmul.f32.gmra.mxu2 %v5116_v38 }
 0x812   : > { %3003 = vmatpush.msrb.mxu2 %v4219_v35  ;;  %2869 = vmatpush.msra.mxu0 %v4220_v59  ;;  %v4260_v35 = vld [vmem:[#allocation6 + $0xb90] sm:$0xff]  ;;  %v4261_v59 = vld [vmem:[#allocation6 + $0xa98] sm:$0xff] }
 0x813   : > { %2870 = vmatmul.f32.vlgmr.msra.gmra.mxu0 %v5105_v33 }
 0x814   : > { %3004 = vmatpush.msrb.mxu2 %v4221_v37  ;;  %v4262_v37 = vld [vmem:[#allocation6 + $0xb80] sm:$0xff] }
 0x816   : > { %3005 = vmatpush.msrb.mxu2 %v4222_v39  ;;  %v4263_v39 = vld [vmem:[#allocation6 + $0xa88] sm:$0xff] }
 0x818   : > { %3006 = vmatpush.msrb.mxu2 %v4223_v40  ;;  %v4264_v40 = vld [vmem:[#allocation6 + $0xb70] sm:$0xff] }
 0x81a   : > { %3007 = vmatpush.msrb.mxu2 %v4224_v43  ;;  %v4265_v43 = vld [vmem:[#allocation6 + $0xa78] sm:$0xff] }
 0x81b   : > { %2873 = vmatmul.f32.gmra.mxu0 %v5116_v38 }
 0x81c   : > { %3008 = vmatpush.msrb.mxu2 %v4225_v60  ;;  %v4266_v60 = vld [vmem:[#allocation6 + $0xb60] sm:$0xff] }
 0x81e   : > { %3009 = vmatpush.msrb.mxu2 %v4226_v44  ;;  %v4267_v44 = vld [vmem:[#allocation6 + $0xa68] sm:$0xff] }
 0x820   : > { %3010 = vmatpush.msrb.mxu2 %v4227_v45  ;;  %v4268_v45 = vld [vmem:[#allocation6 + $0xb50] sm:$0xff] }
 0x822   : > { %3011 = vmatpush.msrb.mxu2 %v4228_v4  ;;  %v4269_v4 = vld [vmem:[#allocation6 + $0xa58] sm:$0xff] }
 0x824   : > { %3012 = vmatpush.msrb.mxu2 %v4229_v47  ;;  %v4270_v47 = vld [vmem:[#allocation6 + $0xb40] sm:$0xff] }
 0x826   : > { %3013 = vmatpush.msrb.mxu2 %v4230_v48  ;;  %v4271_v48 = vld [vmem:[#allocation6 + $0xa48] sm:$0xff] }
 0x828   : > { %3014 = vmatpush.msrb.mxu2 %v4231_v29  ;;  %v4272_v29 = vld [vmem:[#allocation6 + $0xb30] sm:$0xff] }
 0x829   : > { %3015 = vmatmul.f32.vlgmr.msrb.gmra.mxu2 %v5105_v33 }
 0x831   : > { %3018 = vmatmul.f32.gmra.mxu2 %v5116_v38 }
 0x844   : > { %v2704_v21 = vpop.f32.mrf.mxu1 }
 0x845   : > { %v5183_v52 = vadd.f32 %v2704_v21, %v5159_v50  ;;  %v4232_v50 = vld [vmem:[#allocation6 + $0x9f8] sm:$0xff] }
 0x846   : > { %v4273_v21 = vld [vmem:[#allocation6 + $0xa38] sm:$0xff] }
 0x84f   : > { %v2684_v34 = vpop.f32.mrf.mxu0 }
 0x850   : > { %v2707_v61 = vadd.f32 %v2684_v34, %v5157_v46  ;;  %v4234_v46 = vld [vmem:[#allocation6 + $0x9d8] sm:$0xff]  ;;  %v4274_v34 = vld [vmem:[#allocation6 + $0xb20] sm:$0xff] }
 0x865   : > { %v2795_v51 = vpop.f32.mrf.mxu1 }
 0x86b   : > { %v2829_v12 = vpop.f32.mrf.mxu2 }
 0x86c   : > { %v5186_v30 = vadd.f32 %v2829_v12, %v2707_v61  ;;  %v4275_v61 = vld [vmem:[#allocation6 + $0xa28] sm:$0xff]  ;;  %v4276_v12 = vld [vmem:[#allocation6 + $0xb10] sm:$0xff] }
 0x86d   : > { %v2798_v0 = vpop.f32.mrf.mxu1 }
 0x870   : > { %v2772_v63 = vpop.f32.mrf.mxu0 }
 0x871   : > { %v2796_v28 = vadd.f32 %v2795_v51, %v2772_v63  ;;  %v4277_v51 = vld [vmem:[#allocation6 + $0xa18] sm:$0xff]  ;;  %v4278_v63 = vld [vmem:[#allocation6 + $0xb00] sm:$0xff] }
 0x878   : > { %v2775_v1 = vpop.f32.mrf.mxu0 }
 0x879   : > { %v2799_v26 = vadd.f32 %v2798_v0, %v2775_v1  ;;  %v4279_v0 = vld [vmem:[#allocation6 + $0xa08] sm:$0xff]  ;;  %v4280_v1 = vld [vmem:[#allocation6 + $0xcf0] sm:$0xff] }
 0x87b   : > { %3799 = vmatpush.msk.msrb.mxu3 %vm681_vm0, %v2799_v26  ;;  %v4281_v26 = vld [vmem:[#allocation6 + $0xce0] sm:$0xff] }
 0x87d   : > { %2847 = vmatpush.msrb.mxu3 %v2796_v28  ;;  %v4282_v28 = vld [vmem:[#allocation6 + $0xcd0] sm:$0xff] }
 0x87e   : > { %3800 = vmatmul.msk.f32.vlgmr.msrb.gmra.mxu3 %vm2465_vm2, %v5166_v49 }
 0x87f   : > { %2923 = vmatpush.msra.mxu3 %v4232_v50  ;;  %v4283_v50 = vld [vmem:[#allocation6 + $0xcc0] sm:$0xff] }
 0x881   : > { %2924 = vmatpush.msra.mxu3 %v4233_v53  ;;  %v4284_v53 = vld [vmem:[#allocation6 + $0xcb0] sm:$0xff] }
 0x883   : > { %2925 = vmatpush.msra.mxu3 %v4234_v46  ;;  %v4285_v46 = vld [vmem:[#allocation6 + $0xca0] sm:$0xff] }
 0x885   : > { %2926 = vmatpush.msra.mxu3 %v4235_v54  ;;  %v4286_v54 = vld [vmem:[#allocation6 + $0xc90] sm:$0xff] }
 0x886   : > { %v2894_v58 = vpop.f32.mrf.mxu1 }
 0x887   : > { %2927 = vmatpush.msra.mxu3 %v4236_v55  ;;  %v4287_v55 = vld [vmem:[#allocation6 + $0xc80] sm:$0xff] }
 0x889   : > { %2928 = vmatpush.msra.mxu3 %v4237_v11  ;;  %v4288_v11 = vld [vmem:[#allocation6 + $0xc70] sm:$0xff] }
 0x88b   : > { %2929 = vmatpush.msra.mxu3 %v4238_v56  ;;  %v4289_v56 = vld [vmem:[#allocation6 + $0xc60] sm:$0xff] }
 0x88d   : > { %2930 = vmatpush.msra.mxu3 %v4239_v57  ;;  %v4290_v57 = vld [vmem:[#allocation6 + $0xc50] sm:$0xff] }
 0x88e   : > { %v2897_v6 = vpop.f32.mrf.mxu1 }
 0x88f   : > { %2931 = vmatpush.msra.mxu3 %v4240_v62  ;;  %v4292_v62 = vld [vmem:[#allocation6 + $0xc30] sm:$0xff] }
 0x890   : > { %v2871_v49 = vpop.f32.mrf.mxu0 }
 0x891   : > { %2932 = vmatpush.msra.mxu3 %v4241_v2  ;;  %v2895_v13 = vadd.f32 %v2894_v58, %v2871_v49  ;;  %v4291_v58 = vld [vmem:[#allocation6 + $0xc40] sm:$0xff]  ;;  %v4294_v2 = vld [vmem:[#allocation6 + $0xc10] sm:$0xff] }
 0x892   : > { %v4293_v49 = vld [vmem:[#allocation6 + $0xc20] sm:$0xff] }
 0x893   : > { %2933 = vmatpush.msra.mxu3 %v4242_v19  ;;  %v4295_v19 = vld [vmem:[#allocation6 + $0xc00] sm:$0xff] }
 0x895   : > { %2934 = vmatpush.msra.mxu3 %v4243_v20 }
 0x897   : > { %2935 = vmatpush.msra.mxu3 %v4244_v5 }
 0x898   : > { %v2874_v9 = vpop.f32.mrf.mxu0 }
 0x899   : > { %v2898_v41 = vadd.f32 %v2897_v6, %v2874_v9  ;;  %2936 = vmatpush.msra.mxu3 %v4245_v10 }
 0x89b   : > { %2937 = vmatpush.msra.mxu3 %v4246_v14  ;;  %3801 = vmatpush.msk.msrb.mxu0 %vm681_vm0, %v2898_v41  ;;  %v2917_v41 = vpop.f32.mrf.mxu2 }
 0x89d   : > { %2938 = vmatpush.msra.mxu3 %v4247_v16  ;;  %2972 = vmatpush.msrb.mxu0 %v2895_v13 }
 0x89e   : > { %2939 = vmatmul.f32.vlgmr.msra.gmra.mxu3 %v5109_v36  ;;  %3802 = vmatmul.msk.f32.vlgmr.msrb.gmra.mxu0 %vm2465_vm2, %v5192_v15 }
 0x89f   : > { %3022 = vmatpush.msrb.mxu3 %v4248_v17  ;;  %3045 = vmatpush.msra.mxu0 %v4249_v18  ;;  %v4296_v18 = vld [vmem:[#allocation6 + $0xbf8] sm:$0xff] }
 0x8a1   : > { %3023 = vmatpush.msrb.mxu3 %v4250_v22  ;;  %3046 = vmatpush.msra.mxu0 %v4251_v23  ;;  %v4298_v22 = vld [vmem:[#allocation6 + $0xbd8] sm:$0xff] }
 0x8a2   : > { %v4300_v23 = vld [vmem:[#allocation6 + $0xbb8] sm:$0xff] }
 0x8a3   : > { %3024 = vmatpush.msrb.mxu3 %v4252_v8  ;;  %3047 = vmatpush.msra.mxu0 %v4253_v24  ;;  %v2920_v13 = vpop.f32.mrf.mxu2  ;;  %v4301_v8 = vld [vmem:[#allocation6 + $0xba8] sm:$0xff]  ;;  %v4302_v24 = vld [vmem:[#allocation6 + $0xb98] sm:$0xff] }
 0x8a5   : > { %3025 = vmatpush.msrb.mxu3 %v4254_v25  ;;  %3048 = vmatpush.msra.mxu0 %v4255_v27  ;;  %v4303_v25 = vld [vmem:[#allocation6 + $0xb88] sm:$0xff] }
 0x8a6   : > { %2942 = vmatmul.f32.gmra.mxu3 %v5121_v42 }
 0x8a7   : > { %3026 = vmatpush.msrb.mxu3 %v4256_v3  ;;  %3049 = vmatpush.msra.mxu0 %v4257_v31  ;;  %v4304_v3 = vld [vmem:[#allocation6 + $0xb78] sm:$0xff]  ;;  %v4305_v31 = vld [vmem:[#allocation6 + $0xb68] sm:$0xff] }
 0x8a9   : > { %3027 = vmatpush.msrb.mxu3 %v4258_v32  ;;  %3050 = vmatpush.msra.mxu0 %v4259_v7  ;;  %v4306_v32 = vld [vmem:[#allocation6 + $0xb58] sm:$0xff]  ;;  %v4307_v7 = vld [vmem:[#allocation6 + $0xb48] sm:$0xff] }
 0x8ab   : > { %3028 = vmatpush.msrb.mxu3 %v4260_v35  ;;  %3051 = vmatpush.msra.mxu0 %v4261_v59  ;;  %v4308_v35 = vld [vmem:[#allocation6 + $0xb38] sm:$0xff] }
 0x8ac   : > { %v3016_v27 = vpop.f32.mrf.mxu2 }
 0x8ad   : > { %3029 = vmatpush.msrb.mxu3 %v4262_v37  ;;  %3052 = vmatpush.msra.mxu0 %v4263_v39 }
 0x8af   : > { %3030 = vmatpush.msrb.mxu3 %v4264_v40  ;;  %3053 = vmatpush.msra.mxu0 %v4265_v43  ;;  %v4309_v40 = vld [vmem:[#allocation6 + $0xb28] sm:$0xff] }
 0x8b1   : > { %3031 = vmatpush.msrb.mxu3 %v4266_v60  ;;  %3054 = vmatpush.msra.mxu0 %v4267_v44  ;;  %v4310_v60 = vld [vmem:[#allocation6 + $0xb18] sm:$0xff] }
 0x8b2   : > { %v5214_v44 = vld [vmem:[#allocation9 + $0x14] sm:$0xf] }
 0x8b3   : > { %3032 = vmatpush.msrb.mxu3 %v4268_v45  ;;  %3055 = vmatpush.msra.mxu0 %v4269_v4  ;;  %v4311_v45 = vld [vmem:[#allocation6 + $0xb08] sm:$0xff]  ;;  %v4312_v4 = vld [vmem:[#allocation6 + $0xdf0] sm:$0xff] }
 0x8b4   : > { %v3019_v59 = vpop.f32.mrf.mxu2 }
 0x8b5   : > { %3033 = vmatpush.msrb.mxu3 %v4270_v47  ;;  %3056 = vmatpush.msra.mxu0 %v4271_v48  ;;  %v4313_v47 = vld [vmem:[#allocation6 + $0xcf8] sm:$0xff]  ;;  %v4314_v48 = vld [vmem:[#allocation6 + $0xde0] sm:$0xff] }
 0x8b7   : > { %3034 = vmatpush.msrb.mxu3 %v4272_v29  ;;  %3057 = vmatpush.msra.mxu0 %v4273_v21  ;;  %v4315_v29 = vld [vmem:[#allocation6 + $0xce8] sm:$0xff]  ;;  %v4316_v21 = vld [vmem:[#allocation6 + $0xdd0] sm:$0xff] }
 0x8b9   : > { %3035 = vmatpush.msrb.mxu3 %v4274_v34  ;;  %3058 = vmatpush.msra.mxu0 %v4275_v61  ;;  %v4317_v34 = vld [vmem:[#allocation6 + $0xcd8] sm:$0xff]  ;;  %v4318_v61 = vld [vmem:[#allocation6 + $0xdc0] sm:$0xff] }
 0x8bb   : > { %3036 = vmatpush.msrb.mxu3 %v4276_v12  ;;  %3059 = vmatpush.msra.mxu0 %v4277_v51  ;;  %v4319_v12 = vld [vmem:[#allocation6 + $0xcc8] sm:$0xff]  ;;  %v4320_v51 = vld [vmem:[#allocation6 + $0xdb0] sm:$0xff] }
 0x8bd   : > { %3037 = vmatpush.msrb.mxu3 %v4278_v63  ;;  %3060 = vmatpush.msra.mxu0 %v4279_v0  ;;  %v4321_v63 = vld [vmem:[#allocation6 + $0xcb8] sm:$0xff]  ;;  %v4322_v0 = vld [vmem:[#allocation6 + $0xda0] sm:$0xff] }
 0x8be   : > { %3038 = vmatmul.f32.vlgmr.msrb.gmra.mxu3 %v5109_v36  ;;  %3061 = vmatmul.f32.vlgmr.msra.gmra.mxu0 %v5105_v33 }
 0x8bf   : > { %3144 = vmatpush.msrb.mxu0 %v4280_v1  ;;  %v4323_v1 = vld [vmem:[#allocation6 + $0xca8] sm:$0xff] }
 0x8c1   : > { %3145 = vmatpush.msrb.mxu0 %v4281_v26  ;;  %v4324_v26 = vld [vmem:[#allocation6 + $0xd90] sm:$0xff] }
 0x8c3   : > { %3146 = vmatpush.msrb.mxu0 %v4282_v28  ;;  %v4325_v28 = vld [vmem:[#allocation6 + $0xc98] sm:$0xff] }
 0x8c5   : > { %3147 = vmatpush.msrb.mxu0 %v4283_v50  ;;  %v4326_v50 = vld [vmem:[#allocation6 + $0xd80] sm:$0xff] }
 0x8c6   : > { %3041 = vmatmul.f32.gmra.mxu3 %v5121_v42  ;;  %3064 = vmatmul.f32.gmra.mxu0 %v5116_v38 }
 0x8c7   : > { %3148 = vmatpush.msrb.mxu0 %v4284_v53  ;;  %v4327_v53 = vld [vmem:[#allocation6 + $0xc88] sm:$0xff] }
 0x8c9   : > { %3149 = vmatpush.msrb.mxu0 %v4285_v46  ;;  %v4328_v46 = vld [vmem:[#allocation6 + $0xd70] sm:$0xff] }
 0x8cb   : > { %3150 = vmatpush.msrb.mxu0 %v4286_v54  ;;  %v4329_v54 = vld [vmem:[#allocation6 + $0xc78] sm:$0xff] }
 0x8cd   : > { %3151 = vmatpush.msrb.mxu0 %v4287_v55  ;;  %v4330_v55 = vld [vmem:[#allocation6 + $0xd60] sm:$0xff] }
 0x8cf   : > { %3152 = vmatpush.msrb.mxu0 %v4288_v11  ;;  %v4331_v11 = vld [vmem:[#allocation6 + $0xc68] sm:$0xff] }
 0x8d1   : > { %3153 = vmatpush.msrb.mxu0 %v4289_v56  ;;  %v4332_v56 = vld [vmem:[#allocation6 + $0xd50] sm:$0xff] }
 0x8d3   : > { %3154 = vmatpush.msrb.mxu0 %v4290_v57  ;;  %v4333_v57 = vld [vmem:[#allocation6 + $0xc58] sm:$0xff] }
 0x8d5   : > { %3155 = vmatpush.msrb.mxu0 %v4291_v58  ;;  %v4334_v58 = vld [vmem:[#allocation6 + $0xd40] sm:$0xff] }
 0x8d7   : > { %3156 = vmatpush.msrb.mxu0 %v4292_v62  ;;  %v4335_v62 = vld [vmem:[#allocation6 + $0xc48] sm:$0xff] }
 0x8d9   : > { %3157 = vmatpush.msrb.mxu0 %v4293_v49  ;;  %v4336_v49 = vld [vmem:[#allocation6 + $0xd30] sm:$0xff] }
 0x8db   : > { %3158 = vmatpush.msrb.mxu0 %v4294_v2  ;;  %v4337_v2 = vld [vmem:[#allocation6 + $0xc38] sm:$0xff] }
 0x8dd   : > { %3159 = vmatpush.msrb.mxu0 %v4295_v19  ;;  %v4338_v19 = vld [vmem:[#allocation6 + $0xd20] sm:$0xff] }
 0x8de   : > { %3160 = vmatmul.f32.vlgmr.msrb.gmra.mxu0 %v5105_v33 }
 0x8e6   : > { %3163 = vmatmul.f32.gmra.mxu0 %v5116_v38 }
 0x901   : > { %v2849_v20 = vpop.f32.mrf.mxu3 }
 0x902   : > { %v5205_v5 = vadd.f32 %v2849_v20, %v5183_v52  ;;  %v4297_v52 = vld [vmem:[#allocation6 + $0xbe8] sm:$0xff] }
 0x903   : > { %v4339_v20 = vld [vmem:[#allocation6 + $0xc28] sm:$0xff] }
 0x91b   : > { %v2974_v6 = vpop.f32.mrf.mxu0 }
 0x91c   : > { %v5208_v9 = vadd.f32 %v2974_v6, %v5186_v30  ;;  %v4299_v30 = vld [vmem:[#allocation6 + $0xbc8] sm:$0xff]  ;;  %v4340_v6 = vld [vmem:[#allocation6 + $0xd10] sm:$0xff] }
 0x921   : > { %v2940_v10 = vpop.f32.mrf.mxu3 }
 0x922   : > { %v2941_v17 = vadd.f32 %v2940_v10, %v2917_v41  ;;  %v4341_v41 = vld [vmem:[#allocation6 + $0xc18] sm:$0xff]  ;;  %v4342_v10 = vld [vmem:[#allocation6 + $0xd00] sm:$0xff] }
 0x929   : > { %v2943_v14 = vpop.f32.mrf.mxu3 }
 0x92a   : > { %v2944_v16 = vadd.f32 %v2943_v14, %v2920_v13  ;;  %v4343_v13 = vld [vmem:[#allocation6 + $0xc08] sm:$0xff]  ;;  %v4344_v14 = vld [vmem:[#allocation6 + $0xef0] sm:$0xff] }
 0x92c   : > { %3803 = vmatpush.msk.msrb.mxu1 %vm681_vm0, %v2944_v16  ;;  %v4345_v16 = vld [vmem:[#allocation6 + $0xee0] sm:$0xff] }
 0x92e   : > { %2992 = vmatpush.msrb.mxu1 %v2941_v17  ;;  %v4346_v17 = vld [vmem:[#allocation6 + $0xed0] sm:$0xff] }
 0x92f   : > { %3804 = vmatmul.msk.f32.vlgmr.msrb.gmra.mxu1 %vm2465_vm2, %v5192_v15 }
 0x930   : > { %3068 = vmatpush.msra.mxu1 %v4296_v18  ;;  %v4347_v18 = vld [vmem:[#allocation6 + $0xec0] sm:$0xff] }
 0x932   : > { %3069 = vmatpush.msra.mxu1 %v4297_v52  ;;  %v4348_v52 = vld [vmem:[#allocation6 + $0xeb0] sm:$0xff] }
 0x934   : > { %3070 = vmatpush.msra.mxu1 %v4298_v22  ;;  %v4349_v22 = vld [vmem:[#allocation6 + $0xea0] sm:$0xff] }
 0x936   : > { %3071 = vmatpush.msra.mxu1 %v4299_v30  ;;  %v4350_v30 = vld [vmem:[#allocation6 + $0xe90] sm:$0xff] }
 0x938   : > { %3072 = vmatpush.msra.mxu1 %v4300_v23  ;;  %v4351_v23 = vld [vmem:[#allocation6 + $0xe80] sm:$0xff] }
 0x93a   : > { %3073 = vmatpush.msra.mxu1 %v4301_v8  ;;  %v4352_v8 = vld [vmem:[#allocation6 + $0xe70] sm:$0xff] }
 0x93c   : > { %3074 = vmatpush.msra.mxu1 %v4302_v24  ;;  %v4353_v24 = vld [vmem:[#allocation6 + $0xe60] sm:$0xff] }
 0x93e   : > { %3075 = vmatpush.msra.mxu1 %v4303_v25  ;;  %v4354_v25 = vld [vmem:[#allocation6 + $0xe50] sm:$0xff] }
 0x940   : > { %3076 = vmatpush.msra.mxu1 %v4304_v3  ;;  %v4356_v3 = vld [vmem:[#allocation6 + $0xe30] sm:$0xff] }
 0x941   : > { %v3039_v15 = vpop.f32.mrf.mxu3 }
 0x942   : > { %3077 = vmatpush.msra.mxu1 %v4305_v31  ;;  %v3040_v43 = vadd.f32 %v3039_v15, %v3016_v27  ;;  %v4355_v27 = vld [vmem:[#allocation6 + $0xe40] sm:$0xff]  ;;  %v4358_v31 = vld [vmem:[#allocation6 + $0xe10] sm:$0xff] }
 0x943   : > { %v4357_v15 = vld [vmem:[#allocation6 + $0xe20] sm:$0xff] }
 0x944   : > { %3078 = vmatpush.msra.mxu1 %v4306_v32  ;;  %v4359_v32 = vld [vmem:[#allocation6 + $0xe00] sm:$0xff] }
 0x946   : > { %3079 = vmatpush.msra.mxu1 %v4307_v7 }
 0x948   : > { %3080 = vmatpush.msra.mxu1 %v4308_v35 }
 0x949   : > { %v3042_v37 = vpop.f32.mrf.mxu3 }
 0x94a   : > { %v3043_v39 = vadd.f32 %v3042_v37, %v3019_v59  ;;  %3081 = vmatpush.msra.mxu1 %v4309_v40  ;;  %v3062_v59 = vpop.f32.mrf.mxu0 }
 0x94c   : > { %3082 = vmatpush.msra.mxu1 %v4310_v60  ;;  %3805 = vmatpush.msk.msra.mxu2 %vm681_vm0, %v3043_v39 }
 0x94e   : > { %3083 = vmatpush.msra.mxu1 %v4311_v45  ;;  %3117 = vmatpush.msra.mxu2 %v3040_v43 }
 0x94f   : > { %3084 = vmatmul.f32.vlgmr.msra.gmra.mxu1 %v5109_v36  ;;  %3806 = vmatmul.msk.f32.vlgmr.msra.gmra.mxu2 %vm2465_vm2, %v5214_v44 }
 0x950   : > { %3167 = vmatpush.msrb.mxu1 %v4312_v4  ;;  %3190 = vmatpush.msrb.mxu2 %v4313_v47  ;;  %v4360_v47 = vld [vmem:[#allocation6 + $0xdf8] sm:$0xff] }
 0x952   : > { %3168 = vmatpush.msrb.mxu1 %v4314_v48  ;;  %3191 = vmatpush.msrb.mxu2 %v4315_v29  ;;  %v3065_v43 = vpop.f32.mrf.mxu0  ;;  %v4362_v48 = vld [vmem:[#allocation6 + $0xdd8] sm:$0xff]  ;;  %v4363_v29 = vld [vmem:[#allocation6 + $0xdc8] sm:$0xff] }
 0x954   : > { %3169 = vmatpush.msrb.mxu1 %v4316_v21  ;;  %3192 = vmatpush.msrb.mxu2 %v4317_v34  ;;  %v4365_v21 = vld [vmem:[#allocation6 + $0xda8] sm:$0xff]  ;;  %v4366_v34 = vld [vmem:[#allocation6 + $0xd98] sm:$0xff] }
 0x956   : > { %3170 = vmatpush.msrb.mxu1 %v4318_v61  ;;  %3193 = vmatpush.msrb.mxu2 %v4319_v12  ;;  %v4367_v61 = vld [vmem:[#allocation6 + $0xd88] sm:$0xff] }
 0x957   : > { %3087 = vmatmul.f32.gmra.mxu1 %v5121_v42 }
 0x958   : > { %3171 = vmatpush.msrb.mxu1 %v4320_v51  ;;  %3194 = vmatpush.msrb.mxu2 %v4321_v63  ;;  %v4368_v51 = vld [vmem:[#allocation6 + $0xd78] sm:$0xff]  ;;  %v4369_v63 = vld [vmem:[#allocation6 + $0xd68] sm:$0xff] }
 0x95a   : > { %3172 = vmatpush.msrb.mxu1 %v4322_v0  ;;  %3195 = vmatpush.msrb.mxu2 %v4323_v1  ;;  %v4370_v0 = vld [vmem:[#allocation6 + $0xd58] sm:$0xff]  ;;  %v4371_v1 = vld [vmem:[#allocation6 + $0xd48] sm:$0xff] }
 0x95b   : > { %v3161_v12 = vpop.f32.mrf.mxu0 }
 0x95c   : > { %3173 = vmatpush.msrb.mxu1 %v4324_v26  ;;  %3196 = vmatpush.msrb.mxu2 %v4325_v28  ;;  %v4372_v26 = vld [vmem:[#allocation6 + $0xd38] sm:$0xff] }
 0x95e   : > { %3174 = vmatpush.msrb.mxu1 %v4326_v50  ;;  %3197 = vmatpush.msrb.mxu2 %v4327_v53 }
 0x960   : > { %3175 = vmatpush.msrb.mxu1 %v4328_v46  ;;  %3198 = vmatpush.msrb.mxu2 %v4329_v54  ;;  %v4373_v46 = vld [vmem:[#allocation6 + $0xd28] sm:$0xff] }
 0x962   : > { %3176 = vmatpush.msrb.mxu1 %v4330_v55  ;;  %3199 = vmatpush.msrb.mxu2 %v4331_v11  ;;  %v4374_v55 = vld [vmem:[#allocation6 + $0xd18] sm:$0xff] }
 0x963   : > { %v3164_v28 = vpop.f32.mrf.mxu0  ;;  %v5236_v11 = vld [vmem:[#allocation9 + $0x18] sm:$0xf] }
 0x964   : > { %3177 = vmatpush.msrb.mxu1 %v4332_v56  ;;  %3200 = vmatpush.msrb.mxu2 %v4333_v57  ;;  %v4375_v56 = vld [vmem:[#allocation6 + $0xd08] sm:$0xff]  ;;  %v4376_v57 = vld [vmem:[#allocation6 + $0xff0] sm:$0xff] }
 0x966   : > { %3178 = vmatpush.msrb.mxu1 %v4334_v58  ;;  %3201 = vmatpush.msrb.mxu2 %v4335_v62  ;;  %v4377_v58 = vld [vmem:[#allocation6 + $0xef8] sm:$0xff]  ;;  %v4378_v62 = vld [vmem:[#allocation6 + $0xfe0] sm:$0xff] }
 0x968   : > { %3179 = vmatpush.msrb.mxu1 %v4336_v49  ;;  %3202 = vmatpush.msrb.mxu2 %v4337_v2  ;;  %v4379_v49 = vld [vmem:[#allocation6 + $0xee8] sm:$0xff]  ;;  %v4380_v2 = vld [vmem:[#allocation6 + $0xfd0] sm:$0xff] }
 0x96a   : > { %3180 = vmatpush.msrb.mxu1 %v4338_v19  ;;  %3203 = vmatpush.msrb.mxu2 %v4339_v20  ;;  %v4381_v19 = vld [vmem:[#allocation6 + $0xed8] sm:$0xff]  ;;  %v4382_v20 = vld [vmem:[#allocation6 + $0xfc0] sm:$0xff] }
 0x96c   : > { %3181 = vmatpush.msrb.mxu1 %v4340_v6  ;;  %3204 = vmatpush.msrb.mxu2 %v4341_v41  ;;  %v4383_v6 = vld [vmem:[#allocation6 + $0xec8] sm:$0xff]  ;;  %v4384_v41 = vld [vmem:[#allocation6 + $0xfb0] sm:$0xff] }
 0x96e   : > { %3182 = vmatpush.msrb.mxu1 %v4342_v10  ;;  %3205 = vmatpush.msrb.mxu2 %v4343_v13  ;;  %v4385_v10 = vld [vmem:[#allocation6 + $0xeb8] sm:$0xff]  ;;  %v4386_v13 = vld [vmem:[#allocation6 + $0xfa0] sm:$0xff] }
 0x96f   : > { %3183 = vmatmul.f32.vlgmr.msrb.gmra.mxu1 %v5109_v36  ;;  %3206 = vmatmul.f32.vlgmr.msrb.gmra.mxu2 %v5105_v33 }
 0x970   : > { %3289 = vmatpush.msra.mxu2 %v4344_v14  ;;  %v4387_v14 = vld [vmem:[#allocation6 + $0xea8] sm:$0xff] }
 0x972   : > { %3290 = vmatpush.msra.mxu2 %v4345_v16  ;;  %v4388_v16 = vld [vmem:[#allocation6 + $0xf90] sm:$0xff] }
 0x974   : > { %3291 = vmatpush.msra.mxu2 %v4346_v17  ;;  %v4389_v17 = vld [vmem:[#allocation6 + $0xe98] sm:$0xff] }
 0x976   : > { %3292 = vmatpush.msra.mxu2 %v4347_v18  ;;  %v4390_v18 = vld [vmem:[#allocation6 + $0xf80] sm:$0xff] }
 0x977   : > { %3186 = vmatmul.f32.gmra.mxu1 %v5121_v42  ;;  %3209 = vmatmul.f32.gmra.mxu2 %v5116_v38 }
 0x978   : > { %3293 = vmatpush.msra.mxu2 %v4348_v52  ;;  %v4391_v52 = vld [vmem:[#allocation6 + $0xe88] sm:$0xff] }
 0x97a   : > { %3294 = vmatpush.msra.mxu2 %v4349_v22  ;;  %v4392_v22 = vld [vmem:[#allocation6 + $0xf70] sm:$0xff] }
 0x97c   : > { %3295 = vmatpush.msra.mxu2 %v4350_v30  ;;  %v4393_v30 = vld [vmem:[#allocation6 + $0xe78] sm:$0xff] }
 0x97e   : > { %3296 = vmatpush.msra.mxu2 %v4351_v23  ;;  %v4394_v23 = vld [vmem:[#allocation6 + $0xf60] sm:$0xff] }
 0x980   : > { %3297 = vmatpush.msra.mxu2 %v4352_v8  ;;  %v4395_v8 = vld [vmem:[#allocation6 + $0xe68] sm:$0xff] }
 0x982   : > { %3298 = vmatpush.msra.mxu2 %v4353_v24  ;;  %v4396_v24 = vld [vmem:[#allocation6 + $0xf50] sm:$0xff] }
 0x984   : > { %3299 = vmatpush.msra.mxu2 %v4354_v25  ;;  %v4397_v25 = vld [vmem:[#allocation6 + $0xe58] sm:$0xff] }
 0x986   : > { %3300 = vmatpush.msra.mxu2 %v4355_v27  ;;  %v4398_v27 = vld [vmem:[#allocation6 + $0xf40] sm:$0xff] }
 0x988   : > { %3301 = vmatpush.msra.mxu2 %v4356_v3  ;;  %v4399_v3 = vld [vmem:[#allocation6 + $0xe48] sm:$0xff] }
 0x98a   : > { %3302 = vmatpush.msra.mxu2 %v4357_v15  ;;  %v4400_v15 = vld [vmem:[#allocation6 + $0xf30] sm:$0xff] }
 0x98c   : > { %3303 = vmatpush.msra.mxu2 %v4358_v31  ;;  %v4401_v31 = vld [vmem:[#allocation6 + $0xe38] sm:$0xff] }
 0x98e   : > { %3304 = vmatpush.msra.mxu2 %v4359_v32  ;;  %v4402_v32 = vld [vmem:[#allocation6 + $0xf20] sm:$0xff] }
 0x98f   : > { %3305 = vmatmul.f32.vlgmr.msra.gmra.mxu2 %v5105_v33 }
 0x997   : > { %3308 = vmatmul.f32.gmra.mxu2 %v5116_v38 }
 0x9ac   : > { %v2994_v7 = vpop.f32.mrf.mxu1 }
 0x9ad   : > { %v5227_v35 = vadd.f32 %v2994_v7, %v5205_v5  ;;  %v4361_v5 = vld [vmem:[#allocation6 + $0xde8] sm:$0xff] }
 0x9ae   : > { %v4403_v7 = vld [vmem:[#allocation6 + $0xe28] sm:$0xff] }
 0x9cc   : > { %v3085_v37 = vpop.f32.mrf.mxu1 }
 0x9cd   : > { %v3086_v4 = vadd.f32 %v3085_v37, %v3062_v59  ;;  %v4404_v59 = vld [vmem:[#allocation6 + $0xf10] sm:$0xff]  ;;  %v4405_v37 = vld [vmem:[#allocation6 + $0xe18] sm:$0xff] }
 0x9d2   : > { %v3119_v39 = vpop.f32.mrf.mxu2 }
 0x9d3   : > { %v5230_v40 = vadd.f32 %v3119_v39, %v5208_v9  ;;  %v4364_v9 = vld [vmem:[#allocation6 + $0xdb8] sm:$0xff]  ;;  %v4406_v39 = vld [vmem:[#allocation6 + $0xf00] sm:$0xff] }
 0x9d4   : > { %v3088_v60 = vpop.f32.mrf.mxu1 }
 0x9d5   : > { %v3089_v45 = vadd.f32 %v3088_v60, %v3065_v43  ;;  %v4407_v43 = vld [vmem:[#allocation6 + $0xe08] sm:$0xff]  ;;  %v4408_v60 = vld [vmem:[#allocation6 + $0x10f0] sm:$0xff] }
 0x9d7   : > { %3807 = vmatpush.msk.msra.mxu3 %vm681_vm0, %v3089_v45  ;;  %v4409_v45 = vld [vmem:[#allocation6 + $0x10e0] sm:$0xff] }
 0x9d9   : > { %3137 = vmatpush.msra.mxu3 %v3086_v4  ;;  %v4410_v4 = vld [vmem:[#allocation6 + $0x10d0] sm:$0xff] }
 0x9da   : > { %3808 = vmatmul.msk.f32.vlgmr.msra.gmra.mxu3 %vm2465_vm2, %v5214_v44 }
 0x9db   : > { %3213 = vmatpush.msrb.mxu3 %v4360_v47  ;;  %v4411_v47 = vld [vmem:[#allocation6 + $0x10c0] sm:$0xff] }
 0x9dd   : > { %3214 = vmatpush.msrb.mxu3 %v4361_v5  ;;  %v4412_v5 = vld [vmem:[#allocation6 + $0x10b0] sm:$0xff] }
 0x9df   : > { %3215 = vmatpush.msrb.mxu3 %v4362_v48  ;;  %v4413_v48 = vld [vmem:[#allocation6 + $0x10a0] sm:$0xff] }
 0x9e1   : > { %3216 = vmatpush.msrb.mxu3 %v4363_v29  ;;  %v4414_v29 = vld [vmem:[#allocation6 + $0x1090] sm:$0xff] }
 0x9e3   : > { %3217 = vmatpush.msrb.mxu3 %v4364_v9  ;;  %v4415_v9 = vld [vmem:[#allocation6 + $0x1080] sm:$0xff] }
 0x9e5   : > { %3218 = vmatpush.msrb.mxu3 %v4365_v21  ;;  %v4416_v21 = vld [vmem:[#allocation6 + $0x1070] sm:$0xff] }
 0x9e7   : > { %3219 = vmatpush.msrb.mxu3 %v4366_v34  ;;  %v4417_v34 = vld [vmem:[#allocation6 + $0x1060] sm:$0xff] }
 0x9e9   : > { %3220 = vmatpush.msrb.mxu3 %v4367_v61  ;;  %v4418_v61 = vld [vmem:[#allocation6 + $0x1050] sm:$0xff] }
 0x9eb   : > { %3221 = vmatpush.msrb.mxu3 %v4368_v51  ;;  %v4420_v51 = vld [vmem:[#allocation6 + $0x1030] sm:$0xff] }
 0x9ec   : > { %v3184_v44 = vpop.f32.mrf.mxu1 }
 0x9ed   : > { %3222 = vmatpush.msrb.mxu3 %v4369_v63  ;;  %v3185_v54 = vadd.f32 %v3184_v44, %v3161_v12  ;;  %v4419_v12 = vld [vmem:[#allocation6 + $0x1040] sm:$0xff]  ;;  %v4422_v63 = vld [vmem:[#allocation6 + $0x1010] sm:$0xff] }
 0x9ee   : > { %v4421_v44 = vld [vmem:[#allocation6 + $0x1020] sm:$0xff] }
 0x9ef   : > { %3223 = vmatpush.msrb.mxu3 %v4370_v0  ;;  %v4423_v0 = vld [vmem:[#allocation6 + $0x1000] sm:$0xff] }
 0x9f1   : > { %3224 = vmatpush.msrb.mxu3 %v4371_v1 }
 0x9f3   : > { %3225 = vmatpush.msrb.mxu3 %v4372_v26 }
 0x9f4   : > { %v3187_v50 = vpop.f32.mrf.mxu1 }
 0x9f5   : > { %v3188_v53 = vadd.f32 %v3187_v50, %v3164_v28  ;;  %3226 = vmatpush.msrb.mxu3 %v4373_v46 }
 0x9f7   : > { %3227 = vmatpush.msrb.mxu3 %v4374_v55  ;;  %3809 = vmatpush.msk.msra.mxu0 %vm681_vm0, %v3188_v53  ;;  %v3207_v53 = vpop.f32.mrf.mxu2 }
 0x9f9   : > { %3228 = vmatpush.msrb.mxu3 %v4375_v56  ;;  %3262 = vmatpush.msra.mxu0 %v3185_v54 }
 0x9fa   : > { %3229 = vmatmul.f32.vlgmr.msrb.gmra.mxu3 %v5109_v36  ;;  %3810 = vmatmul.msk.f32.vlgmr.msra.gmra.mxu0 %vm2465_vm2, %v5236_v11 }
 0x9fb   : > { %3312 = vmatpush.msra.mxu3 %v4376_v57  ;;  %3335 = vmatpush.msrb.mxu0 %v4377_v58  ;;  %v4424_v58 = vld [vmem:[#allocation6 + $0xff8] sm:$0xff] }
 0x9fd   : > { %3313 = vmatpush.msra.mxu3 %v4378_v62  ;;  %3336 = vmatpush.msrb.mxu0 %v4379_v49  ;;  %v4426_v62 = vld [vmem:[#allocation6 + $0xfd8] sm:$0xff] }
 0x9fe   : > { %v4428_v49 = vld [vmem:[#allocation6 + $0xfb8] sm:$0xff] }
 0x9ff   : > { %3314 = vmatpush.msra.mxu3 %v4380_v2  ;;  %3337 = vmatpush.msrb.mxu0 %v4381_v19  ;;  %v3210_v54 = vpop.f32.mrf.mxu2  ;;  %v4429_v2 = vld [vmem:[#allocation6 + $0xfa8] sm:$0xff]  ;;  %v4430_v19 = vld [vmem:[#allocation6 + $0xf98] sm:$0xff] }
 0xa01   : > { %3315 = vmatpush.msra.mxu3 %v4382_v20  ;;  %3338 = vmatpush.msrb.mxu0 %v4383_v6  ;;  %v4431_v20 = vld [vmem:[#allocation6 + $0xf88] sm:$0xff] }
 0xa02   : > { %3232 = vmatmul.f32.gmra.mxu3 %v5121_v42 }
 0xa03   : > { %3316 = vmatpush.msra.mxu3 %v4384_v41  ;;  %3339 = vmatpush.msrb.mxu0 %v4385_v10  ;;  %v4432_v41 = vld [vmem:[#allocation6 + $0xf78] sm:$0xff]  ;;  %v4433_v10 = vld [vmem:[#allocation6 + $0xf68] sm:$0xff] }
 0xa05   : > { %3317 = vmatpush.msra.mxu3 %v4386_v13  ;;  %3340 = vmatpush.msrb.mxu0 %v4387_v14  ;;  %v4434_v13 = vld [vmem:[#allocation6 + $0xf58] sm:$0xff]  ;;  %v4435_v14 = vld [vmem:[#allocation6 + $0xf48] sm:$0xff] }
 0xa07   : > { %3318 = vmatpush.msra.mxu3 %v4388_v16  ;;  %3341 = vmatpush.msrb.mxu0 %v4389_v17  ;;  %v4436_v16 = vld [vmem:[#allocation6 + $0xf38] sm:$0xff] }
 0xa09   : > { %3319 = vmatpush.msra.mxu3 %v4390_v18  ;;  %3342 = vmatpush.msrb.mxu0 %v4391_v52 }
 0xa0b   : > { %3320 = vmatpush.msra.mxu3 %v4392_v22  ;;  %3343 = vmatpush.msrb.mxu0 %v4393_v30  ;;  %v4437_v22 = vld [vmem:[#allocation6 + $0xf28] sm:$0xff] }
 0xa0d   : > { %3321 = vmatpush.msra.mxu3 %v4394_v23  ;;  %3344 = vmatpush.msrb.mxu0 %v4395_v8  ;;  %v4438_v23 = vld [vmem:[#allocation6 + $0xf18] sm:$0xff] }
 0xa0e   : > { %v5258_v8 = vld [vmem:[#allocation9 + $0x1c] sm:$0xf] }
 0xa0f   : > { %3322 = vmatpush.msra.mxu3 %v4396_v24  ;;  %3345 = vmatpush.msrb.mxu0 %v4397_v25  ;;  %v4439_v24 = vld [vmem:[#allocation6 + $0xf08] sm:$0xff]  ;;  %v4440_v25 = vld [vmem:[#allocation6 + $0x11f0] sm:$0xff] }
 0xa11   : > { %3323 = vmatpush.msra.mxu3 %v4398_v27  ;;  %3346 = vmatpush.msrb.mxu0 %v4399_v3  ;;  %v4441_v27 = vld [vmem:[#allocation6 + $0x10f8] sm:$0xff]  ;;  %v4442_v3 = vld [vmem:[#allocation6 + $0x11e0] sm:$0xff] }
 0xa12   : > { %v3306_v6 = vpop.f32.mrf.mxu2 }
 0xa13   : > { %3324 = vmatpush.msra.mxu3 %v4400_v15  ;;  %3347 = vmatpush.msrb.mxu0 %v4401_v31  ;;  %v4443_v15 = vld [vmem:[#allocation6 + $0x10e8] sm:$0xff]  ;;  %v4444_v31 = vld [vmem:[#allocation6 + $0x11d0] sm:$0xff] }
 0xa15   : > { %3325 = vmatpush.msra.mxu3 %v4402_v32  ;;  %3348 = vmatpush.msrb.mxu0 %v4403_v7  ;;  %v4445_v32 = vld [vmem:[#allocation6 + $0x10d8] sm:$0xff]  ;;  %v4446_v7 = vld [vmem:[#allocation6 + $0x11c0] sm:$0xff] }
 0xa17   : > { %3326 = vmatpush.msra.mxu3 %v4404_v59  ;;  %3349 = vmatpush.msrb.mxu0 %v4405_v37  ;;  %v4447_v59 = vld [vmem:[#allocation6 + $0x10c8] sm:$0xff]  ;;  %v4448_v37 = vld [vmem:[#allocation6 + $0x11b0] sm:$0xff] }
 0xa19   : > { %3327 = vmatpush.msra.mxu3 %v4406_v39  ;;  %3350 = vmatpush.msrb.mxu0 %v4407_v43  ;;  %v4449_v39 = vld [vmem:[#allocation6 + $0x10b8] sm:$0xff]  ;;  %v4450_v43 = vld [vmem:[#allocation6 + $0x11a0] sm:$0xff] }
 0xa1a   : > { %3328 = vmatmul.f32.vlgmr.msra.gmra.mxu3 %v5109_v36  ;;  %3351 = vmatmul.f32.vlgmr.msrb.gmra.mxu0 %v5105_v33  ;;  %v3309_v17 = vpop.f32.mrf.mxu2 }
 0xa1b   : > { %3434 = vmatpush.msra.mxu0 %v4408_v60  ;;  %v4451_v60 = vld [vmem:[#allocation6 + $0x10a8] sm:$0xff] }
 0xa1d   : > { %3435 = vmatpush.msra.mxu0 %v4409_v45  ;;  %v4452_v45 = vld [vmem:[#allocation6 + $0x1190] sm:$0xff] }
 0xa1f   : > { %3436 = vmatpush.msra.mxu0 %v4410_v4  ;;  %v4453_v4 = vld [vmem:[#allocation6 + $0x1098] sm:$0xff] }
 0xa21   : > { %3437 = vmatpush.msra.mxu0 %v4411_v47  ;;  %v4454_v47 = vld [vmem:[#allocation6 + $0x1180] sm:$0xff] }
 0xa22   : > { %3331 = vmatmul.f32.gmra.mxu3 %v5121_v42  ;;  %3354 = vmatmul.f32.gmra.mxu0 %v5116_v38 }
 0xa23   : > { %3438 = vmatpush.msra.mxu0 %v4412_v5  ;;  %v4455_v5 = vld [vmem:[#allocation6 + $0x1088] sm:$0xff] }
 0xa25   : > { %3439 = vmatpush.msra.mxu0 %v4413_v48  ;;  %v4456_v48 = vld [vmem:[#allocation6 + $0x1170] sm:$0xff] }
 0xa27   : > { %3440 = vmatpush.msra.mxu0 %v4414_v29  ;;  %v4457_v29 = vld [vmem:[#allocation6 + $0x1078] sm:$0xff] }
 0xa29   : > { %3441 = vmatpush.msra.mxu0 %v4415_v9  ;;  %v4458_v9 = vld [vmem:[#allocation6 + $0x1160] sm:$0xff] }
 0xa2b   : > { %3442 = vmatpush.msra.mxu0 %v4416_v21  ;;  %v4459_v21 = vld [vmem:[#allocation6 + $0x1068] sm:$0xff] }
 0xa2d   : > { %3443 = vmatpush.msra.mxu0 %v4417_v34  ;;  %v4460_v34 = vld [vmem:[#allocation6 + $0x1150] sm:$0xff] }
 0xa2f   : > { %3444 = vmatpush.msra.mxu0 %v4418_v61  ;;  %v4461_v61 = vld [vmem:[#allocation6 + $0x1058] sm:$0xff] }
 0xa31   : > { %3445 = vmatpush.msra.mxu0 %v4419_v12  ;;  %v4462_v12 = vld [vmem:[#allocation6 + $0x1140] sm:$0xff] }
 0xa33   : > { %3446 = vmatpush.msra.mxu0 %v4420_v51  ;;  %v4463_v51 = vld [vmem:[#allocation6 + $0x1048] sm:$0xff] }
 0xa35   : > { %3447 = vmatpush.msra.mxu0 %v4421_v44  ;;  %v4464_v44 = vld [vmem:[#allocation6 + $0x1130] sm:$0xff] }
 0xa37   : > { %3448 = vmatpush.msra.mxu0 %v4422_v63  ;;  %v4465_v63 = vld [vmem:[#allocation6 + $0x1038] sm:$0xff] }
 0xa39   : > { %3449 = vmatpush.msra.mxu0 %v4423_v0  ;;  %v4466_v0 = vld [vmem:[#allocation6 + $0x1120] sm:$0xff] }
 0xa3a   : > { %3450 = vmatmul.f32.vlgmr.msra.gmra.mxu0 %v5105_v33 }
 0xa42   : > { %3453 = vmatmul.f32.gmra.mxu0 %v5116_v38 }
 0xa5d   : > { %v3139_v1 = vpop.f32.mrf.mxu3 }
 0xa5e   : > { %v5249_v26 = vadd.f32 %v3139_v1, %v5227_v35  ;;  %v4425_v35 = vld [vmem:[#allocation6 + $0xfe8] sm:$0xff] }
 0xa5f   : > { %v4467_v1 = vld [vmem:[#allocation6 + $0x1028] sm:$0xff] }
 0xa77   : > { %v3264_v28 = vpop.f32.mrf.mxu0 }
 0xa78   : > { %v5252_v50 = vadd.f32 %v3264_v28, %v5230_v40  ;;  %v4427_v40 = vld [vmem:[#allocation6 + $0xfc8] sm:$0xff]  ;;  %v4468_v28 = vld [vmem:[#allocation6 + $0x1110] sm:$0xff] }
 0xa7d   : > { %v3230_v46 = vpop.f32.mrf.mxu3 }
 0xa7e   : > { %v3231_v57 = vadd.f32 %v3230_v46, %v3207_v53  ;;  %v4469_v53 = vld [vmem:[#allocation6 + $0x1018] sm:$0xff]  ;;  %v4470_v46 = vld [vmem:[#allocation6 + $0x1100] sm:$0xff] }
 0xa85   : > { %v3233_v55 = vpop.f32.mrf.mxu3 }
 0xa86   : > { %v3234_v56 = vadd.f32 %v3233_v55, %v3210_v54  ;;  %v4471_v54 = vld [vmem:[#allocation6 + $0x1008] sm:$0xff] }
 0xa88   : > { %3811 = vmatpush.msk.msra.mxu1 %vm681_vm0, %v3234_v56 }
 0xa8a   : > { %3282 = vmatpush.msra.mxu1 %v3231_v57 }
 0xa8b   : > { %3812 = vmatmul.msk.f32.vlgmr.msra.gmra.mxu1 %vm2465_vm2, %v5236_v11 }
 0xa8c   : > { %3358 = vmatpush.msrb.mxu1 %v4424_v58 }
 0xa8e   : > { %3359 = vmatpush.msrb.mxu1 %v4425_v35 }
 0xa90   : > { %3360 = vmatpush.msrb.mxu1 %v4426_v62 }
 0xa92   : > { %3361 = vmatpush.msrb.mxu1 %v4427_v40 }
 0xa94   : > { %3362 = vmatpush.msrb.mxu1 %v4428_v49 }
 0xa96   : > { %3363 = vmatpush.msrb.mxu1 %v4429_v2 }
 0xa97   : > { %v3352_v57 = vpop.f32.mrf.mxu0 }
 0xa98   : > { %3364 = vmatpush.msrb.mxu1 %v4430_v19 }
 0xa9a   : > { %3365 = vmatpush.msrb.mxu1 %v4431_v20  ;;  %v4475_v20 = vld [vmem:[#allocation6 + $0x11c8] sm:$0xff] }
 0xa9c   : > { %3366 = vmatpush.msrb.mxu1 %v4432_v41  ;;  %v4477_v41 = vld [vmem:[#allocation6 + $0x11a8] sm:$0xff] }
 0xa9d   : > { %v3329_v11 = vpop.f32.mrf.mxu3 }
 0xa9e   : > { %3367 = vmatpush.msrb.mxu1 %v4433_v10  ;;  %v3330_v30 = vadd.f32 %v3329_v11, %v3306_v6  ;;  %v4476_v6 = vld [vmem:[#allocation6 + $0x11b8] sm:$0xff]  ;;  %v4479_v10 = vld [vmem:[#allocation6 + $0x1188] sm:$0xff] }
 0xa9f   : > { %v3355_v40 = vpop.f32.mrf.mxu0  ;;  %v4478_v11 = vld [vmem:[#allocation6 + $0x1198] sm:$0xff] }
 0xaa0   : > { %3368 = vmatpush.msrb.mxu1 %v4434_v13 }
 0xaa2   : > { %3369 = vmatpush.msrb.mxu1 %v4435_v14  ;;  %v4480_v14 = vld [vmem:[#allocation6 + $0x1178] sm:$0xff] }
 0xaa4   : > { %3370 = vmatpush.msrb.mxu1 %v4436_v16 }
 0xaa5   : > { %v3332_v18 = vpop.f32.mrf.mxu3 }
 0xaa6   : > { %v3333_v52 = vadd.f32 %v3332_v18, %v3309_v17  ;;  %3371 = vmatpush.msrb.mxu1 %v4437_v22  ;;  %v4481_v17 = vld [vmem:[#allocation6 + $0x1168] sm:$0xff]  ;;  %v4482_v18 = vld [vmem:[#allocation6 + $0x1158] sm:$0xff] }
 0xaa7   : > { %v4484_v22 = vld [vmem:[#allocation6 + $0x1138] sm:$0xff] }
 0xaa8   : > { %3372 = vmatpush.msrb.mxu1 %v4438_v23  ;;  %3813 = vmatpush.msk.msrb.mxu2 %vm681_vm0, %v3333_v52  ;;  %v4483_v52 = vld [vmem:[#allocation6 + $0x1148] sm:$0xff] }
 0xaaa   : > { %3373 = vmatpush.msrb.mxu1 %v4439_v24  ;;  %3407 = vmatpush.msrb.mxu2 %v3330_v30  ;;  %v4485_v24 = vld [vmem:[#allocation6 + $0x1128] sm:$0xff] }
 0xaab   : > { %3374 = vmatmul.f32.vlgmr.msrb.gmra.mxu1 %v5109_v36  ;;  %3814 = vmatmul.msk.f32.vlgmr.msrb.gmra.mxu2 %vm2465_vm2, %v5258_v8 }
 0xaac   : > { %3457 = vmatpush.msra.mxu1 %v4440_v25  ;;  %3480 = vmatpush.msra.mxu2 %v4441_v27  ;;  %v4486_v27 = vld [vmem:[#allocation6 + $0x1118] sm:$0xff] }
 0xaae   : > { %3458 = vmatpush.msra.mxu1 %v4442_v3  ;;  %3481 = vmatpush.msra.mxu2 %v4443_v15  ;;  %v3527_v3 = vld [vmem:[#allocation9 + $0x20] sm:$0xf]  ;;  %v4487_v15 = vld [vmem:[#allocation6 + $0x1108] sm:$0xff] }
 0xab0   : > { %3459 = vmatpush.msra.mxu1 %v4444_v31  ;;  %3482 = vmatpush.msra.mxu2 %v4445_v32 }
 0xab2   : > { %3460 = vmatpush.msra.mxu1 %v4446_v7  ;;  %3483 = vmatpush.msra.mxu2 %v4447_v59 }
 0xab3   : > { %3377 = vmatmul.f32.gmra.mxu1 %v5121_v42 }
 0xab4   : > { %3461 = vmatpush.msra.mxu1 %v4448_v37  ;;  %3484 = vmatpush.msra.mxu2 %v4449_v39 }
 0xab6   : > { %3462 = vmatpush.msra.mxu1 %v4450_v43  ;;  %3485 = vmatpush.msra.mxu2 %v4451_v60 }
 0xab7   : > { %v3451_v13 = vpop.f32.mrf.mxu0 }
 0xab8   : > { %3463 = vmatpush.msra.mxu1 %v4452_v45  ;;  %3486 = vmatpush.msra.mxu2 %v4453_v4 }
 0xaba   : > { %3464 = vmatpush.msra.mxu1 %v4454_v47  ;;  %3487 = vmatpush.msra.mxu2 %v4455_v5 }
 0xabc   : > { %3465 = vmatpush.msra.mxu1 %v4456_v48  ;;  %3488 = vmatpush.msra.mxu2 %v4457_v29 }
 0xabe   : > { %3466 = vmatpush.msra.mxu1 %v4458_v9  ;;  %3489 = vmatpush.msra.mxu2 %v4459_v21  ;;  %v3595_v21 = vld.sshfl [vmem:[#allocation1 + $0x8] sm:$0xff pattern:$0x75316420] }
 0xabf   : > { %v3454_v30 = vpop.f32.mrf.mxu0 }
 0xac0   : > { %3467 = vmatpush.msra.mxu1 %v4460_v34  ;;  %3490 = vmatpush.msra.mxu2 %v4461_v61  ;;  %v3594_v61 = vld.sshfl [vmem:[#allocation1] sm:$0xff pattern:$0x75316420] }
 0xac2   : > { %3468 = vmatpush.msra.mxu1 %v4462_v12  ;;  %3491 = vmatpush.msra.mxu2 %v4463_v51 }
 0xac4   : > { %3469 = vmatpush.msra.mxu1 %v4464_v44  ;;  %3492 = vmatpush.msra.mxu2 %v4465_v63 }
 0xac6   : > { %3470 = vmatpush.msra.mxu1 %v4466_v0  ;;  %3493 = vmatpush.msra.mxu2 %v4467_v1 }
 0xac8   : > { %3471 = vmatpush.msra.mxu1 %v4468_v28  ;;  %3494 = vmatpush.msra.mxu2 %v4469_v53 }
 0xaca   : > { %3472 = vmatpush.msra.mxu1 %v4470_v46  ;;  %3495 = vmatpush.msra.mxu2 %v4471_v54 }
 0xacb   : > { %3473 = vmatmul.f32.vlgmr.msra.gmra.mxu1 %v5109_v36  ;;  %3496 = vmatmul.f32.vlgmr.msra.gmra.mxu2 %v5105_v33  ;;  %v4472_v33 = vld [vmem:[#allocation6 + $0x11f8] sm:$0xff] }
 0xad3   : > { %3476 = vmatmul.f32.gmra.mxu1 %v5121_v42  ;;  %3499 = vmatmul.f32.gmra.mxu2 %v5116_v38  ;;  %v4473_v38 = vld [vmem:[#allocation6 + $0x11e8] sm:$0xff] }
 0xb08   : > { %v3284_v55 = vpop.f32.mrf.mxu1 }
 0xb09   : > { %v3288_v56 = vadd.f32 %v3284_v55, %v5249_v26  ;;  %v4474_v26 = vld [vmem:[#allocation6 + $0x11d8] sm:$0xff] }
 0xb28   : > { %v3375_v58 = vpop.f32.mrf.mxu1 }
 0xb29   : > { %v3376_v19 = vadd.f32 %v3375_v58, %v3352_v57 }
 0xb2e   : > { %v3409_v35 = vpop.f32.mrf.mxu2 }
 0xb2f   : > { %v5270_v62 = vadd.f32 %v3409_v35, %v5252_v50  ;;  %v3579_v50 = vld [vmem:[%s5328_s7] sm:$0xf] }
 0xb30   : > { %v3378_v49 = vpop.f32.mrf.mxu1  ;;  %3582 = vperm.xlu1 %3911, %v3579_v50  }
 0xb31   : > { %v3379_v2 = vadd.f32 %v3378_v49, %v3355_v40 }
 0xb33   : > { %3815 = vmatpush.msk.msrb.mxu3 %vm681_vm0, %v3379_v2 }
 0xb35   : > { %3427 = vmatpush.msrb.mxu3 %v3376_v19 }
 0xb36   : > { %3816 = vmatmul.msk.f32.vlgmr.msrb.gmra.mxu3 %vm2465_vm2, %v5258_v8 }
 0xb37   : > { %3503 = vmatpush.msra.mxu3 %v4472_v33 }
 0xb39   : > { %3504 = vmatpush.msra.mxu3 %v4473_v38 }
 0xb3b   : > { %3505 = vmatpush.msra.mxu3 %v4474_v26 }
 0xb3d   : > { %3506 = vmatpush.msra.mxu3 %v4475_v20 }
 0xb3f   : > { %3507 = vmatpush.msra.mxu3 %v4476_v6 }
 0xb41   : > { %3508 = vmatpush.msra.mxu3 %v4477_v41 }
 0xb43   : > { %3509 = vmatpush.msra.mxu3 %v4478_v11 }
 0xb45   : > { %3510 = vmatpush.msra.mxu3 %v4479_v10 }
 0xb47   : > { %3511 = vmatpush.msra.mxu3 %v4480_v14 }
 0xb48   : > { %v3474_v16 = vpop.f32.mrf.mxu1 }
 0xb49   : > { %3512 = vmatpush.msra.mxu3 %v4481_v17  ;;  %v3475_v25 = vadd.f32 %v3474_v16, %v3451_v13 }
 0xb4b   : > { %3513 = vmatpush.msra.mxu3 %v4482_v18 }
 0xb4d   : > { %3514 = vmatpush.msra.mxu3 %v4483_v52 }
 0xb4e   : > { %v3497_v7 = vpop.f32.mrf.mxu2 }
 0xb4f   : > { %3515 = vmatpush.msra.mxu3 %v4484_v22 }
 0xb50   : > { %v3477_v23 = vpop.f32.mrf.mxu1 }
 0xb51   : > { %v3478_v8 = vadd.f32 %v3477_v23, %v3454_v30  ;;  %3516 = vmatpush.msra.mxu3 %v4485_v24 }
 0xb53   : > { %3517 = vmatpush.msra.mxu3 %v4486_v27  ;;  %3817 = vmatpush.msk.msrb.mxu0 %vm681_vm0, %v3478_v8 }
 0xb55   : > { %3518 = vmatpush.msra.mxu3 %v4487_v15  ;;  %3552 = vmatpush.msrb.mxu0 %v3475_v25 }
 0xb56   : > { %3519 = vmatmul.f32.vlgmr.msra.gmra.mxu3 %v5109_v36  ;;  %3818 = vmatmul.msk.f32.vlgmr.msrb.gmra.mxu0 %vm2465_vm2, %v3527_v3  ;;  %v3500_v37 = vpop.f32.mrf.mxu2 }
 0xb5e   : > { %3522 = vmatmul.f32.gmra.mxu3 %v5121_v42 }
 0xba2   : > { %v3583_v4 = vpop.permute.xlu1 %3582 }
 0xbb9   : > { %v3429_v31 = vpop.f32.mrf.mxu3 }
 0xbba   : > { %v3433_v32 = vadd.f32 %v3429_v31, %v3288_v56 }
 0xbd3   : > { %v3554_v45 = vpop.f32.mrf.mxu0 }
 0xbd4   : > { %v3577_v36 = vadd.f32 %v3554_v45, %v5270_v62 }
 0xbd6   : > { %v3585_v42 = vadd.f32 %v3583_v4, %v3577_v36 }
 0xbd8   : > { %v3589_v48 = vmul.f32 0.1, %v3585_v42  ;;  %vm3587_vm3 = vcmp.ge.f32.partialorder %v3585_v42, 0.0 }
 0xbd9   : > { %v3520_v59 = vpop.f32.mrf.mxu3 }
 0xbda   : > { %v3521_v60 = vadd.f32 %v3520_v59, %v3497_v7  ;;  %v3591_v34 = vsel %vm3587_vm3, %v3585_v42, %v3589_v48 }
 0xbdb   : > { %v3598_v44 = vadd.f32 %v3594_v61, %v3591_v34 }
 0xbe1   : > { %v3523_v39 = vpop.f32.mrf.mxu3 }
 0xbe2   : > { %v3524_v43 = vadd.f32 %v3523_v39, %v3500_v37 }
 0xbe4   : > { %3819 = vmatpush.msk.msrb.mxu1 %vm681_vm0, %v3524_v43 }
 0xbe6   : > { %3572 = vmatpush.msrb.mxu1 %v3521_v60 }
 0xbe7   : > { %3820 = vmatmul.msk.f32.vlgmr.msrb.gmra.mxu1 %vm2465_vm2, %v3527_v3 }
 0xc64   : > { %v3574_v47 = vpop.f32.mrf.mxu1 }
 0xc65   : > { %v3578_v5 = vadd.f32 %v3574_v47, %v3433_v32 }
 0xc67   : > { %v3586_v29 = vadd.f32 %v3583_v4, %v3578_v5 }
 0xc69   : > { %vm3588_vm4 = vcmp.ge.f32.partialorder %v3586_v29, 0.0  ;;  %v3590_v9 = vmul.f32 0.1, %v3586_v29 }
 0xc6b   : > { %v3592_v12 = vsel %vm3588_vm4, %v3586_v29, %v3590_v9 }
 0xc6c   : > { %v3599_v51 = vadd.f32 %v3595_v21, %v3592_v12 }
 0xc6e   : > { %v3602_v63 = vrot.slane %v3599_v51, 4 }
 0xc70   : > { %v3603_v0 = vsel %vm681_vm0, %v3598_v44, %v3602_v63 }
 0xc71   : > { %3605 = vst [vmem:[%s372_s20] sm:$0xff] %v3603_v0 }
 0xc72   : > { %4635 = shalt.err (!%p4632_p9)
}
 0xc73   : > { %3842 = dma.vmem_to_hbm [thread:$0]  (%p4816_p13), %s3621_s5, 128, %s3623_s13, %s3607_s15  }
 0xc74 PF: > { %s3634_s22 = sand.u32 1, %s4670_s29   ;;  %p5338_p10 = scmp.ge.s32.totalorder %s4682_s10, 2 }
 0xc75   : > { %s3635_s28 = scalar_lea.sflag [#allocation5], %s3634_s22 }
 0xc76   : > { %p3859_p11 = pnand %p5338_p10, %p4821_p4 }
 0xc78   : > { %p3860_p0 = pneg %p3859_p11 }
 0xc7a   : > { %4665 = dma.done.wait (%p3860_p0), %s3635_s28, 128  }
 0xc7b   : > { %4667 = vsyncadd (%p3860_p0), %s3635_s28, 4294967168  ;;  %p24_p2 = scmp.ge.s32.totalorder %s4796_s12, 4   ;;  %s5339_s29 = smov %s4674_s30 }
 0xc7c   : > { %s5340_s30 = smov %s4678_s9  ;;  %s5341_s9 = smov %s4808_s19 }
 0xc7d   : > { %s5342_s10 = smov %s4796_s12  ;;  %26 = sbr.rel (!%p24_p2) target bundleno = 10 (0xa), region = 133 }
 0xc82   :  { %3641 = vsyncpa [#allocation4], 1 }
 0xc83   :  { %3643 = vsyncpa [#allocation4 + $0x1], 1 }
 0xc84   :  { %3644 = vsyncpa [#allocation7], 1 }
 0xc85   :  { %3645 = vsyncpa [#allocation10], 1 }
 0xc86   :  { %3646 = vsyncpa [#allocation5], 1 }
 0xc87   :  { %3648 = vsyncpa [#allocation5 + $0x1], 1 }

</bundles_post_ra>
